<compile_context>
chip_gen: v6e
topology: v6e:2x2x1
jax: 0.10.0
libtpu: 0.0.40
codegen_flags: <defaults>
</compile_context>

<pallas_src>
import jax
import jax.numpy as jnp
from jax.experimental import pallas as pl
from jax.experimental.pallas import tpu as pltpu


DIMS = [768, 600, 500, 100, 500, 600, 768]
RELU = [True, True, False, False, True, False]          # activation per layer


def _round_up(n, m):
    return (n + m - 1) // m * m


DIMS_P = [_round_up(d, 128) for d in DIMS]               # 768,640,512,128,512,640,768


# ---------------------------------------------------------------------------
# Kernel
# ---------------------------------------------------------------------------
def autoencoder_kernel(x_ref,
                       w1, b1, w2, b2, w3, b3,           # encoder
                       w4, b4, w5, b5, w6, b6,           # decoder
                       out_ref):
    def dense(h_bf16, w_ref, b_ref, relu):
        # bf16 operands, f32 accumulation on the MXU, f32 bias add (VPU).
        y = jnp.dot(h_bf16, w_ref[...], preferred_element_type=jnp.float32)
        y = y + b_ref[...]
        if relu:
            y = jnp.maximum(y, 0.0)
        return y

    h = dense(x_ref[...], w1, b1, True).astype(jnp.bfloat16)
    h = dense(h,          w2, b2, True).astype(jnp.bfloat16)
    z = dense(h,          w3, b3, False).astype(jnp.bfloat16)
    d = dense(z,          w4, b4, False).astype(jnp.bfloat16)
    d = dense(d,          w5, b5, True).astype(jnp.bfloat16)
    y = dense(d,          w6, b6, False)                  # final layer stays f32
    out_ref[...] = y.astype(out_ref.dtype)


# ---------------------------------------------------------------------------
# One-time parameter preparation (pad to 128-lane multiples, cast to bf16)
# ---------------------------------------------------------------------------
def prepare_params(params):
    """params: dict layer{i} -> (W (in,out) f32, b (out,) f32).
    Returns a flat tuple (w1,b1,...,w6,b6) of padded bf16 weights / f32 biases."""
    flat = []
    for i in range(6):
        w, b = params[f"layer{i}"]
        rows_p, cols_p = DIMS_P[i], DIMS_P[i + 1]
        w_p = jnp.pad(w, ((0, rows_p - w.shape[0]), (0, cols_p - w.shape[1])))
        b_p = jnp.pad(b.reshape(1, -1), ((0, 0), (0, cols_p - b.shape[0])))
        flat.append(w_p.astype(jnp.bfloat16))
        flat.append(b_p.astype(jnp.float32))
    return tuple(flat)


# ---------------------------------------------------------------------------
# Forward
# ---------------------------------------------------------------------------
@jax.jit
def autoencoder_forward(x, flat_params):
    """x: (B, 768) f32. flat_params: output of prepare_params."""
    B, F = x.shape
    assert F == 768

    # bf16 sublane packing is (16,128) -> batch tile must be a multiple of 16.
    # Cap at 512: amortizes per-grid-step overhead for large batches while the
    # per-step activation footprint stays a few MiB.
    tile_b = max(16, min(512, _round_up(B, 16)))
    Bp = _round_up(B, tile_b)

    x_p = jnp.pad(x, ((0, Bp - B), (0, 0))).astype(jnp.bfloat16)

    grid = (Bp // tile_b,)

    def resident(a):   # weights/biases: same block every step -> VMEM-resident
        return pl.BlockSpec(a.shape, lambda i: (0, 0))

    in_specs = ([pl.BlockSpec((tile_b, DIMS_P[0]), lambda i: (i, 0))]
                + [resident(a) for a in flat_params])
    out_spec = pl.BlockSpec((tile_b, DIMS_P[-1]), lambda i: (i, 0))

    flops = 2 * Bp * sum(DIMS_P[i] * DIMS_P[i + 1] for i in range(6))
    w_bytes = sum(int(a.size) * a.dtype.itemsize for a in flat_params)
    bytes_accessed = w_bytes + Bp * DIMS_P[0] * 2 + Bp * DIMS_P[-1] * 4

    out = pl.pallas_call(
        autoencoder_kernel,
        out_shape=jax.ShapeDtypeStruct((Bp, DIMS_P[-1]), jnp.float32),
        grid=grid,
        in_specs=in_specs,
        out_specs=out_spec,
        compiler_params=pltpu.CompilerParams(
            dimension_semantics=("parallel",),
            vmem_limit_bytes=32 << 20,     # valid on v5e/v6e/v7x; usage ~10-15 MiB
        ),
        cost_estimate=pl.CostEstimate(
            flops=flops, transcendentals=0, bytes_accessed=bytes_accessed),
    )(x_p, *flat_params)

    return out[:B, :768]


# ---------------------------------------------------------------------------
# Init + references
# ---------------------------------------------------------------------------
def init_params(key):
    """PyTorch-Linear-like init (uniform +-1/sqrt(fan_in)); W stored (in,out)."""
    params = {}
    for i in range(6):
        fan_in, fan_out = DIMS[i], DIMS[i + 1]
        key, kw, kb = jax.random.split(key, 3)
        bound = 1.0 / jnp.sqrt(fan_in)
        w = jax.random.uniform(kw, (fan_in, fan_out), jnp.float32, -bound, bound)
        b = jax.random.uniform(kb, (fan_out,), jnp.float32, -bound, bound)
        params[f"layer{i}"] = (w, b)
    return params


def reference_forward_f32(x, params):
    h = x
    for i in range(6):
        w, b = params[f"layer{i}"]
        h = h @ w + b
        if RELU[i]:
            h = jnp.maximum(h, 0.0)
    return h


def reference_forward_bf16(x, params):
    """Mimics the kernel's numerics: bf16 operands, f32 accumulation/bias."""
    h = x
    for i in range(6):
        w, b = params[f"layer{i}"]
        h = jnp.dot(h.astype(jnp.bfloat16), w.astype(jnp.bfloat16),
                    preferred_element_type=jnp.float32) + b
        if RELU[i]:
            h = jnp.maximum(h, 0.0)
    return h


if __name__ == "__main__":
    key = jax.random.PRNGKey(0)
    kp, kx = jax.random.split(key)
    params = init_params(kp)
    flat_params = prepare_params(params)     # pad + cast once, outside the call

    batch = 8
    x = jax.random.normal(kx, (batch, 768), jnp.float32)

    y = autoencoder_forward(x, flat_params)
    y = jax.block_until_ready(y)
    assert y.shape == (batch, 768)

    y_ref_bf16 = reference_forward_bf16(x, params)
    y_ref_f32 = reference_forward_f32(x, params)

    # Tight check against a bf16-matched reference; loose sanity check vs f32.
    assert jnp.allclose(y, y_ref_bf16, atol=1e-2, rtol=1e-2), (
        float(jnp.max(jnp.abs(y - y_ref_bf16))))
    assert jnp.allclose(y, y_ref_f32, atol=1e-1, rtol=1e-1), (
        float(jnp.max(jnp.abs(y - y_ref_f32))))

    print("KERNEL_OK")
</pallas_src>

<mosaic_0001>
module attributes {stable_mosaic.version = 11 : i64} {
  func.func @autoencoder_kernel(%arg0: i32, %arg1: memref<16x768xbf16, #tpu.memory_space<vmem>>, %arg2: memref<768x640xbf16, #tpu.memory_space<vmem>>, %arg3: memref<1x640xf32, #tpu.memory_space<vmem>>, %arg4: memref<640x512xbf16, #tpu.memory_space<vmem>>, %arg5: memref<1x512xf32, #tpu.memory_space<vmem>>, %arg6: memref<512x128xbf16, #tpu.memory_space<vmem>>, %arg7: memref<1x128xf32, #tpu.memory_space<vmem>>, %arg8: memref<128x512xbf16, #tpu.memory_space<vmem>>, %arg9: memref<1x512xf32, #tpu.memory_space<vmem>>, %arg10: memref<512x640xbf16, #tpu.memory_space<vmem>>, %arg11: memref<1x640xf32, #tpu.memory_space<vmem>>, %arg12: memref<640x768xbf16, #tpu.memory_space<vmem>>, %arg13: memref<1x768xf32, #tpu.memory_space<vmem>>, %arg14: memref<16x768xf32, #tpu.memory_space<vmem>>) attributes {dimension_semantics = [#tpu.dimension_semantics<parallel>], iteration_bounds = array<i64: 1>, scalar_prefetch = 0 : i64, scratch_operands = 0 : i64, tpu.core_type = #tpu.core_type<tc>, window_params = [{transform_indices = @transform_0, window_bounds = array<i64: 16, 768>}, {pipeline_mode = #tpu.pipeline_mode<synchronous>, transform_indices = @transform_1, window_bounds = array<i64: 768, 640>}, {pipeline_mode = #tpu.pipeline_mode<synchronous>, transform_indices = @transform_2, window_bounds = array<i64: 1, 640>}, {pipeline_mode = #tpu.pipeline_mode<synchronous>, transform_indices = @transform_3, window_bounds = array<i64: 640, 512>}, {pipeline_mode = #tpu.pipeline_mode<synchronous>, transform_indices = @transform_4, window_bounds = array<i64: 1, 512>}, {pipeline_mode = #tpu.pipeline_mode<synchronous>, transform_indices = @transform_5, window_bounds = array<i64: 512, 128>}, {pipeline_mode = #tpu.pipeline_mode<synchronous>, transform_indices = @transform_6, window_bounds = array<i64: 1, 128>}, {pipeline_mode = #tpu.pipeline_mode<synchronous>, transform_indices = @transform_7, window_bounds = array<i64: 128, 512>}, {pipeline_mode = #tpu.pipeline_mode<synchronous>, transform_indices = @transform_8, window_bounds = array<i64: 1, 512>}, {pipeline_mode = #tpu.pipeline_mode<synchronous>, transform_indices = @transform_9, window_bounds = array<i64: 512, 640>}, {pipeline_mode = #tpu.pipeline_mode<synchronous>, transform_indices = @transform_10, window_bounds = array<i64: 1, 640>}, {pipeline_mode = #tpu.pipeline_mode<synchronous>, transform_indices = @transform_11, window_bounds = array<i64: 640, 768>}, {pipeline_mode = #tpu.pipeline_mode<synchronous>, transform_indices = @transform_12, window_bounds = array<i64: 1, 768>}, {transform_indices = @transform_13, window_bounds = array<i64: 16, 768>}]} {
    %c0 = arith.constant 0 : index
    %c0_0 = arith.constant 0 : index
    %0 = vector.load %arg1[%c0, %c0_0] : memref<16x768xbf16, #tpu.memory_space<vmem>>, vector<16x768xbf16>
    %c0_1 = arith.constant 0 : index
    %c0_2 = arith.constant 0 : index
    %1 = vector.load %arg2[%c0_1, %c0_2] : memref<768x640xbf16, #tpu.memory_space<vmem>>, vector<768x640xbf16>
    %cst = arith.constant dense<0.000000e+00> : vector<16x640xf32>
    %2 = tpu.matmul %0, %1, %cst {dimension_numbers = #tpu.dot_dimension_numbers<[1], [0], [0], [1], [0, 0, 1, 1], [], []>} : vector<16x768xbf16>, vector<768x640xbf16>, vector<16x640xf32> -> vector<16x640xf32>
    %c0_3 = arith.constant 0 : index
    %c0_4 = arith.constant 0 : index
    %3 = vector.load %arg3[%c0_3, %c0_4] : memref<1x640xf32, #tpu.memory_space<vmem>>, vector<1x640xf32>
    %4 = vector.broadcast %3 : vector<1x640xf32> to vector<16x640xf32>
    %5 = arith.addf %2, %4 : vector<16x640xf32>
    %cst_5 = arith.constant 0.000000e+00 : f32
    %6 = vector.broadcast %cst_5 : f32 to vector<16x640xf32>
    %7 = arith.maximumf %5, %6 : vector<16x640xf32>
    %8 = arith.truncf %7 : vector<16x640xf32> to vector<16x640xbf16>
    %c0_6 = arith.constant 0 : index
    %c0_7 = arith.constant 0 : index
    %9 = vector.load %arg4[%c0_6, %c0_7] : memref<640x512xbf16, #tpu.memory_space<vmem>>, vector<640x512xbf16>
    %cst_8 = arith.constant dense<0.000000e+00> : vector<16x512xf32>
    %10 = tpu.matmul %8, %9, %cst_8 {dimension_numbers = #tpu.dot_dimension_numbers<[1], [0], [0], [1], [0, 0, 1, 1], [], []>} : vector<16x640xbf16>, vector<640x512xbf16>, vector<16x512xf32> -> vector<16x512xf32>
    %c0_9 = arith.constant 0 : index
    %c0_10 = arith.constant 0 : index
    %11 = vector.load %arg5[%c0_9, %c0_10] : memref<1x512xf32, #tpu.memory_space<vmem>>, vector<1x512xf32>
    %12 = vector.broadcast %11 : vector<1x512xf32> to vector<16x512xf32>
    %13 = arith.addf %10, %12 : vector<16x512xf32>
    %cst_11 = arith.constant 0.000000e+00 : f32
    %14 = vector.broadcast %cst_11 : f32 to vector<16x512xf32>
    %15 = arith.maximumf %13, %14 : vector<16x512xf32>
    %16 = arith.truncf %15 : vector<16x512xf32> to vector<16x512xbf16>
    %c0_12 = arith.constant 0 : index
    %c0_13 = arith.constant 0 : index
    %17 = vector.load %arg6[%c0_12, %c0_13] : memref<512x128xbf16, #tpu.memory_space<vmem>>, vector<512x128xbf16>
    %cst_14 = arith.constant dense<0.000000e+00> : vector<16x128xf32>
    %18 = tpu.matmul %16, %17, %cst_14 {dimension_numbers = #tpu.dot_dimension_numbers<[1], [0], [0], [1], [0, 0, 1, 1], [], []>} : vector<16x512xbf16>, vector<512x128xbf16>, vector<16x128xf32> -> vector<16x128xf32>
    %c0_15 = arith.constant 0 : index
    %c0_16 = arith.constant 0 : index
    %19 = vector.load %arg7[%c0_15, %c0_16] : memref<1x128xf32, #tpu.memory_space<vmem>>, vector<1x128xf32>
    %20 = vector.broadcast %19 : vector<1x128xf32> to vector<16x128xf32>
    %21 = arith.addf %18, %20 : vector<16x128xf32>
    %22 = arith.truncf %21 : vector<16x128xf32> to vector<16x128xbf16>
    %c0_17 = arith.constant 0 : index
    %c0_18 = arith.constant 0 : index
    %23 = vector.load %arg8[%c0_17, %c0_18] : memref<128x512xbf16, #tpu.memory_space<vmem>>, vector<128x512xbf16>
    %cst_19 = arith.constant dense<0.000000e+00> : vector<16x512xf32>
    %24 = tpu.matmul %22, %23, %cst_19 {dimension_numbers = #tpu.dot_dimension_numbers<[1], [0], [0], [1], [0, 0, 1, 1], [], []>} : vector<16x128xbf16>, vector<128x512xbf16>, vector<16x512xf32> -> vector<16x512xf32>
    %c0_20 = arith.constant 0 : index
    %c0_21 = arith.constant 0 : index
    %25 = vector.load %arg9[%c0_20, %c0_21] : memref<1x512xf32, #tpu.memory_space<vmem>>, vector<1x512xf32>
    %26 = vector.broadcast %25 : vector<1x512xf32> to vector<16x512xf32>
    %27 = arith.addf %24, %26 : vector<16x512xf32>
    %28 = arith.truncf %27 : vector<16x512xf32> to vector<16x512xbf16>
    %c0_22 = arith.constant 0 : index
    %c0_23 = arith.constant 0 : index
    %29 = vector.load %arg10[%c0_22, %c0_23] : memref<512x640xbf16, #tpu.memory_space<vmem>>, vector<512x640xbf16>
    %cst_24 = arith.constant dense<0.000000e+00> : vector<16x640xf32>
    %30 = tpu.matmul %28, %29, %cst_24 {dimension_numbers = #tpu.dot_dimension_numbers<[1], [0], [0], [1], [0, 0, 1, 1], [], []>} : vector<16x512xbf16>, vector<512x640xbf16>, vector<16x640xf32> -> vector<16x640xf32>
    %c0_25 = arith.constant 0 : index
    %c0_26 = arith.constant 0 : index
    %31 = vector.load %arg11[%c0_25, %c0_26] : memref<1x640xf32, #tpu.memory_space<vmem>>, vector<1x640xf32>
    %32 = vector.broadcast %31 : vector<1x640xf32> to vector<16x640xf32>
    %33 = arith.addf %30, %32 : vector<16x640xf32>
    %cst_27 = arith.constant 0.000000e+00 : f32
    %34 = vector.broadcast %cst_27 : f32 to vector<16x640xf32>
    %35 = arith.maximumf %33, %34 : vector<16x640xf32>
    %36 = arith.truncf %35 : vector<16x640xf32> to vector<16x640xbf16>
    %c0_28 = arith.constant 0 : index
    %c0_29 = arith.constant 0 : index
    %37 = vector.load %arg12[%c0_28, %c0_29] : memref<640x768xbf16, #tpu.memory_space<vmem>>, vector<640x768xbf16>
    %cst_30 = arith.constant dense<0.000000e+00> : vector<16x768xf32>
    %38 = tpu.matmul %36, %37, %cst_30 {dimension_numbers = #tpu.dot_dimension_numbers<[1], [0], [0], [1], [0, 0, 1, 1], [], []>} : vector<16x640xbf16>, vector<640x768xbf16>, vector<16x768xf32> -> vector<16x768xf32>
    %c0_31 = arith.constant 0 : index
    %c0_32 = arith.constant 0 : index
    %39 = vector.load %arg13[%c0_31, %c0_32] : memref<1x768xf32, #tpu.memory_space<vmem>>, vector<1x768xf32>
    %40 = vector.broadcast %39 : vector<1x768xf32> to vector<16x768xf32>
    %41 = arith.addf %38, %40 : vector<16x768xf32>
    %c0_33 = arith.constant 0 : index
    %c0_34 = arith.constant 0 : index
    %42 = vector.load %arg14[%c0_33, %c0_34] : memref<16x768xf32, #tpu.memory_space<vmem>>, vector<16x768xf32>
    tpu.vector_store %arg14[%c0_33, %c0_34], %41 {strides = array<i32>} : memref<16x768xf32, #tpu.memory_space<vmem>>, vector<16x768xf32>,
    return
  }
  func.func @transform_0(%arg0: i32) -> (i32, i32) {
    %c0_i32 = arith.constant 0 : i32
    %c0_i32_0 = arith.constant 0 : i32
    return %arg0, %c0_i32 : i32, i32
  }
  func.func @transform_1(%arg0: i32) -> (i32, i32) {
    %c0_i32 = arith.constant 0 : i32
    %c0_i32_0 = arith.constant 0 : i32
    %c0_i32_1 = arith.constant 0 : i32
    return %c0_i32, %c0_i32_0 : i32, i32
  }
  func.func @transform_2(%arg0: i32) -> (i32, i32) {
    %c0_i32 = arith.constant 0 : i32
    %c0_i32_0 = arith.constant 0 : i32
    %c0_i32_1 = arith.constant 0 : i32
    return %c0_i32, %c0_i32_0 : i32, i32
  }
  func.func @transform_3(%arg0: i32) -> (i32, i32) {
    %c0_i32 = arith.constant 0 : i32
    %c0_i32_0 = arith.constant 0 : i32
    %c0_i32_1 = arith.constant 0 : i32
    return %c0_i32, %c0_i32_0 : i32, i32
  }
  func.func @transform_4(%arg0: i32) -> (i32, i32) {
    %c0_i32 = arith.constant 0 : i32
    %c0_i32_0 = arith.constant 0 : i32
    %c0_i32_1 = arith.constant 0 : i32
    return %c0_i32, %c0_i32_0 : i32, i32
  }
  func.func @transform_5(%arg0: i32) -> (i32, i32) {
    %c0_i32 = arith.constant 0 : i32
    %c0_i32_0 = arith.constant 0 : i32
    %c0_i32_1 = arith.constant 0 : i32
    return %c0_i32, %c0_i32_0 : i32, i32
  }
  func.func @transform_6(%arg0: i32) -> (i32, i32) {
    %c0_i32 = arith.constant 0 : i32
    %c0_i32_0 = arith.constant 0 : i32
    %c0_i32_1 = arith.constant 0 : i32
    return %c0_i32, %c0_i32_0 : i32, i32
  }
  func.func @transform_7(%arg0: i32) -> (i32, i32) {
    %c0_i32 = arith.constant 0 : i32
    %c0_i32_0 = arith.constant 0 : i32
    %c0_i32_1 = arith.constant 0 : i32
    return %c0_i32, %c0_i32_0 : i32, i32
  }
  func.func @transform_8(%arg0: i32) -> (i32, i32) {
    %c0_i32 = arith.constant 0 : i32
    %c0_i32_0 = arith.constant 0 : i32
    %c0_i32_1 = arith.constant 0 : i32
    return %c0_i32, %c0_i32_0 : i32, i32
  }
  func.func @transform_9(%arg0: i32) -> (i32, i32) {
    %c0_i32 = arith.constant 0 : i32
    %c0_i32_0 = arith.constant 0 : i32
    %c0_i32_1 = arith.constant 0 : i32
    return %c0_i32, %c0_i32_0 : i32, i32
  }
  func.func @transform_10(%arg0: i32) -> (i32, i32) {
    %c0_i32 = arith.constant 0 : i32
    %c0_i32_0 = arith.constant 0 : i32
    %c0_i32_1 = arith.constant 0 : i32
    return %c0_i32, %c0_i32_0 : i32, i32
  }
  func.func @transform_11(%arg0: i32) -> (i32, i32) {
    %c0_i32 = arith.constant 0 : i32
    %c0_i32_0 = arith.constant 0 : i32
    %c0_i32_1 = arith.constant 0 : i32
    return %c0_i32, %c0_i32_0 : i32, i32
  }
  func.func @transform_12(%arg0: i32) -> (i32, i32) {
    %c0_i32 = arith.constant 0 : i32
    %c0_i32_0 = arith.constant 0 : i32
    %c0_i32_1 = arith.constant 0 : i32
    return %c0_i32, %c0_i32_0 : i32, i32
  }
  func.func @transform_13(%arg0: i32) -> (i32, i32) {
    %c0_i32 = arith.constant 0 : i32
    %c0_i32_0 = arith.constant 0 : i32
    return %arg0, %c0_i32 : i32, i32
  }
}

</mosaic_0001>

<bundles_post_ra>
// kernel: autoencoder_forward.1
= control target key start
LH: loop header
LB: loop body
LE: loop exit
PB: predicated region body
PF: predicated region fallthrough
CT: control target
= control target key end

     0   :  { %18 = vsyncpa [#allocation3], 0  ;;  %s10000_s0 = inlined_call_operand.vmem [shape: bf16[16,768], index: 0, kind: input, shape index: {}]   ;;  %s10001_s1 = inlined_call_operand.hbm [shape: bf16[768,640], index: 1, kind: input, shape index: {}]   ;;  %s10002_s2 = inlined_call_operand.vmem [shape: f32[1,640], index: 2, kind: input, shape index: {}]   ;;  %s10003_s3 = inlined_call_operand.hbm [shape: bf16[640,512], index: 3, kind: input, shape index: {}]   ;;  %s10004_s4 = inlined_call_operand.vmem [shape: f32[1,512], index: 4, kind: input, shape index: {}]   ;;  %s10005_s5 = inlined_call_operand.hbm [shape: bf16[512,128], index: 5, kind: input, shape index: {}]   ;;  %s10006_s6 = inlined_call_operand.vmem [shape: f32[1,128], index: 6, kind: input, shape index: {}]   ;;  %s10007_s7 = inlined_call_operand.hbm [shape: bf16[128,512], index: 7, kind: input, shape index: {}]   ;;  %s10008_s8 = inlined_call_operand.vmem [shape: f32[1,512], index: 8, kind: input, shape index: {}]   ;;  %s10009_s9 = inlined_call_operand.hbm [shape: bf16[512,640], index: 9, kind: input, shape index: {}]   ;;  %s10010_s10 = inlined_call_operand.vmem [shape: f32[1,640], index: 10, kind: input, shape index: {}]   ;;  %s10011_s11 = inlined_call_operand.hbm [shape: bf16[640,768], index: 11, kind: input, shape index: {}]   ;;  %s10012_s12 = inlined_call_operand.vmem [shape: f32[1,768], index: 12, kind: input, shape index: {}]   ;;  %s10013_s13 = inlined_call_operand.vmem [shape: f32[16,768], index: 13, kind: output, shape index: {}]  }
   0x1   :  { %19 = vsyncpa [#allocation5], 0 }
   0x2   :  { %20 = vsyncpa [#allocation8], 0 }
   0x3   :  { %21 = vsyncpa [#allocation11], 0  ;;  %s9646_s25 = smov [#allocation4]  }
   0x4   :  { %s43_s26 = sshll.u32 %s9646_s25, 4  ;;  %s44_s26 = int_to_ptr.vmem [resolvable:$true] %s43_s26 }
   0x5   :  { %s9526_s27 = scalar_lea.vmem %s44_s26, 20480  ;;  %p9531_p1 = scmp.lt.s32.totalorder %s44_s26, %s44_s26 }
   0x6   :  { %p9527_p0 = scmp.ne.s32.totalorder %s44_s26, %s9526_s27  ;;  %p9532_p2 = scmp.lt.s32.totalorder %s9526_s27, %s9526_s27 }
   0x8   :  { %p9533_p3 = por %p9532_p2, %p9531_p1 }
   0xa   :  { %p9534_p4 = pnand %p9533_p3, %p9527_p0 }
   0xc   :  { %9537 = shalt.err (!%p9534_p4)
}
   0xd   :  { %s9647_s28 = smov 256   ;;  %s9648_s29 = smov 16  }
   0xe   :  { %49 = dma.hbm_to_vmem [thread:$0]  %s10003_s3, 20480, %s44_s26, [#allocation5], %s9647_s28, %s9647_s28, %s9648_s29  }
   0xf   :  { %s9649_s15 = smov [#allocation7]   ;;  %s9650_s17 = smov [#allocation2]  }
  0x10   :  { %s71_s16 = sshll.u32 %s9649_s15, 4  ;;  %s29_s18 = sshll.u32 %s9650_s17, 4  ;;  %s72_s16 = int_to_ptr.vmem [resolvable:$true] %s71_s16  ;;  %s30_s18 = int_to_ptr.vmem [resolvable:$true] %s29_s18 }
  0x11   :  { %s9546_s19 = scalar_lea.vmem %s72_s16, 4096  ;;  %p9551_p6 = scmp.lt.s32.totalorder %s72_s16, %s72_s16 }
  0x12   :  { %p9547_p5 = scmp.ne.s32.totalorder %s72_s16, %s9546_s19  ;;  %p9552_p7 = scmp.lt.s32.totalorder %s9546_s19, %s9546_s19 }
  0x14   :  { %p9553_p8 = por %p9552_p7, %p9551_p6 }
  0x16   :  { %p9554_p9 = pnand %p9553_p8, %p9547_p5 }
  0x18   :  { %9557 = shalt.err (!%p9554_p9)
}
  0x19   :  { %77 = dma.hbm_to_vmem [thread:$0]  %s10007_s7, 4096, %s72_s16, [#allocation8], %s9647_s28, %s9647_s28, %s9648_s29  }
  0x1a   :  { %s9566_s22 = scalar_lea.vmem %s30_s18, 30720  ;;  %p9571_p11 = scmp.lt.s32.totalorder %s30_s18, %s30_s18 }
  0x1b   :  { %p9567_p10 = scmp.ne.s32.totalorder %s30_s18, %s9566_s22  ;;  %p9572_p12 = scmp.lt.s32.totalorder %s9566_s22, %s9566_s22 }
  0x1d   :  { %p9573_p13 = por %p9572_p12, %p9571_p11 }
  0x1f   :  { %p9574_p0 = pnand %p9573_p13, %p9567_p10 }
  0x21   :  { %9577 = shalt.err (!%p9574_p0)
}
  0x22   :  { %s9651_s3 = smov 320   ;;  %s9652_s23 = smov 20  }
  0x23   :  { %35 = dma.hbm_to_vmem [thread:$0]  %s10001_s1, 30720, %s30_s18, [#allocation3], %s9651_s3, %s9651_s3, %s9652_s23  }
  0x24   :  { %s9653_s26 = smov [#allocation6]  }
  0x25   :  { %s57_s27 = sshll.u32 %s9653_s26, 4  ;;  %s58_s27 = int_to_ptr.vmem [resolvable:$true] %s57_s27 }
  0x26   :  { %s9586_s7 = scalar_lea.vmem %s58_s27, 4096  ;;  %p9591_p2 = scmp.lt.s32.totalorder %s58_s27, %s58_s27 }
  0x27   :  { %p9587_p1 = scmp.ne.s32.totalorder %s58_s27, %s9586_s7  ;;  %p9592_p3 = scmp.lt.s32.totalorder %s9586_s7, %s9586_s7 }
  0x29   :  { %p9593_p4 = por %p9592_p3, %p9591_p2 }
  0x2b   :  { %p9594_p5 = pnand %p9593_p4, %p9587_p1 }
  0x2d   :  { %9597 = shalt.err (!%p9594_p5)
}
  0x2e   :  { %s9654_s28 = smov 64   ;;  %s9655_s29 = smov 4  }
  0x2f   :  { %63 = dma.hbm_to_vmem [thread:$0]  %s10005_s5, 4096, %s58_s27, [#allocation5], %s9654_s28, %s9654_s28, %s9655_s29  }
  0x30   :  { %s9656_s15 = smov [#allocation9]   ;;  %s9657_s17 = smov [#allocation10]  }
  0x31   :  { %s85_s16 = sshll.u32 %s9656_s15, 4  ;;  %s99_s1 = sshll.u32 %s9657_s17, 4  ;;  %s86_s16 = int_to_ptr.vmem [resolvable:$true] %s85_s16  ;;  %s100_s1 = int_to_ptr.vmem [resolvable:$true] %s99_s1 }
  0x32   :  { %s9606_s18 = scalar_lea.vmem %s86_s16, 20480  ;;  %p9611_p7 = scmp.lt.s32.totalorder %s86_s16, %s86_s16 }
  0x33   :  { %p9607_p6 = scmp.ne.s32.totalorder %s86_s16, %s9606_s18  ;;  %p9612_p8 = scmp.lt.s32.totalorder %s9606_s18, %s9606_s18 }
  0x35   :  { %p9613_p9 = por %p9612_p8, %p9611_p7 }
  0x37   :  { %p9614_p10 = pnand %p9613_p9, %p9607_p6 }
  0x39   :  { %9617 = shalt.err (!%p9614_p10)
}
  0x3a   :  { %91 = dma.hbm_to_vmem [thread:$0]  %s10009_s9, 20480, %s86_s16, [#allocation8], %s9651_s3, %s9651_s3, %s9652_s23  }
  0x3b   :  { %s9626_s5 = scalar_lea.vmem %s100_s1, 30720  ;;  %p9631_p12 = scmp.lt.s32.totalorder %s100_s1, %s100_s1 }
  0x3c   :  { %p9627_p11 = scmp.ne.s32.totalorder %s100_s1, %s9626_s5  ;;  %p9632_p13 = scmp.lt.s32.totalorder %s9626_s5, %s9626_s5 }
  0x3e   :  { %p9633_p0 = por %p9632_p13, %p9631_p12 }
  0x40   :  { %p9634_p1 = pnand %p9633_p0, %p9627_p11 }
  0x42   :  { %9637 = shalt.err (!%p9634_p1)
}
  0x43   :  { %s9658_s21 = smov 384   ;;  %s9659_s22 = smov 24  }
  0x44   :  { %105 = dma.hbm_to_vmem [thread:$0]  %s10011_s11, 30720, %s100_s1, [#allocation11], %s9658_s21, %s9658_s21, %s9659_s22  }
  0x45   :  { %9638 = dma.done.wait [#allocation3], 30720  }
  0x46   :  { %9639 = vsyncadd [#allocation3], 4294936576 }
  0x47   :  { %9640 = dma.done.wait [#allocation5], 24576  }
  0x48   :  { %9641 = vsyncadd [#allocation5], 4294942720 }
  0x49   :  { %9642 = dma.done.wait [#allocation8], 24576  }
  0x4a   :  { %9643 = vsyncadd [#allocation8], 4294942720 }
  0x4b   :  { %9644 = dma.done.wait [#allocation11], 30720  }
  0x4c   :  { %9645 = vsyncadd [#allocation11], 4294936576  ;;  %v8263_v0 = vld [vmem:[#allocation2 + $0x11c] ss:$20 sps:$4 sm:$0xff]   ;;  %v8265_v1 = vld [vmem:[#allocation2 + $0x118] ss:$20 sps:$4 sm:$0xff]  }
  0x4d   :  { %1726 = vmatprep.subr.bf16.mxu0 %v8263_v0  ;;  %v8266_v2 = vld [vmem:[#allocation2 + $0x39c] ss:$20 sps:$4 sm:$0xff]   ;;  %v8268_v3 = vld [vmem:[#allocation2 + $0x398] ss:$20 sps:$4 sm:$0xff]   ;;  %v8269_v4 = vld [vmem:[#allocation2 + $0xf4] ss:$20 sps:$4 sm:$0xff]  }
  0x4e   :  { %1727 = vmatpush1.bf16.msra.mxu0 %v8265_v1  ;;  %v8271_v5 = vld [vmem:[#allocation2 + $0xf0] ss:$20 sps:$4 sm:$0xff]   ;;  %1769 = vmatprep.subr.bf16.mxu1 %v8266_v2  ;;  %v8272_v6 = vld [vmem:[#allocation2 + $0x374] ss:$20 sps:$4 sm:$0xff]   ;;  %v8275_v8 = vld [vmem:[#allocation2 + $0xcc] ss:$20 sps:$4 sm:$0xff]  }
  0x4f   :  { %1770 = vmatpush1.bf16.msra.mxu1 %v8268_v3  ;;  %1728 = vmatprep.subr.bf16.mxu0 %v8269_v4  ;;  %v8274_v7 = vld [vmem:[#allocation2 + $0x370] ss:$20 sps:$4 sm:$0xff]   ;;  %v8277_v9 = vld [vmem:[#allocation2 + $0xc8] ss:$20 sps:$4 sm:$0xff]   ;;  %v8278_v10 = vld [vmem:[#allocation2 + $0x34c] ss:$20 sps:$4 sm:$0xff]  }
  0x50   :  { %1771 = vmatprep.subr.bf16.mxu1 %v8272_v6  ;;  %v8281_v11 = vld [vmem:[#allocation2 + $0xa4] ss:$20 sps:$4 sm:$0xff]   ;;  %v8280_v12 = vld [vmem:[#allocation2 + $0x348] ss:$20 sps:$4 sm:$0xff]   ;;  %v8283_v14 = vld [vmem:[#allocation2 + $0xa0] ss:$20 sps:$4 sm:$0xff]  }
  0x51   :  { %v8284_v13 = vld [vmem:[#allocation2 + $0x324] ss:$20 sps:$4 sm:$0xff]   ;;  %v8287_v15 = vld [vmem:[#allocation2 + $0x7c] ss:$20 sps:$4 sm:$0xff]   ;;  %v8286_v16 = vld [vmem:[#allocation2 + $0x320] ss:$20 sps:$4 sm:$0xff]  }
  0x52   :  { %1729 = vmatpush1.bf16.msra.mxu0 %v8271_v5  ;;  %v8290_v17 = vld [vmem:[#allocation2 + $0x2fc] ss:$20 sps:$4 sm:$0xff]   ;;  %v8289_v18 = vld [vmem:[#allocation2 + $0x78] ss:$20 sps:$4 sm:$0xff]   ;;  %v8293_v19 = vld [vmem:[#allocation2 + $0x54] ss:$20 sps:$4 sm:$0xff]  }
  0x53   :  { %1730 = vmatprep.subr.bf16.mxu0 %v8275_v8  ;;  %1772 = vmatpush1.bf16.msra.mxu1 %v8274_v7  ;;  %v8292_v20 = vld [vmem:[#allocation2 + $0x2f8] ss:$20 sps:$4 sm:$0xff]   ;;  %v8296_v21 = vld [vmem:[#allocation2 + $0x2d4] ss:$20 sps:$4 sm:$0xff]   ;;  %v8295_v22 = vld [vmem:[#allocation2 + $0x50] ss:$20 sps:$4 sm:$0xff]  }
  0x54   :  { %1773 = vmatprep.subr.bf16.mxu1 %v8278_v10  ;;  %v8299_v23 = vld [vmem:[#allocation2 + $0x2c] ss:$20 sps:$4 sm:$0xff]   ;;  %v8298_v24 = vld [vmem:[#allocation2 + $0x2d0] ss:$20 sps:$4 sm:$0xff]   ;;  %v8301_v26 = vld [vmem:[#allocation2 + $0x28] ss:$20 sps:$4 sm:$0xff]  }
  0x55   :  { %v8302_v25 = vld [vmem:[#allocation2 + $0x2ac] ss:$20 sps:$4 sm:$0xff]   ;;  %v8305_v27 = vld [vmem:[#allocation2 + $0x4] ss:$20 sps:$4 sm:$0xff]   ;;  %v8304_v28 = vld [vmem:[#allocation2 + $0x2a8] ss:$20 sps:$4 sm:$0xff]  }
  0x56   :  { %1731 = vmatpush1.bf16.msra.mxu0 %v8277_v9  ;;  %v8308_v29 = vld [vmem:[#allocation2 + $0x284] ss:$20 sps:$4 sm:$0xff]   ;;  %v8307_v30 = vld [vmem:[#allocation2] ss:$20 sps:$4 sm:$0xff]   ;;  %v8311_v31 = vld [vmem:[#allocation2 + $0x25c] ss:$20 sps:$4 sm:$0xff]  }
  0x57   :  { %1732 = vmatprep.subr.bf16.mxu0 %v8281_v11  ;;  %1774 = vmatpush1.bf16.msra.mxu1 %v8280_v12  ;;  %v8310_v32 = vld [vmem:[#allocation2 + $0x280] ss:$20 sps:$4 sm:$0xff]   ;;  %v8314_v33 = vld [vmem:[#allocation2 + $0x4dc] ss:$20 sps:$4 sm:$0xff]   ;;  %v8313_v34 = vld [vmem:[#allocation2 + $0x258] ss:$20 sps:$4 sm:$0xff]  }
  0x58   :  { %1775 = vmatprep.subr.bf16.mxu1 %v8284_v13  ;;  %v8317_v35 = vld [vmem:[#allocation2 + $0x234] ss:$20 sps:$4 sm:$0xff]   ;;  %v8316_v36 = vld [vmem:[#allocation2 + $0x4d8] ss:$20 sps:$4 sm:$0xff]   ;;  %v8319_v38 = vld [vmem:[#allocation2 + $0x230] ss:$20 sps:$4 sm:$0xff]  }
  0x59   :  { %v8320_v37 = vld [vmem:[#allocation2 + $0x4b4] ss:$20 sps:$4 sm:$0xff]   ;;  %v8323_v39 = vld [vmem:[#allocation2 + $0x20c] ss:$20 sps:$4 sm:$0xff]   ;;  %v8322_v40 = vld [vmem:[#allocation2 + $0x4b0] ss:$20 sps:$4 sm:$0xff]  }
  0x5a   :  { %1733 = vmatpush1.bf16.msra.mxu0 %v8283_v14  ;;  %v8326_v41 = vld [vmem:[#allocation2 + $0x48c] ss:$20 sps:$4 sm:$0xff]   ;;  %v8325_v42 = vld [vmem:[#allocation2 + $0x208] ss:$20 sps:$4 sm:$0xff]   ;;  %v8329_v43 = vld [vmem:[#allocation2 + $0x1e4] ss:$20 sps:$4 sm:$0xff]  }
  0x5b   :  { %1734 = vmatprep.subr.bf16.mxu0 %v8287_v15  ;;  %1776 = vmatpush1.bf16.msra.mxu1 %v8286_v16  ;;  %v8328_v44 = vld [vmem:[#allocation2 + $0x488] ss:$20 sps:$4 sm:$0xff]   ;;  %v8332_v45 = vld [vmem:[#allocation2 + $0x464] ss:$20 sps:$4 sm:$0xff]   ;;  %v8331_v46 = vld [vmem:[#allocation2 + $0x1e0] ss:$20 sps:$4 sm:$0xff]  }
  0x5c   :  { %1777 = vmatprep.subr.bf16.mxu1 %v8290_v17  ;;  %v8358_v47 = vld [vmem:[%s10000_s0 + $0x4] ss:$24 sps:$4 sm:$0xff]   ;;  %v8334_v49 = vld [vmem:[#allocation2 + $0x460] ss:$20 sps:$4 sm:$0xff]   ;;  %v8337_v52 = vld [vmem:[#allocation2 + $0x1b8] ss:$20 sps:$4 sm:$0xff]  }
  0x5d   :  { %v8335_v48 = vld [vmem:[#allocation2 + $0x1bc] ss:$20 sps:$4 sm:$0xff]   ;;  %1758 = vmatprep.mubr.bf16.mxu0 %v8358_v47  ;;  %v9761_v51 = vld [vmem:[%s10000_s0 + $0xc] ss:$24 sps:$4 sm:$0xff]   ;;  %v8341_v53 = vld [vmem:[#allocation2 + $0x194] ss:$20 sps:$4 sm:$0xff]  }
  0x5e   :  { %1735 = vmatpush1.bf16.msra.mxu0 %v8289_v18  ;;  %v8338_v50 = vld [vmem:[#allocation2 + $0x43c] ss:$20 sps:$4 sm:$0xff]   ;;  %1801 = vmatprep.mubr.bf16.mxu1 %v9761_v51  ;;  %v8340_v54 = vld [vmem:[#allocation2 + $0x438] ss:$20 sps:$4 sm:$0xff]   ;;  %v8344_v55 = vld [vmem:[#allocation2 + $0x414] ss:$20 sps:$4 sm:$0xff]  }
  0x5f   :  { %1736 = vmatprep.subr.bf16.mxu0 %v8293_v19  ;;  %1778 = vmatpush1.bf16.msra.mxu1 %v8292_v20  ;;  %v8343_v56 = vld [vmem:[#allocation2 + $0x190] ss:$20 sps:$4 sm:$0xff]   ;;  %v8347_v57 = vld [vmem:[#allocation2 + $0x16c] ss:$20 sps:$4 sm:$0xff]   ;;  %v8349_v60 = vld [vmem:[#allocation2 + $0x168] ss:$20 sps:$4 sm:$0xff]  }
  0x60   :  { %1779 = vmatprep.subr.bf16.mxu1 %v8296_v21  ;;  %v8346_v58 = vld [vmem:[#allocation2 + $0x410] ss:$20 sps:$4 sm:$0xff]   ;;  %v8350_v59 = vld [vmem:[#allocation2 + $0x3ec] ss:$20 sps:$4 sm:$0xff]   ;;  %v8352_v62 = vld [vmem:[#allocation2 + $0x3e8] ss:$20 sps:$4 sm:$0xff]  }
  0x61   :  { %v8353_v61 = vld [vmem:[#allocation2 + $0x144] ss:$20 sps:$4 sm:$0xff]   ;;  %v8355_v0 = vld [vmem:[#allocation2 + $0x140] ss:$20 sps:$4 sm:$0xff]   ;;  %v8364_v1 = vld [vmem:[#allocation2 + $0x61c] ss:$20 sps:$4 sm:$0xff]  }
  0x62   :  { %1737 = vmatpush1.bf16.msra.mxu0 %v8295_v22  ;;  %v8356_v63 = vld [vmem:[#allocation2 + $0x3c4] ss:$20 sps:$4 sm:$0xff]   ;;  %v8360_v2 = vld [vmem:[#allocation2 + $0x3c0] ss:$20 sps:$4 sm:$0xff]   ;;  %v8376_v9 = vld [vmem:[#allocation2 + $0xfc] ss:$20 sps:$4 sm:$0xff]  }
  0x63   :  { %1738 = vmatprep.subr.bf16.mxu0 %v8299_v23  ;;  %1780 = vmatpush1.bf16.msra.mxu1 %v8298_v24  ;;  %v9767_v3 = vld [vmem:[%s10000_s0] ss:$24 sps:$4 sm:$0xff]   ;;  %v8373_v7 = vld [vmem:[#allocation2 + $0x5f4] ss:$20 sps:$4 sm:$0xff]   ;;  %v8371_v10 = vld [vmem:[#allocation2 + $0x5f0] ss:$20 sps:$4 sm:$0xff]  }
  0x64   :  { %1781 = vmatprep.subr.bf16.mxu1 %v8302_v25  ;;  %v8370_v4 = vld [vmem:[#allocation2 + $0x124] ss:$20 sps:$4 sm:$0xff]   ;;  %v9772_v6 = vld [vmem:[%s10000_s0 + $0x8] ss:$24 sps:$4 sm:$0xff]   ;;  %v8391_v19 = vld [vmem:[#allocation2 + $0x57c] ss:$20 sps:$4 sm:$0xff]  }
  0x65   :  { %v8362_v5 = vld [vmem:[#allocation2 + $0x618] ss:$20 sps:$4 sm:$0xff]   ;;  %v8368_v8 = vld [vmem:[#allocation2 + $0x120] ss:$20 sps:$4 sm:$0xff]   ;;  %v8377_v14 = vld [vmem:[#allocation2 + $0x5c8] ss:$20 sps:$4 sm:$0xff]  }
  0x66   :  { %1739 = vmatpush1.bf16.msra.mxu0 %v8301_v26  ;;  %v8379_v11 = vld [vmem:[#allocation2 + $0x5cc] ss:$20 sps:$4 sm:$0xff]   ;;  %v8382_v13 = vld [vmem:[#allocation2 + $0xd4] ss:$20 sps:$4 sm:$0xff]   ;;  %v8385_v15 = vld [vmem:[#allocation2 + $0x5a4] ss:$20 sps:$4 sm:$0xff]  }
  0x67   :  { %1740 = vmatprep.subr.bf16.mxu0 %v8305_v27  ;;  %1782 = vmatpush1.bf16.msra.mxu1 %v8304_v28  ;;  %v8374_v12 = vld [vmem:[#allocation2 + $0xf8] ss:$20 sps:$4 sm:$0xff]   ;;  %v8380_v16 = vld [vmem:[#allocation2 + $0xd0] ss:$20 sps:$4 sm:$0xff]   ;;  %v8383_v18 = vld [vmem:[#allocation2 + $0x5a0] ss:$20 sps:$4 sm:$0xff]  }
  0x68   :  { %1783 = vmatprep.subr.bf16.mxu1 %v8308_v29  ;;  %v8388_v17 = vld [vmem:[#allocation2 + $0xac] ss:$20 sps:$4 sm:$0xff]   ;;  %v8386_v20 = vld [vmem:[#allocation2 + $0xa8] ss:$20 sps:$4 sm:$0xff]   ;;  %v8394_v21 = vld [vmem:[#allocation2 + $0x84] ss:$20 sps:$4 sm:$0xff]  }
  0x69   :  { %v8389_v22 = vld [vmem:[#allocation2 + $0x578] ss:$20 sps:$4 sm:$0xff]   ;;  %v8397_v23 = vld [vmem:[#allocation2 + $0x554] ss:$20 sps:$4 sm:$0xff]   ;;  %v8400_v25 = vld [vmem:[#allocation2 + $0x5c] ss:$20 sps:$4 sm:$0xff]  }
  0x6a   :  { %1741 = vmatpush1.bf16.msra.mxu0 %v8307_v30  ;;  %v8392_v24 = vld [vmem:[#allocation2 + $0x80] ss:$20 sps:$4 sm:$0xff]   ;;  %v8395_v26 = vld [vmem:[#allocation2 + $0x550] ss:$20 sps:$4 sm:$0xff]   ;;  %v8398_v28 = vld [vmem:[#allocation2 + $0x58] ss:$20 sps:$4 sm:$0xff]  }
  0x6b   :  { %1742 = vmatprep.subr.bf16.mxu0 %v8311_v31  ;;  %1784 = vmatpush1.bf16.msra.mxu1 %v8310_v32  ;;  %v8403_v27 = vld [vmem:[#allocation2 + $0x52c] ss:$20 sps:$4 sm:$0xff]   ;;  %v8406_v29 = vld [vmem:[#allocation2 + $0x34] ss:$20 sps:$4 sm:$0xff]   ;;  %v8404_v31 = vld [vmem:[#allocation2 + $0x30] ss:$20 sps:$4 sm:$0xff]  }
  0x6c   :  { %1785 = vmatprep.subr.bf16.mxu1 %v8314_v33  ;;  %v8401_v30 = vld [vmem:[#allocation2 + $0x528] ss:$20 sps:$4 sm:$0xff]   ;;  %v8409_v32 = vld [vmem:[#allocation2 + $0x504] ss:$20 sps:$4 sm:$0xff]   ;;  %v9779_v33 = vld [vmem:[%s10000_s0 + $0x14] ss:$24 sps:$4 sm:$0xff]  }
  0x6e   :  { %1743 = vmatpush2.bf16.msra.mxu0 %v8313_v34  ;;  %v8412_v34 = vld [vmem:[#allocation2 + $0xc] ss:$20 sps:$4 sm:$0xff]  }
  0x6f   :  { %1744 = vmatprep.subr.bf16.mxu0 %v8317_v35  ;;  %1786 = vmatpush2.bf16.msra.mxu1 %v8316_v36  ;;  %v8407_v35 = vld [vmem:[#allocation2 + $0x500] ss:$20 sps:$4 sm:$0xff]   ;;  %v8415_v36 = vld [vmem:[#allocation2 + $0x75c] ss:$20 sps:$4 sm:$0xff]  }
  0x70   :  { %1787 = vmatprep.subr.bf16.mxu1 %v8320_v37  ;;  %v8410_v37 = vld [vmem:[#allocation2 + $0x8] ss:$20 sps:$4 sm:$0xff]  }
  0x72   :  { %1745 = vmatpush2.bf16.msra.mxu0 %v8319_v38  ;;  %v8418_v38 = vld [vmem:[#allocation2 + $0x264] ss:$20 sps:$4 sm:$0xff]  }
  0x73   :  { %1746 = vmatprep.subr.bf16.mxu0 %v8323_v39  ;;  %1788 = vmatpush2.bf16.msra.mxu1 %v8322_v40  ;;  %v8413_v39 = vld [vmem:[#allocation2 + $0x758] ss:$20 sps:$4 sm:$0xff]   ;;  %v8421_v40 = vld [vmem:[#allocation2 + $0x734] ss:$20 sps:$4 sm:$0xff]  }
  0x74   :  { %1789 = vmatprep.subr.bf16.mxu1 %v8326_v41  ;;  %v8416_v41 = vld [vmem:[#allocation2 + $0x260] ss:$20 sps:$4 sm:$0xff]  }
  0x76   :  { %1747 = vmatpush2.bf16.msra.mxu0 %v8325_v42  ;;  %v8424_v42 = vld [vmem:[#allocation2 + $0x23c] ss:$20 sps:$4 sm:$0xff]  }
  0x77   :  { %1748 = vmatprep.subr.bf16.mxu0 %v8329_v43  ;;  %1790 = vmatpush2.bf16.msra.mxu1 %v8328_v44  ;;  %v8419_v43 = vld [vmem:[#allocation2 + $0x730] ss:$20 sps:$4 sm:$0xff]   ;;  %v8427_v44 = vld [vmem:[#allocation2 + $0x70c] ss:$20 sps:$4 sm:$0xff]  }
  0x78   :  { %1791 = vmatprep.subr.bf16.mxu1 %v8332_v45  ;;  %v8422_v45 = vld [vmem:[#allocation2 + $0x238] ss:$20 sps:$4 sm:$0xff]  }
  0x7a   :  { %1749 = vmatpush2.bf16.msra.mxu0 %v8331_v46  ;;  %v8430_v46 = vld [vmem:[#allocation2 + $0x214] ss:$20 sps:$4 sm:$0xff]  }
  0x7b   :  { %1750 = vmatprep.subr.bf16.mxu0 %v8335_v48  ;;  %1792 = vmatpush2.bf16.msra.mxu1 %v8334_v49  ;;  %v8433_v48 = vld [vmem:[#allocation2 + $0x6e4] ss:$20 sps:$4 sm:$0xff]  }
  0x7c   :  { %1793 = vmatprep.subr.bf16.mxu1 %v8338_v50  ;;  %v8428_v49 = vld [vmem:[#allocation2 + $0x210] ss:$20 sps:$4 sm:$0xff]   ;;  %v8436_v50 = vld [vmem:[#allocation2 + $0x1ec] ss:$20 sps:$4 sm:$0xff]  }
  0x7e   :  { %1751 = vmatpush2.bf16.msra.mxu0 %v8337_v52  ;;  %v8431_v52 = vld [vmem:[#allocation2 + $0x6e0] ss:$20 sps:$4 sm:$0xff]  }
  0x7f   :  { %1752 = vmatprep.subr.bf16.mxu0 %v8341_v53  ;;  %1794 = vmatpush2.bf16.msra.mxu1 %v8340_v54  ;;  %v8439_v53 = vld [vmem:[#allocation2 + $0x6bc] ss:$20 sps:$4 sm:$0xff]  }
  0x80   :  { %1795 = vmatprep.subr.bf16.mxu1 %v8344_v55  ;;  %v8434_v54 = vld [vmem:[#allocation2 + $0x1e8] ss:$20 sps:$4 sm:$0xff]   ;;  %v8442_v55 = vld [vmem:[#allocation2 + $0x1c4] ss:$20 sps:$4 sm:$0xff]  }
  0x82   :  { %1753 = vmatpush2.bf16.msra.mxu0 %v8343_v56  ;;  %v8437_v56 = vld [vmem:[#allocation2 + $0x6b8] ss:$20 sps:$4 sm:$0xff]  }
  0x83   :  { %1754 = vmatprep.subr.bf16.mxu0 %v8347_v57  ;;  %1796 = vmatpush2.bf16.msra.mxu1 %v8346_v58  ;;  %v8445_v57 = vld [vmem:[#allocation2 + $0x694] ss:$20 sps:$4 sm:$0xff]  }
  0x84   :  { %1797 = vmatprep.subr.bf16.mxu1 %v8350_v59  ;;  %v8440_v58 = vld [vmem:[#allocation2 + $0x1c0] ss:$20 sps:$4 sm:$0xff]   ;;  %v8448_v59 = vld [vmem:[#allocation2 + $0x19c] ss:$20 sps:$4 sm:$0xff]  }
  0x86   :  { %1755 = vmatpush2.bf16.msra.mxu0 %v8349_v60  ;;  %v8443_v60 = vld [vmem:[#allocation2 + $0x690] ss:$20 sps:$4 sm:$0xff]  }
  0x87   :  { %1756 = vmatprep.subr.bf16.mxu0 %v8353_v61  ;;  %1798 = vmatpush2.bf16.msra.mxu1 %v8352_v62  ;;  %v8451_v61 = vld [vmem:[#allocation2 + $0x66c] ss:$20 sps:$4 sm:$0xff]  }
  0x88   :  { %1799 = vmatprep.subr.bf16.mxu1 %v8356_v63  ;;  %v8446_v62 = vld [vmem:[#allocation2 + $0x198] ss:$20 sps:$4 sm:$0xff]   ;;  %v8454_v63 = vld [vmem:[#allocation2 + $0x174] ss:$20 sps:$4 sm:$0xff]  }
  0x8a   :  { %1757 = vmatpush2.bf16.msra.mxu0 %v8355_v0  ;;  %v8449_v0 = vld [vmem:[#allocation2 + $0x668] ss:$20 sps:$4 sm:$0xff]  }
  0x8b   :  { %1812 = vmatprep.subr.bf16.mxu0 %v8364_v1  ;;  %1800 = vmatpush2.bf16.msra.mxu1 %v8360_v2  ;;  %v8457_v1 = vld [vmem:[#allocation2 + $0x644] ss:$20 sps:$4 sm:$0xff]  }
  0x8c   :  { %1855 = vmatprep.subr.bf16.mxu1 %v8370_v4  ;;  %v8452_v2 = vld [vmem:[#allocation2 + $0x170] ss:$20 sps:$4 sm:$0xff]   ;;  %v8460_v4 = vld [vmem:[#allocation2 + $0x14c] ss:$20 sps:$4 sm:$0xff]  }
  0x8d   :  { %1759 = vmatmul.mubr.bf16.vlgmr.msra.gmra.mxu0 %v9767_v3 }
  0x8e   :  { %1813 = vmatpush1.bf16.msra.mxu0 %v8362_v5  ;;  %1802 = vmatmul.mubr.bf16.vlgmr.msra.gmra.mxu1 %v9772_v6  ;;  %v8455_v5 = vld [vmem:[#allocation2 + $0x640] ss:$20 sps:$4 sm:$0xff]  }
  0x8f   :  { %1814 = vmatprep.subr.bf16.mxu0 %v8373_v7  ;;  %1856 = vmatpush1.bf16.msra.mxu1 %v8368_v8  ;;  %v8466_v7 = vld [vmem:[#allocation2 + $0x3a4] ss:$20 sps:$4 sm:$0xff]   ;;  %v8458_v8 = vld [vmem:[#allocation2 + $0x148] ss:$20 sps:$4 sm:$0xff]  }
  0x90   :  { %1887 = vmatprep.mubr.bf16.mxu1 %v8358_v47  ;;  %1857 = vmatprep.subr.bf16.mxu1 %v8376_v9  ;;  %v8425_v47 = vld [vmem:[#allocation2 + $0x708] ss:$20 sps:$4 sm:$0xff]  }
  0x91   :  { %1844 = vmatprep.mubr.bf16.mxu0 %v9779_v33  ;;  %v9785_v9 = vld [vmem:[%s10000_s0 + $0x10] ss:$24 sps:$4 sm:$0xff]  }
  0x92   :  { %1815 = vmatpush1.bf16.msra.mxu0 %v8371_v10  ;;  %v8469_v10 = vld [vmem:[#allocation2 + $0x624] ss:$20 sps:$4 sm:$0xff]  }
  0x93   :  { %1816 = vmatprep.subr.bf16.mxu0 %v8379_v11  ;;  %1858 = vmatpush1.bf16.msra.mxu1 %v8374_v12  ;;  %v8464_v11 = vld [vmem:[#allocation2 + $0x3a0] ss:$20 sps:$4 sm:$0xff]   ;;  %v8472_v12 = vld [vmem:[#allocation2 + $0x37c] ss:$20 sps:$4 sm:$0xff]  }
  0x94   :  { %1859 = vmatprep.subr.bf16.mxu1 %v8382_v13  ;;  %v8467_v13 = vld [vmem:[#allocation2 + $0x620] ss:$20 sps:$4 sm:$0xff]  }
  0x96   :  { %1817 = vmatpush1.bf16.msra.mxu0 %v8377_v14  ;;  %v8475_v14 = vld [vmem:[#allocation2 + $0x5fc] ss:$20 sps:$4 sm:$0xff]  }
  0x97   :  { %1818 = vmatprep.subr.bf16.mxu0 %v8385_v15  ;;  %1860 = vmatpush1.bf16.msra.mxu1 %v8380_v16  ;;  %v8470_v15 = vld [vmem:[#allocation2 + $0x378] ss:$20 sps:$4 sm:$0xff]   ;;  %v8478_v16 = vld [vmem:[#allocation2 + $0x354] ss:$20 sps:$4 sm:$0xff]  }
  0x98   :  { %1861 = vmatprep.subr.bf16.mxu1 %v8388_v17  ;;  %v8473_v17 = vld [vmem:[#allocation2 + $0x5f8] ss:$20 sps:$4 sm:$0xff]  }
  0x9a   :  { %1819 = vmatpush1.bf16.msra.mxu0 %v8383_v18  ;;  %v8481_v18 = vld [vmem:[#allocation2 + $0x5d4] ss:$20 sps:$4 sm:$0xff]  }
  0x9b   :  { %1820 = vmatprep.subr.bf16.mxu0 %v8391_v19  ;;  %1862 = vmatpush1.bf16.msra.mxu1 %v8386_v20  ;;  %v8476_v19 = vld [vmem:[#allocation2 + $0x350] ss:$20 sps:$4 sm:$0xff]   ;;  %v8484_v20 = vld [vmem:[#allocation2 + $0x32c] ss:$20 sps:$4 sm:$0xff]  }
  0x9c   :  { %1863 = vmatprep.subr.bf16.mxu1 %v8394_v21  ;;  %v8479_v21 = vld [vmem:[#allocation2 + $0x5d0] ss:$20 sps:$4 sm:$0xff]  }
  0x9e   :  { %1821 = vmatpush1.bf16.msra.mxu0 %v8389_v22  ;;  %v8487_v22 = vld [vmem:[#allocation2 + $0x5ac] ss:$20 sps:$4 sm:$0xff]  }
  0x9f   :  { %1822 = vmatprep.subr.bf16.mxu0 %v8397_v23  ;;  %1864 = vmatpush1.bf16.msra.mxu1 %v8392_v24  ;;  %v8485_v23 = vld [vmem:[#allocation2 + $0x5a8] ss:$20 sps:$4 sm:$0xff]   ;;  %v8493_v24 = vld [vmem:[#allocation2 + $0x584] ss:$20 sps:$4 sm:$0xff]  }
  0xa0   :  { %1865 = vmatprep.subr.bf16.mxu1 %v8400_v25  ;;  %v8488_v25 = vld [vmem:[#allocation2 + $0x300] ss:$20 sps:$4 sm:$0xff]  }
  0xa2   :  { %1823 = vmatpush1.bf16.msra.mxu0 %v8395_v26  ;;  %v8496_v26 = vld [vmem:[#allocation2 + $0x2dc] ss:$20 sps:$4 sm:$0xff]  }
  0xa3   :  { %1824 = vmatprep.subr.bf16.mxu0 %v8403_v27  ;;  %1866 = vmatpush1.bf16.msra.mxu1 %v8398_v28  ;;  %v8491_v27 = vld [vmem:[#allocation2 + $0x580] ss:$20 sps:$4 sm:$0xff]   ;;  %v8499_v28 = vld [vmem:[#allocation2 + $0x55c] ss:$20 sps:$4 sm:$0xff]  }
  0xa4   :  { %1867 = vmatprep.subr.bf16.mxu1 %v8406_v29  ;;  %v8494_v29 = vld [vmem:[#allocation2 + $0x2d8] ss:$20 sps:$4 sm:$0xff]  }
  0xa6   :  { %1825 = vmatpush1.bf16.msra.mxu0 %v8401_v30  ;;  %v8502_v30 = vld [vmem:[#allocation2 + $0x2b4] ss:$20 sps:$4 sm:$0xff]  }
  0xa7   :  { %1826 = vmatprep.subr.bf16.mxu0 %v8409_v32  ;;  %1868 = vmatpush1.bf16.msra.mxu1 %v8404_v31  ;;  %v8497_v31 = vld [vmem:[#allocation2 + $0x558] ss:$20 sps:$4 sm:$0xff]   ;;  %v8505_v32 = vld [vmem:[#allocation2 + $0x534] ss:$20 sps:$4 sm:$0xff]  }
  0xa8   :  { %1869 = vmatprep.subr.bf16.mxu1 %v8412_v34  ;;  %v8508_v34 = vld [vmem:[#allocation2 + $0x28c] ss:$20 sps:$4 sm:$0xff]  }
  0xaa   :  { %1827 = vmatpush1.bf16.msra.mxu0 %v8407_v35  ;;  %v8503_v35 = vld [vmem:[#allocation2 + $0x530] ss:$20 sps:$4 sm:$0xff]  }
  0xab   :  { %1828 = vmatprep.subr.bf16.mxu0 %v8415_v36  ;;  %1870 = vmatpush1.bf16.msra.mxu1 %v8410_v37  ;;  %v8511_v36 = vld [vmem:[#allocation2 + $0x50c] ss:$20 sps:$4 sm:$0xff]   ;;  %v8506_v37 = vld [vmem:[#allocation2 + $0x288] ss:$20 sps:$4 sm:$0xff]  }
  0xac   :  { %1871 = vmatprep.subr.bf16.mxu1 %v8418_v38  ;;  %v8514_v38 = vld [vmem:[#allocation2 + $0x4e4] ss:$20 sps:$4 sm:$0xff]  }
  0xae   :  { %1829 = vmatpush2.bf16.msra.mxu0 %v8413_v39  ;;  %v8509_v39 = vld [vmem:[#allocation2 + $0x508] ss:$20 sps:$4 sm:$0xff]  }
  0xaf   :  { %1830 = vmatprep.subr.bf16.mxu0 %v8421_v40  ;;  %1872 = vmatpush2.bf16.msra.mxu1 %v8416_v41  ;;  %v8517_v40 = vld [vmem:[#allocation2 + $0x764] ss:$20 sps:$4 sm:$0xff]   ;;  %v8512_v41 = vld [vmem:[#allocation2 + $0x4e0] ss:$20 sps:$4 sm:$0xff]  }
  0xb0   :  { %1873 = vmatprep.subr.bf16.mxu1 %v8424_v42  ;;  %v8520_v42 = vld [vmem:[#allocation2 + $0x4bc] ss:$20 sps:$4 sm:$0xff]  }
  0xb2   :  { %1831 = vmatpush2.bf16.msra.mxu0 %v8419_v43  ;;  %v8515_v43 = vld [vmem:[#allocation2 + $0x760] ss:$20 sps:$4 sm:$0xff]  }
  0xb3   :  { %1832 = vmatprep.subr.bf16.mxu0 %v8427_v44  ;;  %1874 = vmatpush2.bf16.msra.mxu1 %v8422_v45  ;;  %v8523_v44 = vld [vmem:[#allocation2 + $0x73c] ss:$20 sps:$4 sm:$0xff]   ;;  %v8518_v45 = vld [vmem:[#allocation2 + $0x4b8] ss:$20 sps:$4 sm:$0xff]  }
  0xb4   :  { %1875 = vmatprep.subr.bf16.mxu1 %v8430_v46  ;;  %v8526_v46 = vld [vmem:[#allocation2 + $0x494] ss:$20 sps:$4 sm:$0xff]  }
  0xb6   :  { %1833 = vmatpush2.bf16.msra.mxu0 %v8425_v47  ;;  %v8521_v47 = vld [vmem:[#allocation2 + $0x738] ss:$20 sps:$4 sm:$0xff]  }
  0xb7   :  { %1834 = vmatprep.subr.bf16.mxu0 %v8433_v48  ;;  %1876 = vmatpush2.bf16.msra.mxu1 %v8428_v49  ;;  %v8529_v48 = vld [vmem:[#allocation2 + $0x714] ss:$20 sps:$4 sm:$0xff]   ;;  %v8524_v49 = vld [vmem:[#allocation2 + $0x490] ss:$20 sps:$4 sm:$0xff]  }
  0xb8   :  { %1877 = vmatprep.subr.bf16.mxu1 %v8436_v50  ;;  %v8532_v50 = vld [vmem:[#allocation2 + $0x46c] ss:$20 sps:$4 sm:$0xff]  }
  0xba   :  { %1835 = vmatpush2.bf16.msra.mxu0 %v8431_v52  ;;  %v8527_v52 = vld [vmem:[#allocation2 + $0x710] ss:$20 sps:$4 sm:$0xff]  }
  0xbb   :  { %1836 = vmatprep.subr.bf16.mxu0 %v8439_v53  ;;  %1878 = vmatpush2.bf16.msra.mxu1 %v8434_v54  ;;  %v8535_v53 = vld [vmem:[#allocation2 + $0x6ec] ss:$20 sps:$4 sm:$0xff]   ;;  %v8530_v54 = vld [vmem:[#allocation2 + $0x468] ss:$20 sps:$4 sm:$0xff]  }
  0xbc   :  { %1879 = vmatprep.subr.bf16.mxu1 %v8442_v55  ;;  %v8538_v55 = vld [vmem:[#allocation2 + $0x444] ss:$20 sps:$4 sm:$0xff]  }
  0xbe   :  { %1837 = vmatpush2.bf16.msra.mxu0 %v8437_v56  ;;  %v8533_v56 = vld [vmem:[#allocation2 + $0x6e8] ss:$20 sps:$4 sm:$0xff]  }
  0xbf   :  { %1838 = vmatprep.subr.bf16.mxu0 %v8445_v57  ;;  %1880 = vmatpush2.bf16.msra.mxu1 %v8440_v58  ;;  %v8541_v57 = vld [vmem:[#allocation2 + $0x6c4] ss:$20 sps:$4 sm:$0xff]   ;;  %v8536_v58 = vld [vmem:[#allocation2 + $0x440] ss:$20 sps:$4 sm:$0xff]  }
  0xc0   :  { %1881 = vmatprep.subr.bf16.mxu1 %v8448_v59  ;;  %v8544_v59 = vld [vmem:[#allocation2 + $0x41c] ss:$20 sps:$4 sm:$0xff]  }
  0xc2   :  { %1839 = vmatpush2.bf16.msra.mxu0 %v8443_v60  ;;  %v8539_v60 = vld [vmem:[#allocation2 + $0x6c0] ss:$20 sps:$4 sm:$0xff]  }
  0xc3   :  { %1840 = vmatprep.subr.bf16.mxu0 %v8451_v61  ;;  %1882 = vmatpush2.bf16.msra.mxu1 %v8446_v62  ;;  %v8547_v61 = vld [vmem:[#allocation2 + $0x69c] ss:$20 sps:$4 sm:$0xff]   ;;  %v8542_v62 = vld [vmem:[#allocation2 + $0x418] ss:$20 sps:$4 sm:$0xff]  }
  0xc4   :  { %1883 = vmatprep.subr.bf16.mxu1 %v8454_v63  ;;  %v8550_v63 = vld [vmem:[#allocation2 + $0x3f4] ss:$20 sps:$4 sm:$0xff]  }
  0xc6   :  { %1841 = vmatpush2.bf16.msra.mxu0 %v8449_v0  ;;  %v8545_v0 = vld [vmem:[#allocation2 + $0x698] ss:$20 sps:$4 sm:$0xff]  }
  0xc7   :  { %1842 = vmatprep.subr.bf16.mxu0 %v8457_v1  ;;  %1884 = vmatpush2.bf16.msra.mxu1 %v8452_v2  ;;  %v8553_v1 = vld [vmem:[#allocation2 + $0x674] ss:$20 sps:$4 sm:$0xff]   ;;  %v8548_v2 = vld [vmem:[#allocation2 + $0x3f0] ss:$20 sps:$4 sm:$0xff]  }
  0xc8   :  { %1885 = vmatprep.subr.bf16.mxu1 %v8460_v4  ;;  %v8556_v4 = vld [vmem:[#allocation2 + $0x3cc] ss:$20 sps:$4 sm:$0xff]  }
  0xca   :  { %1843 = vmatpush2.bf16.msra.mxu0 %v8455_v5  ;;  %v8551_v5 = vld [vmem:[#allocation2 + $0x670] ss:$20 sps:$4 sm:$0xff]  }
  0xcb   :  { %1898 = vmatprep.subr.bf16.mxu0 %v8466_v7  ;;  %1886 = vmatpush2.bf16.msra.mxu1 %v8458_v8  ;;  %v8559_v7 = vld [vmem:[#allocation2 + $0x64c] ss:$20 sps:$4 sm:$0xff]   ;;  %v8554_v8 = vld [vmem:[#allocation2 + $0x3c8] ss:$20 sps:$4 sm:$0xff]  }
  0xcc   :  { %1941 = vmatprep.subr.bf16.mxu1 %v8469_v10  ;;  %v8560_v10 = vld [vmem:[#allocation2 + $0x268] ss:$20 sps:$4 sm:$0xff]  }
  0xcd   :  { %1845 = vmatmul.mubr.bf16.vlgmr.msra.gmra.mxu0 %v9785_v9 }
  0xce   :  { %1899 = vmatpush1.bf16.msra.mxu0 %v8464_v11  ;;  %1930 = vmatprep.mubr.bf16.mxu0 %v9761_v51  ;;  %v8482_v51 = vld [vmem:[#allocation2 + $0x328] ss:$20 sps:$4 sm:$0xff]  }
  0xcf   :  { %1888 = vmatmul.mubr.bf16.vlgmr.msra.gmra.mxu1 %v9767_v3  ;;  %1900 = vmatprep.subr.bf16.mxu0 %v8472_v12  ;;  %v8490_v3 = vld [vmem:[#allocation2 + $0x304] ss:$20 sps:$4 sm:$0xff]   ;;  %v8557_v11 = vld [vmem:[#allocation2 + $0x648] ss:$20 sps:$4 sm:$0xff]  }
  0xd0   :  { %1942 = vmatpush1.bf16.msra.mxu1 %v8467_v13  ;;  %1973 = vmatprep.mubr.bf16.mxu1 %v9779_v33  ;;  %v8500_v33 = vld [vmem:[#allocation2 + $0x2b0] ss:$20 sps:$4 sm:$0xff]   ;;  %v8562_v12 = vld [vmem:[#allocation2 + $0x4e8] ss:$20 sps:$4 sm:$0xff]  }
  0xd1   :  { %1943 = vmatprep.subr.bf16.mxu1 %v8475_v14  ;;  %v8561_v13 = vld [vmem:[#allocation2 + $0x128] ss:$20 sps:$4 sm:$0xff]   ;;  %v8564_v14 = vld [vmem:[#allocation2 + $0x240] ss:$20 sps:$4 sm:$0xff]  }
  0xd2   :  { %1901 = vmatpush1.bf16.msra.mxu0 %v8470_v15  ;;  %v8563_v15 = vld [vmem:[#allocation2 + $0x3a8] ss:$20 sps:$4 sm:$0xff]  }
  0xd3   :  { %1902 = vmatprep.subr.bf16.mxu0 %v8478_v16  ;;  %v8566_v16 = vld [vmem:[#allocation2 + $0x4c0] ss:$20 sps:$4 sm:$0xff]  }
  0xd4   :  { %1944 = vmatpush1.bf16.msra.mxu1 %v8473_v17  ;;  %v8565_v17 = vld [vmem:[#allocation2 + $0x100] ss:$20 sps:$4 sm:$0xff]  }
  0xd5   :  { %1945 = vmatprep.subr.bf16.mxu1 %v8481_v18  ;;  %v9512_v18 = vld [vmem:[%s10000_s0 + $0x4] ss:$24 sps:$4 sm:$0xff]  }
  0xd6   :  { %1903 = vmatpush1.bf16.msra.mxu0 %v8476_v19  ;;  %v8568_v19 = vld [vmem:[#allocation2 + $0x218] ss:$20 sps:$4 sm:$0xff]  }
  0xd7   :  { %1904 = vmatprep.subr.bf16.mxu0 %v8484_v20  ;;  %v8567_v20 = vld [vmem:[#allocation2 + $0x380] ss:$20 sps:$4 sm:$0xff]  }
  0xd8   :  { %1946 = vmatpush1.bf16.msra.mxu1 %v8479_v21  ;;  %v9513_v21 = vld [vmem:[%s10000_s0 + $0xc] ss:$24 sps:$4 sm:$0xff]  }
  0xd9   :  { %1947 = vmatprep.subr.bf16.mxu1 %v8487_v22  ;;  %v8570_v22 = vld [vmem:[#allocation2 + $0x498] ss:$20 sps:$4 sm:$0xff]  }
  0xda   :  { %1905 = vmatpush1.bf16.msra.mxu0 %v8482_v51  ;;  %v8571_v51 = vld [vmem:[#allocation2 + $0x358] ss:$20 sps:$4 sm:$0xff]  }
  0xdb   :  { %1906 = vmatprep.subr.bf16.mxu0 %v8490_v3  ;;  %v8572_v3 = vld [vmem:[#allocation2 + $0x1f0] ss:$20 sps:$4 sm:$0xff]  }
  0xdc   :  { %1948 = vmatpush1.bf16.msra.mxu1 %v8485_v23  ;;  %v8573_v23 = vld [vmem:[#allocation2 + $0xb0] ss:$20 sps:$4 sm:$0xff]  }
  0xdd   :  { %1949 = vmatprep.subr.bf16.mxu1 %v8493_v24  ;;  %v8575_v24 = vld [vmem:[#allocation2 + $0x330] ss:$20 sps:$4 sm:$0xff]  }
  0xde   :  { %1907 = vmatpush1.bf16.msra.mxu0 %v8488_v25  ;;  %v8576_v25 = vld [vmem:[#allocation2 + $0x1c8] ss:$20 sps:$4 sm:$0xff]  }
  0xdf   :  { %1908 = vmatprep.subr.bf16.mxu0 %v8496_v26  ;;  %v8578_v26 = vld [vmem:[#allocation2 + $0x448] ss:$20 sps:$4 sm:$0xff]  }
  0xe0   :  { %1950 = vmatpush1.bf16.msra.mxu1 %v8491_v27  ;;  %v8577_v27 = vld [vmem:[#allocation2 + $0x88] ss:$20 sps:$4 sm:$0xff]  }
  0xe1   :  { %1951 = vmatprep.subr.bf16.mxu1 %v8499_v28  ;;  %v8580_v28 = vld [vmem:[#allocation2 + $0x1a0] ss:$20 sps:$4 sm:$0xff]  }
  0xe2   :  { %1909 = vmatpush1.bf16.msra.mxu0 %v8494_v29  ;;  %v8579_v29 = vld [vmem:[#allocation2 + $0x308] ss:$20 sps:$4 sm:$0xff]  }
  0xe3   :  { %1910 = vmatprep.subr.bf16.mxu0 %v8502_v30  ;;  %v8582_v30 = vld [vmem:[#allocation2 + $0x420] ss:$20 sps:$4 sm:$0xff]  }
  0xe4   :  { %1952 = vmatpush1.bf16.msra.mxu1 %v8497_v31  ;;  %v8581_v31 = vld [vmem:[#allocation2 + $0x60] ss:$20 sps:$4 sm:$0xff]  }
  0xe5   :  { %1953 = vmatprep.subr.bf16.mxu1 %v8505_v32  ;;  %v8584_v32 = vld [vmem:[#allocation2 + $0x178] ss:$20 sps:$4 sm:$0xff]  }
  0xe6   :  { %1911 = vmatpush1.bf16.msra.mxu0 %v8500_v33  ;;  %v8583_v33 = vld [vmem:[#allocation2 + $0x2e0] ss:$20 sps:$4 sm:$0xff]  }
  0xe7   :  { %1912 = vmatprep.subr.bf16.mxu0 %v8508_v34  ;;  %v8586_v34 = vld [vmem:[#allocation2 + $0x3f8] ss:$20 sps:$4 sm:$0xff]  }
  0xe8   :  { %1954 = vmatpush1.bf16.msra.mxu1 %v8503_v35  ;;  %v8585_v35 = vld [vmem:[#allocation2 + $0x38] ss:$20 sps:$4 sm:$0xff]  }
  0xe9   :  { %1955 = vmatprep.subr.bf16.mxu1 %v8511_v36  ;;  %v8588_v36 = vld [vmem:[#allocation2 + $0x150] ss:$20 sps:$4 sm:$0xff]  }
  0xea   :  { %1913 = vmatpush1.bf16.msra.mxu0 %v8506_v37  ;;  %v8587_v37 = vld [vmem:[#allocation2 + $0x2b8] ss:$20 sps:$4 sm:$0xff]  }
  0xeb   :  { %1914 = vmatprep.subr.bf16.mxu0 %v8514_v38  ;;  %v8589_v38 = vld [vmem:[#allocation2 + $0x10] ss:$20 sps:$4 sm:$0xff]  }
  0xec   :  { %1956 = vmatpush1.bf16.msra.mxu1 %v8509_v39  ;;  %v8590_v39 = vld [vmem:[#allocation2 + $0x3d0] ss:$20 sps:$4 sm:$0xff]  }
  0xed   :  { %1957 = vmatprep.subr.bf16.mxu1 %v8517_v40  ;;  %v8591_v40 = vld [vmem:[#allocation2 + $0x290] ss:$20 sps:$4 sm:$0xff]  }
  0xee   :  { %1915 = vmatpush2.bf16.msra.mxu0 %v8512_v41  ;;  %v8592_v41 = vld [vmem:[#allocation2 + $0x768] ss:$20 sps:$4 sm:$0xff]  }
  0xef   :  { %1916 = vmatprep.subr.bf16.mxu0 %v8520_v42  ;;  %v8610_v42 = vld [vmem:[#allocation4 + $0xe4] ss:$16 sps:$4 sm:$0xff]  }
  0xf0   :  { %1958 = vmatpush2.bf16.msra.mxu1 %v8515_v43  ;;  %v8593_v43 = vld [vmem:[#allocation2 + $0x628] ss:$20 sps:$4 sm:$0xff]  }
  0xf1   :  { %1959 = vmatprep.subr.bf16.mxu1 %v8523_v44  ;;  %v8594_v44 = vld [vmem:[#allocation2 + $0x740] ss:$20 sps:$4 sm:$0xff]  }
  0xf2   :  { %1917 = vmatpush2.bf16.msra.mxu0 %v8518_v45  ;;  %v8608_v45 = vld [vmem:[#allocation4 + $0xe0] ss:$16 sps:$4 sm:$0xff]  }
  0xf3   :  { %1918 = vmatprep.subr.bf16.mxu0 %v8526_v46  ;;  %v8613_v46 = vld [vmem:[#allocation4 + $0xc4] ss:$16 sps:$4 sm:$0xff]  }
  0xf4   :  { %1960 = vmatpush2.bf16.msra.mxu1 %v8521_v47  ;;  %v8595_v47 = vld [vmem:[#allocation2 + $0x600] ss:$20 sps:$4 sm:$0xff]  }
  0xf5   :  { %1961 = vmatprep.subr.bf16.mxu1 %v8529_v48  ;;  %v9514_v48 = vld [vmem:[%s10000_s0] ss:$24 sps:$4 sm:$0xff]  }
  0xf6   :  { %1919 = vmatpush2.bf16.msra.mxu0 %v8524_v49  ;;  %v8596_v49 = vld [vmem:[#allocation2 + $0x718] ss:$20 sps:$4 sm:$0xff]  }
  0xf7   :  { %1920 = vmatprep.subr.bf16.mxu0 %v8532_v50  ;;  %v9515_v50 = vld [vmem:[%s10000_s0 + $0x14] ss:$24 sps:$4 sm:$0xff]  }
  0xf8   :  { %1962 = vmatpush2.bf16.msra.mxu1 %v8527_v52  ;;  %v8611_v52 = vld [vmem:[#allocation4 + $0xc0] ss:$16 sps:$4 sm:$0xff]  }
  0xf9   :  { %1963 = vmatprep.subr.bf16.mxu1 %v8535_v53  ;;  %v9516_v53 = vld [vmem:[%s10000_s0 + $0x8] ss:$24 sps:$4 sm:$0xff]  }
  0xfa   :  { %1921 = vmatpush2.bf16.msra.mxu0 %v8530_v54  ;;  %v8616_v54 = vld [vmem:[#allocation4 + $0xa4] ss:$16 sps:$4 sm:$0xff]  }
  0xfb   :  { %1922 = vmatprep.subr.bf16.mxu0 %v8538_v55  ;;  %v8597_v55 = vld [vmem:[#allocation2 + $0x5d8] ss:$20 sps:$4 sm:$0xff]  }
  0xfc   :  { %1964 = vmatpush2.bf16.msra.mxu1 %v8533_v56  ;;  %v8598_v56 = vld [vmem:[#allocation2 + $0x6f0] ss:$20 sps:$4 sm:$0xff]  }
  0xfd   :  { %1965 = vmatprep.subr.bf16.mxu1 %v8541_v57  ;;  %v8614_v57 = vld [vmem:[#allocation4 + $0xa0] ss:$16 sps:$4 sm:$0xff]  }
  0xfe   :  { %1923 = vmatpush2.bf16.msra.mxu0 %v8536_v58  ;;  %v8619_v58 = vld [vmem:[#allocation4 + $0x84] ss:$16 sps:$4 sm:$0xff]  }
  0xff   :  { %1924 = vmatprep.subr.bf16.mxu0 %v8544_v59  ;;  %v8599_v59 = vld [vmem:[#allocation2 + $0x5b0] ss:$20 sps:$4 sm:$0xff]  }
 0x100   :  { %1966 = vmatpush2.bf16.msra.mxu1 %v8539_v60  ;;  %v8600_v60 = vld [vmem:[#allocation2 + $0x6c8] ss:$20 sps:$4 sm:$0xff]  }
 0x101   :  { %1967 = vmatprep.subr.bf16.mxu1 %v8547_v61  ;;  %v8617_v61 = vld [vmem:[#allocation4 + $0x80] ss:$16 sps:$4 sm:$0xff]  }
 0x102   :  { %1925 = vmatpush2.bf16.msra.mxu0 %v8542_v62  ;;  %v8622_v62 = vld [vmem:[#allocation4 + $0x64] ss:$16 sps:$4 sm:$0xff]  }
 0x103   :  { %1926 = vmatprep.subr.bf16.mxu0 %v8550_v63  ;;  %v8601_v63 = vld [vmem:[#allocation2 + $0x588] ss:$20 sps:$4 sm:$0xff]  }
 0x104   :  { %1968 = vmatpush2.bf16.msra.mxu1 %v8545_v0  ;;  %v8602_v0 = vld [vmem:[#allocation2 + $0x6a0] ss:$20 sps:$4 sm:$0xff]  }
 0x105   :  { %1969 = vmatprep.subr.bf16.mxu1 %v8553_v1  ;;  %v8620_v1 = vld [vmem:[#allocation4 + $0x60] ss:$16 sps:$4 sm:$0xff]  }
 0x106   :  { %1927 = vmatpush2.bf16.msra.mxu0 %v8548_v2  ;;  %v8625_v2 = vld [vmem:[#allocation4 + $0x44] ss:$16 sps:$4 sm:$0xff]  }
 0x107   :  { %1928 = vmatprep.subr.bf16.mxu0 %v8556_v4  ;;  %v8603_v4 = vld [vmem:[#allocation2 + $0x560] ss:$20 sps:$4 sm:$0xff]  }
 0x108   :  { %1970 = vmatpush2.bf16.msra.mxu1 %v8551_v5  ;;  %v8604_v5 = vld [vmem:[#allocation2 + $0x678] ss:$20 sps:$4 sm:$0xff]  }
 0x109   :  { %1971 = vmatprep.subr.bf16.mxu1 %v8559_v7  ;;  %v8623_v7 = vld [vmem:[#allocation4 + $0x40] ss:$16 sps:$4 sm:$0xff]  }
 0x10a   :  { %1929 = vmatpush2.bf16.msra.mxu0 %v8554_v8  ;;  %v8628_v8 = vld [vmem:[#allocation4 + $0x24] ss:$16 sps:$4 sm:$0xff]  }
 0x10b   :  { %8094 = vmatprep.subr.bf16.mxu0 %v8560_v10  ;;  %v8605_v10 = vld [vmem:[#allocation2 + $0x538] ss:$20 sps:$4 sm:$0xff]  }
 0x10c   :  { %1972 = vmatpush2.bf16.msra.mxu1 %v8557_v11  ;;  %v8606_v11 = vld [vmem:[#allocation2 + $0x650] ss:$20 sps:$4 sm:$0xff]  }
 0x10d   :  { %1931 = vmatmul.mubr.bf16.vlgmr.msra.gmra.mxu0 %v9772_v6  ;;  %8116 = vmatprep.subr.bf16.mxu1 %v8562_v12  ;;  %v8569_v6 = vld [vmem:[#allocation2 + $0xd8] ss:$20 sps:$4 sm:$0xff]   ;;  %v8626_v12 = vld [vmem:[#allocation4 + $0x20] ss:$16 sps:$4 sm:$0xff]  }
 0x10e   :  { %8095 = vmatpush3.bf16.msra.mxu0 %v8561_v13  ;;  %2016 = vmatprep.mubr.bf16.mxu0 %v9512_v18  ;;  %v8631_v13 = vld [vmem:[#allocation4 + $0x4] ss:$16 sps:$4 sm:$0xff]   ;;  %v8656_v18 = vld [vmem:[#allocation4 + $0x2e0] ss:$16 sps:$4 sm:$0xff]  }
 0x10f   :  { %1974 = vmatmul.mubr.bf16.vlgmr.msra.gmra.mxu1 %v9785_v9  ;;  %8096 = vmatprep.subr.bf16.mxu0 %v8564_v14  ;;  %v8574_v9 = vld [vmem:[#allocation2 + $0x470] ss:$20 sps:$4 sm:$0xff]  }
 0x110   :  { %8117 = vmatpush3.bf16.msra.mxu1 %v8563_v15  ;;  %2057 = vmatprep.mubr.bf16.mxu1 %v9513_v21  ;;  %v8607_v14 = vld [vmem:[#allocation2 + $0x510] ss:$20 sps:$4 sm:$0xff]  }
 0x111   :  { %8118 = vmatprep.subr.bf16.mxu1 %v8566_v16  ;;  %v8658_v15 = vld [vmem:[#allocation4 + $0x2e4] ss:$16 sps:$4 sm:$0xff]   ;;  %v8629_v16 = vld [vmem:[#allocation4] ss:$16 sps:$4 sm:$0xff]  }
 0x112   :  { %8097 = vmatpush3.bf16.msra.mxu0 %v8565_v17  ;;  %v8634_v17 = vld [vmem:[#allocation4 + $0x1e4] ss:$16 sps:$4 sm:$0xff]  }
 0x113   :  { %8098 = vmatprep.subr.bf16.mxu0 %v8568_v19  ;;  %v8661_v19 = vld [vmem:[#allocation4 + $0x2c4] ss:$16 sps:$4 sm:$0xff]  }
 0x114   :  { %8119 = vmatpush3.bf16.msra.mxu1 %v8567_v20  ;;  %v8632_v20 = vld [vmem:[#allocation4 + $0x1e0] ss:$16 sps:$4 sm:$0xff]   ;;  %v8637_v21 = vld [vmem:[#allocation4 + $0x1c4] ss:$16 sps:$4 sm:$0xff]  }
 0x115   :  { %8120 = vmatprep.subr.bf16.mxu1 %v8570_v22  ;;  %v8635_v22 = vld [vmem:[#allocation4 + $0x1c0] ss:$16 sps:$4 sm:$0xff]  }
 0x116   :  { %8099 = vmatpush3.bf16.msra.mxu0 %v8569_v6  ;;  %v9517_v6 = vld [vmem:[%s10000_s0 + $0x10] ss:$24 sps:$4 sm:$0xff]  }
 0x117   :  { %8100 = vmatprep.subr.bf16.mxu0 %v8572_v3  ;;  %v8640_v3 = vld [vmem:[#allocation4 + $0x1a4] ss:$16 sps:$4 sm:$0xff]  }
 0x118   :  { %8121 = vmatpush3.bf16.msra.mxu1 %v8571_v51  ;;  %v8659_v51 = vld [vmem:[#allocation4 + $0x2c0] ss:$16 sps:$4 sm:$0xff]  }
 0x119   :  { %8122 = vmatprep.subr.bf16.mxu1 %v8574_v9  ;;  %v8638_v9 = vld [vmem:[#allocation4 + $0x1a0] ss:$16 sps:$4 sm:$0xff]  }
 0x11a   :  { %8101 = vmatpush3.bf16.msra.mxu0 %v8573_v23  ;;  %v8664_v23 = vld [vmem:[#allocation4 + $0x2a4] ss:$16 sps:$4 sm:$0xff]  }
 0x11b   :  { %8102 = vmatprep.subr.bf16.mxu0 %v8576_v25  ;;  %v8643_v25 = vld [vmem:[#allocation4 + $0x184] ss:$16 sps:$4 sm:$0xff]  }
 0x11c   :  { %8123 = vmatpush3.bf16.msra.mxu1 %v8575_v24  ;;  %v8662_v24 = vld [vmem:[#allocation4 + $0x2a0] ss:$16 sps:$4 sm:$0xff]  }
 0x11d   :  { %8124 = vmatprep.subr.bf16.mxu1 %v8578_v26  ;;  %v8667_v26 = vld [vmem:[#allocation4 + $0x284] ss:$16 sps:$4 sm:$0xff]  }
 0x11e   :  { %8103 = vmatpush3.bf16.msra.mxu0 %v8577_v27  ;;  %v8641_v27 = vld [vmem:[#allocation4 + $0x180] ss:$16 sps:$4 sm:$0xff]  }
 0x11f   :  { %8104 = vmatprep.subr.bf16.mxu0 %v8580_v28  ;;  %v8665_v28 = vld [vmem:[#allocation4 + $0x280] ss:$16 sps:$4 sm:$0xff]  }
 0x120   :  { %8125 = vmatpush3.bf16.msra.mxu1 %v8579_v29  ;;  %v8646_v29 = vld [vmem:[#allocation4 + $0x164] ss:$16 sps:$4 sm:$0xff]  }
 0x121   :  { %8126 = vmatprep.subr.bf16.mxu1 %v8582_v30  ;;  %v8670_v30 = vld [vmem:[#allocation4 + $0x264] ss:$16 sps:$4 sm:$0xff]  }
 0x122   :  { %8105 = vmatpush3.bf16.msra.mxu0 %v8581_v31  ;;  %v8644_v31 = vld [vmem:[#allocation4 + $0x160] ss:$16 sps:$4 sm:$0xff]  }
 0x123   :  { %8106 = vmatprep.subr.bf16.mxu0 %v8584_v32  ;;  %v8668_v32 = vld [vmem:[#allocation4 + $0x260] ss:$16 sps:$4 sm:$0xff]  }
 0x124   :  { %8127 = vmatpush3.bf16.msra.mxu1 %v8583_v33  ;;  %v8649_v33 = vld [vmem:[#allocation4 + $0x144] ss:$16 sps:$4 sm:$0xff]  }
 0x125   :  { %8128 = vmatprep.subr.bf16.mxu1 %v8586_v34  ;;  %v8673_v34 = vld [vmem:[#allocation4 + $0x244] ss:$16 sps:$4 sm:$0xff]  }
 0x126   :  { %8107 = vmatpush3.bf16.msra.mxu0 %v8585_v35  ;;  %v8647_v35 = vld [vmem:[#allocation4 + $0x140] ss:$16 sps:$4 sm:$0xff]  }
 0x127   :  { %8108 = vmatprep.subr.bf16.mxu0 %v8588_v36  ;;  %v8671_v36 = vld [vmem:[#allocation4 + $0x240] ss:$16 sps:$4 sm:$0xff]  }
 0x128   :  { %8129 = vmatpush3.bf16.msra.mxu1 %v8587_v37  ;;  %v8676_v37 = vld [vmem:[#allocation4 + $0x224] ss:$16 sps:$4 sm:$0xff]  }
 0x129   :  { %8130 = vmatprep.subr.bf16.mxu1 %v8590_v39  ;;  %v8650_v39 = vld [vmem:[#allocation4 + $0x120] ss:$16 sps:$4 sm:$0xff]  }
 0x12a   :  { %8109 = vmatpush3.bf16.msra.mxu0 %v8589_v38  ;;  %v8652_v38 = vld [vmem:[#allocation4 + $0x124] ss:$16 sps:$4 sm:$0xff]  }
 0x12b   :  { %8138 = vmatprep.subr.bf16.mxu0 %v8592_v41  ;;  %v8679_v41 = vld [vmem:[#allocation4 + $0x204] ss:$16 sps:$4 sm:$0xff]  }
 0x12c   :  { %8131 = vmatpush3.bf16.msra.mxu1 %v8591_v40  ;;  %v8674_v40 = vld [vmem:[#allocation4 + $0x220] ss:$16 sps:$4 sm:$0xff]  }
 0x12d   :  { %2017 = vmatmul.mubr.bf16.vlgmr.msra.gmra.mxu0 %v9514_v48  ;;  %3104 = vmatprep.subr.bf16.mxu1 %v8610_v42  ;;  %v8655_v42 = vld [vmem:[#allocation4 + $0x104] ss:$16 sps:$4 sm:$0xff]   ;;  %v8683_v48 = vld [vmem:[#allocation4 + $0x3c0] ss:$16 sps:$4 sm:$0xff]  }
 0x12e   :  { %8139 = vmatpush3.bf16.msra.mxu0 %v8593_v43  ;;  %2098 = vmatprep.mubr.bf16.mxu0 %v9515_v50  ;;  %v8653_v43 = vld [vmem:[#allocation4 + $0x100] ss:$16 sps:$4 sm:$0xff]  }
 0x12f   :  { %2058 = vmatmul.mubr.bf16.vlgmr.msra.gmra.mxu1 %v9516_v53  ;;  %8140 = vmatprep.subr.bf16.mxu0 %v8594_v44  ;;  %v8677_v44 = vld [vmem:[#allocation4 + $0x200] ss:$16 sps:$4 sm:$0xff]  }
 0x130   :  { %3105 = vmatpush1.bf16.msra.mxu1 %v8608_v45  ;;  %v8682_v45 = vld [vmem:[#allocation4 + $0x3e4] ss:$16 sps:$4 sm:$0xff]   ;;  %v8686_v50 = vld [vmem:[#allocation4 + $0x3a0] ss:$16 sps:$4 sm:$0xff]  }
 0x131   :  { %3106 = vmatprep.subr.bf16.mxu1 %v8613_v46  ;;  %v8680_v46 = vld [vmem:[#allocation4 + $0x3e0] ss:$16 sps:$4 sm:$0xff]  }
 0x132   :  { %8141 = vmatpush3.bf16.msra.mxu0 %v8595_v47  ;;  %v8685_v47 = vld [vmem:[#allocation4 + $0x3c4] ss:$16 sps:$4 sm:$0xff]   ;;  %v8689_v53 = vld [vmem:[#allocation4 + $0x380] ss:$16 sps:$4 sm:$0xff]  }
 0x133   :  { %8142 = vmatprep.subr.bf16.mxu0 %v8596_v49  ;;  %v8688_v49 = vld [vmem:[#allocation4 + $0x3a4] ss:$16 sps:$4 sm:$0xff]  }
 0x134   :  { %3107 = vmatpush1.bf16.msra.mxu1 %v8611_v52  ;;  %v8691_v52 = vld [vmem:[#allocation4 + $0x384] ss:$16 sps:$4 sm:$0xff]  }
 0x135   :  { %3108 = vmatprep.subr.bf16.mxu1 %v8616_v54  ;;  %v8694_v54 = vld [vmem:[#allocation4 + $0x364] ss:$16 sps:$4 sm:$0xff]  }
 0x136   :  { %8143 = vmatpush3.bf16.msra.mxu0 %v8597_v55  ;;  %v8692_v55 = vld [vmem:[#allocation4 + $0x360] ss:$16 sps:$4 sm:$0xff]  }
 0x137   :  { %8144 = vmatprep.subr.bf16.mxu0 %v8598_v56  ;;  %v8730_v56 = vld [vmem:[#allocation4 + $0x4e4] ss:$16 sps:$4 sm:$0xff]  }
 0x138   :  { %3109 = vmatpush1.bf16.msra.mxu1 %v8614_v57  ;;  %v8697_v57 = vld [vmem:[#allocation4 + $0x344] ss:$16 sps:$4 sm:$0xff]  }
 0x139   :  { %3110 = vmatprep.subr.bf16.mxu1 %v8619_v58  ;;  %v423_v58 = vlaneseq }
 0x13a   :  { %8145 = vmatpush3.bf16.msra.mxu0 %v8599_v59  ;;  %v8695_v59 = vld [vmem:[#allocation4 + $0x340] ss:$16 sps:$4 sm:$0xff]  }
 0x13b   :  { %8146 = vmatprep.subr.bf16.mxu0 %v8600_v60 }
 0x13c   :  { %3111 = vmatpush1.bf16.msra.mxu1 %v8617_v61  ;;  %v8700_v61 = vld [vmem:[#allocation4 + $0x324] ss:$16 sps:$4 sm:$0xff]  }
 0x13d   :  { %3112 = vmatprep.subr.bf16.mxu1 %v8622_v62  ;;  %v9811_v62 = vshrl.u32 %v423_v58, 7 }
 0x13e   :  { %8147 = vmatpush3.bf16.msra.mxu0 %v8601_v63  ;;  %v8698_v63 = vld [vmem:[#allocation4 + $0x320] ss:$16 sps:$4 sm:$0xff]  }
 0x13f   :  { %8148 = vmatprep.subr.bf16.mxu0 %v8602_v0  ;;  %v9816_v0 = vld [vmem:[%s10002_s2] sm:$0x1f] }
 0x140   :  { %3113 = vmatpush1.bf16.msra.mxu1 %v8620_v1 }
 0x141   :  { %3114 = vmatprep.subr.bf16.mxu1 %v8625_v2 }
 0x142   :  { %8149 = vmatpush3.bf16.msra.mxu0 %v8603_v4  ;;  %v8703_v4 = vld [vmem:[#allocation4 + $0x304] ss:$16 sps:$4 sm:$0xff]  }
 0x143   :  { %8150 = vmatprep.subr.bf16.mxu0 %v8604_v5  ;;  %v9819_v5 = vsub.s32 1, %v9811_v62 }
 0x144   :  { %3115 = vmatpush1.bf16.msra.mxu1 %v8623_v7  ;;  %v9822_v7 = vsub.s32 0, %v9811_v62 }
 0x145   :  { %3116 = vmatprep.subr.bf16.mxu1 %v8628_v8  ;;  %v8701_v8 = vld [vmem:[#allocation4 + $0x300] ss:$16 sps:$4 sm:$0xff]  }
 0x146   :  { %8151 = vmatpush3.bf16.msra.mxu0 %v8605_v10 }
 0x147   :  { %8152 = vmatprep.subr.bf16.mxu0 %v8606_v11 }
 0x148   :  { %3117 = vmatpush1.bf16.msra.mxu1 %v8626_v12  ;;  %v8706_v12 = vld [vmem:[#allocation4 + $0xec] ss:$16 sps:$4 sm:$0xff]  }
 0x149   :  { %3118 = vmatprep.subr.bf16.mxu1 %v8631_v13  ;;  %v430_v13 = vrot.slane %v9816_v0, %v9819_v5 }
 0x14a   :  { %8153 = vmatpush3.bf16.msra.mxu0 %v8607_v14  ;;  %v426_v14 = vrot.slane %v9816_v0, %v9822_v7 }
 0x14b   :  { %3147 = vmatprep.subr.bf16.mxu0 %v8658_v15 }
 0x14c   :  { %3119 = vmatpush1.bf16.msra.mxu1 %v8629_v16 }
 0x14d   :  { %2099 = vmatmul.mubr.bf16.vlgmr.msra.gmra.mxu0 %v9517_v6  ;;  %3120 = vmatprep.subr.bf16.mxu1 %v8634_v17  ;;  %v1760_v60 = vpop.f32.mrf.mxu0 }
 0x14e   :  { %3148 = vmatpush1.bf16.msra.mxu0 %v8656_v18  ;;  %v1803_v2 = vpop.f32.mrf.mxu1 }
 0x14f   :  { %3149 = vmatprep.subr.bf16.mxu0 %v8661_v19  ;;  %v1762_v1 = vpop.f32.mrf.mxu0  ;;  %v1761_v19 = vadd.f32 %v1760_v60, %v426_v14 }
 0x150   :  { %3121 = vmatpush2.bf16.msra.mxu1 %v8632_v20  ;;  %v1805_v11 = vpop.f32.mrf.mxu1  ;;  %v1763_v17 = vadd.f32 %v1762_v1, %v430_v13 }
 0x151   :  { %3122 = vmatprep.subr.bf16.mxu1 %v8637_v21  ;;  %v1764_v10 = vpop.f32.mrf.mxu0 }
 0x152   :  { %3150 = vmatpush1.bf16.msra.mxu0 %v8659_v51  ;;  %v1807_v16 = vpop.f32.mrf.mxu1  ;;  %v1765_v18 = vadd.f32 %v1764_v10, %v426_v14  ;;  %v1806_v51 = vadd.f32 %v1805_v11, %v1763_v17 }
 0x153   :  { %3151 = vmatprep.subr.bf16.mxu0 %v8664_v23  ;;  %v1766_v15 = vpop.f32.mrf.mxu0  ;;  %v1804_v23 = vadd.f32 %v1803_v2, %v1761_v19 }
 0x154   :  { %3123 = vmatpush2.bf16.msra.mxu1 %v8635_v22  ;;  %v1767_v21 = vadd.f32 %v1766_v15, %v430_v13  ;;  %v1809_v6 = vpop.f32.mrf.mxu1 }
 0x155   :  { %3124 = vmatprep.subr.bf16.mxu1 %v8640_v3  ;;  %v1808_v3 = vadd.f32 %v1807_v16, %v1765_v18 }
 0x156   :  { %3152 = vmatpush1.bf16.msra.mxu0 %v8662_v24  ;;  %v1810_v24 = vadd.f32 %v1809_v6, %v1767_v21 }
 0x157   :  { %3153 = vmatprep.subr.bf16.mxu0 %v8667_v26 }
 0x158   :  { %3125 = vmatpush2.bf16.msra.mxu1 %v8638_v9 }
 0x159   :  { %3126 = vmatprep.subr.bf16.mxu1 %v8643_v25 }
 0x15a   :  { %3154 = vmatpush1.bf16.msra.mxu0 %v8665_v28 }
 0x15b   :  { %3155 = vmatprep.subr.bf16.mxu0 %v8670_v30 }
 0x15c   :  { %3127 = vmatpush2.bf16.msra.mxu1 %v8641_v27 }
 0x15d   :  { %3128 = vmatprep.subr.bf16.mxu1 %v8646_v29 }
 0x15e   :  { %3156 = vmatpush1.bf16.msra.mxu0 %v8668_v32 }
 0x15f   :  { %3157 = vmatprep.subr.bf16.mxu0 %v8673_v34  ;;  %v8728_v34 = vld [vmem:[#allocation4 + $0x4e0] ss:$16 sps:$4 sm:$0xff]  }
 0x160   :  { %3129 = vmatpush2.bf16.msra.mxu1 %v8644_v31 }
 0x161   :  { %3130 = vmatprep.subr.bf16.mxu1 %v8649_v33 }
 0x162   :  { %3158 = vmatpush1.bf16.msra.mxu0 %v8671_v36  ;;  %v8736_v36 = vld [vmem:[#allocation4 + $0x4c4] ss:$16 sps:$4 sm:$0xff]  }
 0x163   :  { %3159 = vmatprep.subr.bf16.mxu0 %v8676_v37 }
 0x164   :  { %3131 = vmatpush2.bf16.msra.mxu1 %v8647_v35 }
 0x165   :  { %3132 = vmatprep.subr.bf16.mxu1 %v8652_v38  ;;  %v8734_v38 = vld [vmem:[#allocation4 + $0x4c0] ss:$16 sps:$4 sm:$0xff]  }
 0x166   :  { %3160 = vmatpush1.bf16.msra.mxu0 %v8674_v40  ;;  %v9660_v40 = vmov 0  }
 0x167   :  { %3161 = vmatprep.subr.bf16.mxu0 %v8679_v41  ;;  %v8740_v41 = vld [vmem:[#allocation4 + $0x4a0] ss:$16 sps:$4 sm:$0xff]  }
 0x168   :  { %3133 = vmatpush2.bf16.msra.mxu1 %v8650_v39  ;;  %v8742_v39 = vld [vmem:[#allocation4 + $0x4a4] ss:$16 sps:$4 sm:$0xff]  }
 0x169   :  { %3134 = vmatprep.subr.bf16.mxu1 %v8655_v42  ;;  %v8748_v42 = vld [vmem:[#allocation4 + $0x484] ss:$16 sps:$4 sm:$0xff]  }
 0x16a   :  { %3162 = vmatpush1.bf16.msra.mxu0 %v8677_v44  ;;  %v8754_v44 = vld [vmem:[#allocation4 + $0x464] ss:$16 sps:$4 sm:$0xff]  }
 0x16b   :  { %3163 = vmatprep.subr.bf16.mxu0 %v8682_v45  ;;  %v8752_v45 = vld [vmem:[#allocation4 + $0x460] ss:$16 sps:$4 sm:$0xff]  }
 0x16c   :  { %3135 = vmatpush2.bf16.msra.mxu1 %v8653_v43  ;;  %v8746_v43 = vld [vmem:[#allocation4 + $0x480] ss:$16 sps:$4 sm:$0xff]  }
 0x16d   :  { %3190 = vmatprep.subr.bf16.mxu1 %v8730_v56 }
 0x16e   :  { %3164 = vmatpush2.bf16.msra.mxu0 %v8680_v46  ;;  %v8760_v46 = vld [vmem:[#allocation4 + $0x444] ss:$16 sps:$4 sm:$0xff]  }
 0x16f   :  { %3165 = vmatprep.subr.bf16.mxu0 %v8685_v47  ;;  %v8758_v47 = vld [vmem:[#allocation4 + $0x440] ss:$16 sps:$4 sm:$0xff]  }
 0x172   :  { %3166 = vmatpush2.bf16.msra.mxu0 %v8683_v48  ;;  %v8766_v48 = vld [vmem:[#allocation4 + $0x424] ss:$16 sps:$4 sm:$0xff]  }
 0x173   :  { %3167 = vmatprep.subr.bf16.mxu0 %v8688_v49  ;;  %v8764_v49 = vld [vmem:[#allocation4 + $0x420] ss:$16 sps:$4 sm:$0xff]  }
 0x176   :  { %3168 = vmatpush2.bf16.msra.mxu0 %v8686_v50  ;;  %v8772_v50 = vld [vmem:[#allocation4 + $0x404] ss:$16 sps:$4 sm:$0xff]  }
 0x177   :  { %3169 = vmatprep.subr.bf16.mxu0 %v8691_v52  ;;  %v8770_v52 = vld [vmem:[#allocation4 + $0x400] ss:$16 sps:$4 sm:$0xff]  }
 0x17a   :  { %3170 = vmatpush2.bf16.msra.mxu0 %v8689_v53  ;;  %v8778_v53 = vld [vmem:[#allocation4 + $0x2ec] ss:$16 sps:$4 sm:$0xff]  }
 0x17b   :  { %3171 = vmatprep.subr.bf16.mxu0 %v8694_v54 }
 0x17e   :  { %3172 = vmatpush2.bf16.msra.mxu0 %v8692_v55  ;;  %v9836_v55 = vsub.s32 3, %v9811_v62 }
 0x17f   :  { %3173 = vmatprep.subr.bf16.mxu0 %v8697_v57  ;;  %v9839_v57 = vsub.s32 2, %v9811_v62 }
 0x181   :  { %v434_v60 = vrot.slane %v9816_v0, %v9839_v57 }
 0x182   :  { %3174 = vmatpush2.bf16.msra.mxu0 %v8695_v59  ;;  %v438_v59 = vrot.slane %v9816_v0, %v9836_v55 }
 0x183   :  { %3175 = vmatprep.subr.bf16.mxu0 %v8700_v61 }
 0x186   :  { %3176 = vmatpush2.bf16.msra.mxu0 %v8698_v63 }
 0x187   :  { %3177 = vmatprep.subr.bf16.mxu0 %v8703_v4 }
 0x18a   :  { %3178 = vmatpush2.bf16.msra.mxu0 %v8701_v8 }
 0x18b   :  { %3233 = vmatprep.subr.bf16.mxu0 %v8706_v12 }
 0x18d   :  { %v1846_v20 = vpop.f32.mrf.mxu0 }
 0x18e   :  { %v1847_v27 = vadd.f32 %v1846_v20, %v1804_v23 }
 0x18f   :  { %v1848_v22 = vpop.f32.mrf.mxu0  ;;  %v1889_v54 = vpop.f32.mrf.mxu1 }
 0x190   :  { %v1849_v25 = vadd.f32 %v1848_v22, %v1806_v51  ;;  %v2107_v33 = vmax.f32 %v1847_v27, 0.0  ;;  %v1890_v2 = vadd.f32 %v1889_v54, %v434_v60  ;;  %v8751_v54 = vld [vmem:[#allocation4 + $0x18c] ss:$16 sps:$4 sm:$0xff]  }
 0x191   :  { %v1850_v9 = vpop.f32.mrf.mxu0  ;;  %v1891_v56 = vpop.f32.mrf.mxu1 }
 0x192   :  { %v1851_v26 = vadd.f32 %v1850_v9, %v1808_v3  ;;  %v2108_v31 = vmax.f32 %v1849_v25, 0.0  ;;  %v1892_v1 = vadd.f32 %v1891_v56, %v438_v59  ;;  %v8749_v56 = vld [vmem:[#allocation4 + $0x188] ss:$16 sps:$4 sm:$0xff]  }
 0x193   :  { %v1852_v28 = vpop.f32.mrf.mxu0  ;;  %v1893_v58 = vpop.f32.mrf.mxu1 }
 0x194   :  { %v1853_v29 = vadd.f32 %v1852_v28, %v1810_v24  ;;  %v2112_v30 = vmax.f32 %v1851_v26, 0.0  ;;  %v1894_v10 = vadd.f32 %v1893_v58, %v434_v60  ;;  %v8704_v24 = vld [vmem:[#allocation4 + $0xe8] ss:$16 sps:$4 sm:$0xff]   ;;  %v8709_v26 = vld [vmem:[#allocation4 + $0xcc] ss:$16 sps:$4 sm:$0xff]  }
 0x195   :  { %v1895_v61 = vpop.f32.mrf.mxu1  ;;  %v8757_v60 = vld [vmem:[#allocation4 + $0x16c] ss:$16 sps:$4 sm:$0xff]  }
 0x196   :  { %v2113_v32 = vmax.f32 %v1853_v29, 0.0  ;;  %v9830_v37 = vpack.c.bf16 %v2112_v30, %v2107_v33  ;;  %v1896_v15 = vadd.f32 %v1895_v61, %v438_v59  ;;  %v8707_v29 = vld [vmem:[#allocation4 + $0xc8] ss:$16 sps:$4 sm:$0xff]   ;;  %v8712_v30 = vld [vmem:[#allocation4 + $0xac] ss:$16 sps:$4 sm:$0xff]   ;;  %v9853_v61 = vsub.s32 4, %v9811_v62 }
 0x197   :  { %v8713_v33 = vld [vmem:[#allocation4 + $0x88] ss:$16 sps:$4 sm:$0xff]  }
 0x198   :  { %v9828_v35 = vpack.c.bf16 %v2113_v32, %v2108_v31  ;;  %v8710_v31 = vld [vmem:[#allocation4 + $0xa8] ss:$16 sps:$4 sm:$0xff]   ;;  %v8715_v32 = vld [vmem:[#allocation4 + $0x8c] ss:$16 sps:$4 sm:$0xff]  }
 0x19a   :  { %3136 = vmatprep.mubr.bf16.mxu1 %v9828_v35 }
 0x19b   :  { %3137 = vmatmul.mubr.bf16.vlgmr.msra.gmra.mxu1 %v9830_v37 }
 0x19c   :  { %3191 = vmatpush1.bf16.msra.mxu1 %v8728_v34  ;;  %3222 = vmatprep.mubr.bf16.mxu1 %v9660_v40  ;;  %v8718_v34 = vld [vmem:[#allocation4 + $0x6c] ss:$16 sps:$4 sm:$0xff]  }
 0x19d   :  { %3192 = vmatprep.subr.bf16.mxu1 %v8736_v36  ;;  %v8716_v36 = vld [vmem:[#allocation4 + $0x68] ss:$16 sps:$4 sm:$0xff]  }
 0x1a0   :  { %3193 = vmatpush1.bf16.msra.mxu1 %v8734_v38  ;;  %v8721_v38 = vld [vmem:[#allocation4 + $0x4c] ss:$16 sps:$4 sm:$0xff]  }
 0x1a1   :  { %3194 = vmatprep.subr.bf16.mxu1 %v8742_v39  ;;  %v8719_v39 = vld [vmem:[#allocation4 + $0x48] ss:$16 sps:$4 sm:$0xff]  }
 0x1a4   :  { %3195 = vmatpush1.bf16.msra.mxu1 %v8740_v41  ;;  %v8724_v41 = vld [vmem:[#allocation4 + $0x2c] ss:$16 sps:$4 sm:$0xff]  }
 0x1a5   :  { %3196 = vmatprep.subr.bf16.mxu1 %v8748_v42  ;;  %v8722_v42 = vld [vmem:[#allocation4 + $0x28] ss:$16 sps:$4 sm:$0xff]  }
 0x1a8   :  { %3197 = vmatpush1.bf16.msra.mxu1 %v8746_v43  ;;  %v8727_v43 = vld [vmem:[#allocation4 + $0xc] ss:$16 sps:$4 sm:$0xff]  }
 0x1a9   :  { %3198 = vmatprep.subr.bf16.mxu1 %v8754_v44  ;;  %v8733_v44 = vld [vmem:[#allocation4 + $0x1ec] ss:$16 sps:$4 sm:$0xff]  }
 0x1ac   :  { %3199 = vmatpush1.bf16.msra.mxu1 %v8752_v45  ;;  %v8731_v45 = vld [vmem:[#allocation4 + $0x1e8] ss:$16 sps:$4 sm:$0xff]  }
 0x1ad   :  { %3200 = vmatprep.subr.bf16.mxu1 %v8760_v46  ;;  %v8739_v46 = vld [vmem:[#allocation4 + $0x1cc] ss:$16 sps:$4 sm:$0xff]  }
 0x1b0   :  { %3201 = vmatpush1.bf16.msra.mxu1 %v8758_v47  ;;  %v8737_v47 = vld [vmem:[#allocation4 + $0x1c8] ss:$16 sps:$4 sm:$0xff]  }
 0x1b1   :  { %3202 = vmatprep.subr.bf16.mxu1 %v8766_v48 }
 0x1b4   :  { %3203 = vmatpush1.bf16.msra.mxu1 %v8764_v49  ;;  %v8745_v49 = vld [vmem:[#allocation4 + $0x1ac] ss:$16 sps:$4 sm:$0xff]  }
 0x1b5   :  { %3204 = vmatprep.subr.bf16.mxu1 %v8772_v50  ;;  %v8743_v50 = vld [vmem:[#allocation4 + $0x1a8] ss:$16 sps:$4 sm:$0xff]  }
 0x1b8   :  { %3205 = vmatpush1.bf16.msra.mxu1 %v8770_v52 }
 0x1b9   :  { %3276 = vmatprep.subr.bf16.mxu1 %v8778_v53 }
 0x1cd   :  { %v1932_v63 = vpop.f32.mrf.mxu0 }
 0x1ce   :  { %v1933_v12 = vadd.f32 %v1932_v63, %v1890_v2  ;;  %v8755_v63 = vld [vmem:[#allocation4 + $0x168] ss:$16 sps:$4 sm:$0xff]  }
 0x1cf   :  { %v1934_v4 = vpop.f32.mrf.mxu0  ;;  %v1975_v8 = vpop.f32.mrf.mxu1 }
 0x1d0   :  { %v1935_v11 = vadd.f32 %v1934_v4, %v1892_v1  ;;  %v1976_v6 = vadd.f32 %v1975_v8, %v1933_v12  ;;  %v8763_v4 = vld [vmem:[#allocation4 + $0x14c] ss:$16 sps:$4 sm:$0xff]   ;;  %v442_v8 = vrot.slane %v9816_v0, %v9853_v61  ;;  %v8761_v12 = vld [vmem:[#allocation4 + $0x148] ss:$16 sps:$4 sm:$0xff]  }
 0x1d1   :  { %v1936_v13 = vpop.f32.mrf.mxu0  ;;  %v1977_v14 = vpop.f32.mrf.mxu1 }
 0x1d2   :  { %v1937_v16 = vadd.f32 %v1936_v13, %v1894_v10  ;;  %v1978_v19 = vadd.f32 %v1977_v14, %v1935_v11  ;;  %v2109_v25 = vmax.f32 %v1976_v6, 0.0  ;;  %v8767_v6 = vld [vmem:[#allocation4 + $0x128] ss:$16 sps:$4 sm:$0xff]  }
 0x1d3   :  { %v1938_v17 = vpop.f32.mrf.mxu0  ;;  %v1979_v18 = vpop.f32.mrf.mxu1 }
 0x1d4   :  { %v1939_v20 = vadd.f32 %v1938_v17, %v1896_v15  ;;  %v1980_v21 = vadd.f32 %v1979_v18, %v1937_v16  ;;  %v2110_v23 = vmax.f32 %v1978_v19, 0.0  ;;  %v8769_v15 = vld [vmem:[#allocation4 + $0x12c] ss:$16 sps:$4 sm:$0xff]  }
 0x1d5   :  { %v1981_v22 = vpop.f32.mrf.mxu1 }
 0x1d6   :  { %v1982_v51 = vadd.f32 %v1981_v22, %v1939_v20  ;;  %v2114_v3 = vmax.f32 %v1980_v21, 0.0 }
 0x1d8   :  { %v2115_v9 = vmax.f32 %v1982_v51, 0.0  ;;  %v9847_v28 = vpack.c.bf16 %v2114_v3, %v2109_v25  ;;  %v8775_v51 = vld [vmem:[#allocation4 + $0x10c] ss:$16 sps:$4 sm:$0xff]   ;;  %v8773_v25 = vld [vmem:[#allocation4 + $0x108] ss:$16 sps:$4 sm:$0xff]  }
 0x1da   :  { %v9845_v27 = vpack.c.bf16 %v2115_v9, %v2110_v23 }
 0x1dc   :  { %3179 = vmatprep.mubr.bf16.mxu0 %v9845_v27 }
 0x1dd   :  { %3180 = vmatmul.mubr.bf16.vlgmr.msra.gmra.mxu0 %v9847_v28 }
 0x1de   :  { %3234 = vmatpush1.bf16.msra.mxu0 %v8704_v24  ;;  %3265 = vmatprep.mubr.bf16.mxu0 %v9828_v35  ;;  %v8725_v35 = vld [vmem:[#allocation4 + $0x8] ss:$16 sps:$4 sm:$0xff]  }
 0x1df   :  { %3235 = vmatprep.subr.bf16.mxu0 %v8709_v26  ;;  %v8781_v26 = vld [vmem:[#allocation4 + $0x4ec] ss:$16 sps:$4 sm:$0xff]  }
 0x1e2   :  { %3236 = vmatpush1.bf16.msra.mxu0 %v8707_v29 }
 0x1e3   :  { %3237 = vmatprep.subr.bf16.mxu0 %v8712_v30  ;;  %v8776_v30 = vld [vmem:[#allocation4 + $0x2e8] ss:$16 sps:$4 sm:$0xff]  }
 0x1e6   :  { %3238 = vmatpush1.bf16.msra.mxu0 %v8710_v31 }
 0x1e7   :  { %3239 = vmatprep.subr.bf16.mxu0 %v8715_v32 }
 0x1ea   :  { %3240 = vmatpush1.bf16.msra.mxu0 %v8713_v33 }
 0x1eb   :  { %3241 = vmatprep.subr.bf16.mxu0 %v8718_v34  ;;  %v8779_v34 = vld [vmem:[#allocation4 + $0x4e8] ss:$16 sps:$4 sm:$0xff]  }
 0x1ed   :  { %v8110_v48 = vpop.f32.mrf.mxu0 }
 0x1ee   :  { %3242 = vmatpush1.bf16.msra.mxu0 %v8716_v36  ;;  %v8784_v36 = vld [vmem:[#allocation4 + $0x2cc] ss:$16 sps:$4 sm:$0xff]  }
 0x1ef   :  { %3243 = vmatprep.subr.bf16.mxu0 %v8721_v38  ;;  %v8111_v52 = vpop.f32.mrf.mxu0  ;;  %v8132_v53 = vpop.f32.mrf.mxu1  ;;  %v8787_v38 = vld [vmem:[#allocation4 + $0x4cc] ss:$16 sps:$4 sm:$0xff]  }
 0x1f0   :  { %v8112_v10 = vadd.f32 %v8111_v52, %v8110_v48  ;;  %v8805_v48 = vld [vmem:[#allocation4 + $0x46c] ss:$16 sps:$4 sm:$0xff]  }
 0x1f1   :  { %v8113_v58 = vpop.f32.mrf.mxu0  ;;  %v8133_v59 = vpop.f32.mrf.mxu1  ;;  %v8808_v52 = vld [vmem:[#allocation4 + $0x24c] ss:$16 sps:$4 sm:$0xff]  }
 0x1f2   :  { %3244 = vmatpush1.bf16.msra.mxu0 %v8719_v39  ;;  %v2019_v16 = vadd.f32 %v8112_v10, %v442_v8  ;;  %v8134_v17 = vadd.f32 %v8133_v59, %v8132_v53  ;;  %v8782_v39 = vld [vmem:[#allocation4 + $0x2c8] ss:$16 sps:$4 sm:$0xff]   ;;  %v8811_v53 = vld [vmem:[#allocation4 + $0x44c] ss:$16 sps:$4 sm:$0xff]  }
 0x1f3   :  { %3245 = vmatprep.subr.bf16.mxu0 %v8724_v41  ;;  %v8114_v1 = vpop.f32.mrf.mxu0  ;;  %v8135_v2 = vpop.f32.mrf.mxu1  ;;  %v8785_v41 = vld [vmem:[#allocation4 + $0x4c8] ss:$16 sps:$4 sm:$0xff]   ;;  %v8817_v59 = vld [vmem:[#allocation4 + $0x42c] ss:$16 sps:$4 sm:$0xff]  }
 0x1f4   :  { %v8115_v11 = vadd.f32 %v8114_v1, %v8113_v58  ;;  %v2060_v0 = vadd.f32 %v8134_v17, %v2019_v16  ;;  %v8814_v58 = vld [vmem:[#allocation4 + $0x22c] ss:$16 sps:$4 sm:$0xff]   ;;  %v8833_v17 = vld [vmem:[#allocation4 + $0x388] ss:$16 sps:$4 sm:$0xff]  }
 0x1f5   :  { %v8136_v13 = vpop.f32.mrf.mxu1  ;;  %v8820_v1 = vld [vmem:[#allocation4 + $0x20c] ss:$16 sps:$4 sm:$0xff]  }
 0x1f6   :  { %3246 = vmatpush1.bf16.msra.mxu0 %v8722_v42  ;;  %v2022_v19 = vadd.f32 %v8115_v11, %v442_v8  ;;  %v8137_v20 = vadd.f32 %v8136_v13, %v8135_v2  ;;  %v8790_v42 = vld [vmem:[#allocation4 + $0x2ac] ss:$16 sps:$4 sm:$0xff]   ;;  %v8821_v8 = vld [vmem:[#allocation4 + $0x408] ss:$16 sps:$4 sm:$0xff]  }
 0x1f7   :  { %3247 = vmatprep.subr.bf16.mxu0 %v8727_v43  ;;  %v8793_v43 = vld [vmem:[#allocation4 + $0x4ac] ss:$16 sps:$4 sm:$0xff]   ;;  %v8824_v11 = vld [vmem:[#allocation4 + $0x3e8] ss:$16 sps:$4 sm:$0xff]  }
 0x1f8   :  { %v2063_v23 = vadd.f32 %v8137_v20, %v2022_v19  ;;  %v8823_v2 = vld [vmem:[#allocation4 + $0x40c] ss:$16 sps:$4 sm:$0xff]   ;;  %v8827_v13 = vld [vmem:[#allocation4 + $0x3c8] ss:$16 sps:$4 sm:$0xff]  }
 0x1f9   :  { %v8826_v10 = vld [vmem:[#allocation4 + $0x3ec] ss:$16 sps:$4 sm:$0xff]   ;;  %v8836_v19 = vld [vmem:[#allocation4 + $0x368] ss:$16 sps:$4 sm:$0xff]  }
 0x1fa   :  { %3248 = vmatpush1.bf16.msra.mxu0 %v8725_v35  ;;  %v8788_v35 = vld [vmem:[#allocation4 + $0x2a8] ss:$16 sps:$4 sm:$0xff]   ;;  %v8835_v16 = vld [vmem:[#allocation4 + $0x38c] ss:$16 sps:$4 sm:$0xff]  }
 0x1fb   :  { %3249 = vmatprep.subr.bf16.mxu0 %v8733_v44  ;;  %v8791_v44 = vld [vmem:[#allocation4 + $0x4a8] ss:$16 sps:$4 sm:$0xff]   ;;  %v8841_v20 = vld [vmem:[#allocation4 + $0x34c] ss:$16 sps:$4 sm:$0xff]  }
 0x1fe   :  { %3250 = vmatpush2.bf16.msra.mxu0 %v8731_v45  ;;  %v8796_v45 = vld [vmem:[#allocation4 + $0x28c] ss:$16 sps:$4 sm:$0xff]  }
 0x1ff   :  { %3251 = vmatprep.subr.bf16.mxu0 %v8739_v46  ;;  %v8794_v46 = vld [vmem:[#allocation4 + $0x288] ss:$16 sps:$4 sm:$0xff]  }
 0x202   :  { %3252 = vmatpush2.bf16.msra.mxu0 %v8737_v47  ;;  %v8802_v47 = vld [vmem:[#allocation4 + $0x26c] ss:$16 sps:$4 sm:$0xff]  }
 0x203   :  { %3253 = vmatprep.subr.bf16.mxu0 %v8745_v49  ;;  %v8800_v49 = vld [vmem:[#allocation4 + $0x268] ss:$16 sps:$4 sm:$0xff]  }
 0x206   :  { %3254 = vmatpush2.bf16.msra.mxu0 %v8743_v50  ;;  %v8803_v50 = vld [vmem:[#allocation4 + $0x468] ss:$16 sps:$4 sm:$0xff]  }
 0x207   :  { %3255 = vmatprep.subr.bf16.mxu0 %v8751_v54  ;;  %v8806_v54 = vld [vmem:[#allocation4 + $0x248] ss:$16 sps:$4 sm:$0xff]  }
 0x20a   :  { %3256 = vmatpush2.bf16.msra.mxu0 %v8749_v56  ;;  %v8809_v56 = vld [vmem:[#allocation4 + $0x448] ss:$16 sps:$4 sm:$0xff]  }
 0x20b   :  { %3257 = vmatprep.subr.bf16.mxu0 %v8757_v60  ;;  %v8812_v60 = vld [vmem:[#allocation4 + $0x228] ss:$16 sps:$4 sm:$0xff]  }
 0x20d   :  { %v8154_v14 = vpop.f32.mrf.mxu0 }
 0x20e   :  { %3258 = vmatpush2.bf16.msra.mxu0 %v8755_v63  ;;  %v8815_v63 = vld [vmem:[#allocation4 + $0x428] ss:$16 sps:$4 sm:$0xff]  }
 0x20f   :  { %v8155_v18 = vpop.f32.mrf.mxu0  ;;  %3259 = vmatprep.subr.bf16.mxu0 %v8763_v4  ;;  %v8818_v4 = vld [vmem:[#allocation4 + $0x208] ss:$16 sps:$4 sm:$0xff]  }
 0x210   :  { %v8156_v21 = vadd.f32 %v8155_v18, %v8154_v14  ;;  %v8832_v14 = vld [vmem:[#allocation4 + $0x3ac] ss:$16 sps:$4 sm:$0xff]  }
 0x211   :  { %v8157_v22 = vpop.f32.mrf.mxu0  ;;  %v8838_v18 = vld [vmem:[#allocation4 + $0x36c] ss:$16 sps:$4 sm:$0xff]  }
 0x212   :  { %3260 = vmatpush2.bf16.msra.mxu0 %v8761_v12  ;;  %v2101_v9 = vadd.f32 %v8156_v21, %v2060_v0  ;;  %v8829_v12 = vld [vmem:[#allocation4 + $0x3cc] ss:$16 sps:$4 sm:$0xff]   ;;  %v8839_v21 = vld [vmem:[#allocation4 + $0x348] ss:$16 sps:$4 sm:$0xff]  }
 0x213   :  { %v8158_v3 = vpop.f32.mrf.mxu0  ;;  %3261 = vmatprep.subr.bf16.mxu0 %v8769_v15  ;;  %v8830_v15 = vld [vmem:[#allocation4 + $0x3a8] ss:$16 sps:$4 sm:$0xff]  }
 0x214   :  { %v8159_v24 = vadd.f32 %v8158_v3, %v8157_v22  ;;  %v2111_v31 = vmax.f32 %v2101_v9, 0.0  ;;  %v8842_v22 = vld [vmem:[#allocation4 + $0x328] ss:$16 sps:$4 sm:$0xff]   ;;  %v8850_v9 = vld [vmem:[#allocation6 + $0x70] sm:$0xff]  }
 0x215   :  { %v8845_v0 = vld [vmem:[#allocation4 + $0x308] ss:$16 sps:$4 sm:$0xff]  }
 0x216   :  { %v2104_v29 = vadd.f32 %v8159_v24, %v2063_v23  ;;  %3262 = vmatpush2.bf16.msra.mxu0 %v8767_v6  ;;  %v8844_v6 = vld [vmem:[#allocation4 + $0x32c] ss:$16 sps:$4 sm:$0xff]   ;;  %v8851_v24 = vld [vmem:[#allocation6 + $0x30] sm:$0xff]  }
 0x217   :  { %3263 = vmatprep.subr.bf16.mxu0 %v8775_v51  ;;  %v8847_v51 = vld [vmem:[#allocation4 + $0x30c] ss:$16 sps:$4 sm:$0xff]  }
 0x218   :  { %v2116_v32 = vmax.f32 %v2104_v29, 0.0  ;;  %v8848_v3 = vld [vmem:[#allocation6 + $0x78] sm:$0xff]   ;;  %v8854_v29 = vld [vmem:[#allocation6 + $0x60] sm:$0xff]  }
 0x219   :  { %v8849_v23 = vld [vmem:[#allocation6 + $0x38] sm:$0xff]  }
 0x21a   :  { %v9857_v33 = vpack.c.bf16 %v2116_v32, %v2111_v31  ;;  %3264 = vmatpush2.bf16.msra.mxu0 %v8773_v25  ;;  %v8852_v25 = vld [vmem:[#allocation6 + $0x68] sm:$0xff]   ;;  %v8856_v31 = vld [vmem:[#allocation6 + $0x58] sm:$0xff]  }
 0x21b   :  { %3319 = vmatprep.subr.bf16.mxu0 %v8781_v26  ;;  %v8853_v26 = vld [vmem:[#allocation6 + $0x28] sm:$0xff]   ;;  %v8857_v32 = vld [vmem:[#allocation6 + $0x18] sm:$0xff]  }
 0x21c   :  { %3223 = vmatmul.mubr.bf16.vlgmr.msra.gmra.mxu1 %v9857_v33 }
 0x21d   :  { %3266 = vmatmul.mubr.bf16.vlgmr.msra.gmra.mxu0 %v9830_v37  ;;  %3277 = vmatpush1.bf16.msra.mxu1 %v8776_v30  ;;  %v8799_v37 = vld [vmem:[#allocation4 + $0x48c] ss:$16 sps:$4 sm:$0xff]   ;;  %v8855_v30 = vld [vmem:[#allocation6 + $0x20] sm:$0xff]  }
 0x21e   :  { %3308 = vmatprep.mubr.bf16.mxu1 %v9845_v27  ;;  %3320 = vmatpush1.bf16.msra.mxu0 %v8779_v34  ;;  %v8797_v27 = vld [vmem:[#allocation4 + $0x488] ss:$16 sps:$4 sm:$0xff]   ;;  %v8859_v34 = vld [vmem:[#allocation6 + $0x10] sm:$0xff]  }
 0x21f   :  { %3278 = vmatprep.subr.bf16.mxu1 %v8784_v36  ;;  %3321 = vmatprep.subr.bf16.mxu0 %v8787_v38  ;;  %v8861_v36 = vld [vmem:[#allocation6 + $0x8] sm:$0xff]   ;;  %v8862_v38 = vld [vmem:[#allocation6 + $0x40] sm:$0xff]  }
 0x220   :  { %3351 = vmatprep.mubr.bf16.mxu0 %v9660_v40 }
 0x221   :  { %3279 = vmatpush1.bf16.msra.mxu1 %v8782_v39  ;;  %v8863_v39 = vld [vmem:[#allocation6] sm:$0xff]  }
 0x222   :  { %3322 = vmatpush1.bf16.msra.mxu0 %v8785_v41  ;;  %3280 = vmatprep.subr.bf16.mxu1 %v8790_v42  ;;  %v8864_v41 = vld [vmem:[#allocation6 + $0xf8] sm:$0xff]  }
 0x223   :  { %3323 = vmatprep.subr.bf16.mxu0 %v8793_v43  ;;  %v8865_v42 = vld [vmem:[#allocation6 + $0xb8] sm:$0xff]   ;;  %v8866_v43 = vld [vmem:[#allocation6 + $0xf0] sm:$0xff]  }
 0x225   :  { %3281 = vmatpush1.bf16.msra.mxu1 %v8788_v35  ;;  %v8867_v35 = vld [vmem:[#allocation6 + $0xb0] sm:$0xff]  }
 0x226   :  { %3324 = vmatpush1.bf16.msra.mxu0 %v8791_v44  ;;  %3282 = vmatprep.subr.bf16.mxu1 %v8796_v45  ;;  %v8868_v44 = vld [vmem:[#allocation6 + $0xe8] sm:$0xff]  }
 0x227   :  { %3325 = vmatprep.subr.bf16.mxu0 %v8799_v37  ;;  %v8869_v45 = vld [vmem:[#allocation6 + $0xa8] sm:$0xff]   ;;  %v8870_v37 = vld [vmem:[#allocation6 + $0xe0] sm:$0xff]  }
 0x229   :  { %3283 = vmatpush1.bf16.msra.mxu1 %v8794_v46  ;;  %v8871_v46 = vld [vmem:[#allocation6 + $0xa0] sm:$0xff]  }
 0x22a   :  { %3326 = vmatpush1.bf16.msra.mxu0 %v8797_v27  ;;  %3284 = vmatprep.subr.bf16.mxu1 %v8802_v47  ;;  %v8872_v27 = vld [vmem:[#allocation6 + $0xd8] sm:$0xff]  }
 0x22b   :  { %3327 = vmatprep.subr.bf16.mxu0 %v8805_v48  ;;  %v8873_v47 = vld [vmem:[#allocation6 + $0x98] sm:$0xff]   ;;  %v8874_v48 = vld [vmem:[#allocation6 + $0xd0] sm:$0xff]  }
 0x22d   :  { %3285 = vmatpush1.bf16.msra.mxu1 %v8800_v49  ;;  %v8875_v49 = vld [vmem:[#allocation6 + $0x90] sm:$0xff]  }
 0x22e   :  { %3328 = vmatpush1.bf16.msra.mxu0 %v8803_v50  ;;  %3286 = vmatprep.subr.bf16.mxu1 %v8808_v52  ;;  %v8876_v50 = vld [vmem:[#allocation6 + $0xc8] sm:$0xff]  }
 0x22f   :  { %3329 = vmatprep.subr.bf16.mxu0 %v8811_v53  ;;  %v8877_v52 = vld [vmem:[#allocation6 + $0x88] sm:$0xff]   ;;  %v8878_v53 = vld [vmem:[#allocation6 + $0xc0] sm:$0xff]  }
 0x231   :  { %3287 = vmatpush1.bf16.msra.mxu1 %v8806_v54  ;;  %v8879_v54 = vld [vmem:[#allocation6 + $0x80] sm:$0xff]  }
 0x232   :  { %3330 = vmatpush1.bf16.msra.mxu0 %v8809_v56  ;;  %3288 = vmatprep.subr.bf16.mxu1 %v8814_v58 }
 0x233   :  { %3331 = vmatprep.subr.bf16.mxu0 %v8817_v59 }
 0x235   :  { %3289 = vmatpush1.bf16.msra.mxu1 %v8812_v60 }
 0x236   :  { %3332 = vmatpush1.bf16.msra.mxu0 %v8815_v63  ;;  %3290 = vmatprep.subr.bf16.mxu1 %v8820_v1  ;;  %v2282_v1 = vld [vmem:[%s10004_s4] sm:$0xf] }
 0x237   :  { %3333 = vmatprep.subr.bf16.mxu0 %v8823_v2  ;;  %v2291_v2 = vrot.slane %v2282_v1, %v9819_v5 }
 0x239   :  { %3291 = vmatpush1.bf16.msra.mxu1 %v8818_v4  ;;  %v2287_v4 = vrot.slane %v2282_v1, %v9822_v7 }
 0x23a   :  { %3334 = vmatpush1.bf16.msra.mxu0 %v8821_v8  ;;  %3292 = vmatprep.subr.bf16.mxu1 %v8826_v10 }
 0x23b   :  { %8182 = vmatprep.subr.bf16.mxu0 %v8864_v41 }
 0x23d   :  { %3293 = vmatpush2.bf16.msra.mxu1 %v8824_v11  ;;  %3352 = vmatmul.mubr.bf16.vlgmr.msra.gmra.mxu0 %v9857_v33  ;;  %v8858_v33 = vld [vmem:[#allocation6 + $0x50] sm:$0xff]  }
 0x23e   :  { %3294 = vmatprep.subr.bf16.mxu1 %v8829_v12  ;;  %8183 = vmatpush3.bf16.msra.mxu0 %v8865_v42 }
 0x23f   :  { %8184 = vmatprep.subr.bf16.mxu0 %v8866_v43 }
 0x241   :  { %3295 = vmatpush2.bf16.msra.mxu1 %v8827_v13 }
 0x242   :  { %3296 = vmatprep.subr.bf16.mxu1 %v8832_v14  ;;  %8185 = vmatpush3.bf16.msra.mxu0 %v8867_v35 }
 0x243   :  { %8186 = vmatprep.subr.bf16.mxu0 %v8868_v44 }
 0x245   :  { %3297 = vmatpush2.bf16.msra.mxu1 %v8830_v15 }
 0x246   :  { %3298 = vmatprep.subr.bf16.mxu1 %v8835_v16  ;;  %8187 = vmatpush3.bf16.msra.mxu0 %v8869_v45 }
 0x247   :  { %8188 = vmatprep.subr.bf16.mxu0 %v8870_v37 }
 0x249   :  { %3299 = vmatpush2.bf16.msra.mxu1 %v8833_v17 }
 0x24a   :  { %3300 = vmatprep.subr.bf16.mxu1 %v8838_v18  ;;  %8189 = vmatpush3.bf16.msra.mxu0 %v8871_v46 }
 0x24b   :  { %8190 = vmatprep.subr.bf16.mxu0 %v8872_v27 }
 0x24d   :  { %3301 = vmatpush2.bf16.msra.mxu1 %v8836_v19 }
 0x24e   :  { %3302 = vmatprep.subr.bf16.mxu1 %v8841_v20  ;;  %8191 = vmatpush3.bf16.msra.mxu0 %v8873_v47 }
 0x24f   :  { %8192 = vmatprep.subr.bf16.mxu0 %v8874_v48 }
 0x251   :  { %3303 = vmatpush2.bf16.msra.mxu1 %v8839_v21 }
 0x252   :  { %3304 = vmatprep.subr.bf16.mxu1 %v8844_v6  ;;  %8193 = vmatpush3.bf16.msra.mxu0 %v8875_v49 }
 0x253   :  { %8194 = vmatprep.subr.bf16.mxu0 %v8876_v50 }
 0x255   :  { %3305 = vmatpush2.bf16.msra.mxu1 %v8842_v22 }
 0x256   :  { %3306 = vmatprep.subr.bf16.mxu1 %v8847_v51  ;;  %8195 = vmatpush3.bf16.msra.mxu0 %v8877_v52 }
 0x257   :  { %8196 = vmatprep.subr.bf16.mxu0 %v8878_v53 }
 0x259   :  { %3307 = vmatpush2.bf16.msra.mxu1 %v8845_v0 }
 0x25a   :  { %8160 = vmatprep.subr.bf16.mxu1 %v8848_v3  ;;  %8197 = vmatpush3.bf16.msra.mxu0 %v8879_v54 }
 0x25b   :  { %v3138_v56 = vpop.f32.mrf.mxu1 }
 0x25c   :  { %3309 = vmatmul.mubr.bf16.vlgmr.msra.gmra.mxu1 %v9847_v28  ;;  %v8860_v28 = vld [vmem:[#allocation6 + $0x48] sm:$0xff]   ;;  %v3139_v14 = vadd.f32 %v3138_v56, %v2287_v4 }
 0x25d   :  { %8161 = vmatpush3.bf16.msra.mxu1 %v8849_v23  ;;  %v3140_v58 = vpop.f32.mrf.mxu1 }
 0x25e   :  { %8162 = vmatprep.subr.bf16.mxu1 %v8850_v9  ;;  %v3141_v12 = vadd.f32 %v3140_v58, %v2291_v2 }
 0x25f   :  { %v3142_v60 = vpop.f32.mrf.mxu1 }
 0x260   :  { %v3143_v13 = vadd.f32 %v3142_v60, %v2287_v4 }
 0x261   :  { %8163 = vmatpush3.bf16.msra.mxu1 %v8851_v24  ;;  %v3144_v8 = vpop.f32.mrf.mxu1 }
 0x262   :  { %8164 = vmatprep.subr.bf16.mxu1 %v8852_v25  ;;  %v3145_v17 = vadd.f32 %v3144_v8, %v2291_v2  ;;  %v8880_v8 = vld [vmem:[#allocation7 + $0xe0] ss:$16 sps:$4 sm:$0xff]  }
 0x265   :  { %8165 = vmatpush3.bf16.msra.mxu1 %v8853_v26 }
 0x266   :  { %8166 = vmatprep.subr.bf16.mxu1 %v8854_v29 }
 0x269   :  { %8167 = vmatpush3.bf16.msra.mxu1 %v8855_v30 }
 0x26a   :  { %8168 = vmatprep.subr.bf16.mxu1 %v8856_v31 }
 0x26d   :  { %8169 = vmatpush3.bf16.msra.mxu1 %v8857_v32 }
 0x26e   :  { %8170 = vmatprep.subr.bf16.mxu1 %v8858_v33 }
 0x271   :  { %8171 = vmatpush3.bf16.msra.mxu1 %v8859_v34 }
 0x272   :  { %8172 = vmatprep.subr.bf16.mxu1 %v8860_v28 }
 0x275   :  { %8173 = vmatpush3.bf16.msra.mxu1 %v8861_v36  ;;  %v2299_v36 = vrot.slane %v2282_v1, %v9836_v55 }
 0x276   :  { %8174 = vmatprep.subr.bf16.mxu1 %v8862_v38  ;;  %v2295_v38 = vrot.slane %v2282_v1, %v9839_v57 }
 0x279   :  { %8175 = vmatpush3.bf16.msra.mxu1 %v8863_v39 }
 0x29d   :  { %v3181_v59 = vpop.f32.mrf.mxu0 }
 0x29e   :  { %v3182_v20 = vadd.f32 %v3181_v59, %v3139_v14  ;;  %v8891_v14 = vld [vmem:[#allocation7 + $0xcc] ss:$16 sps:$4 sm:$0xff]  }
 0x29f   :  { %v3183_v63 = vpop.f32.mrf.mxu0 }
 0x2a0   :  { %v3184_v18 = vadd.f32 %v3183_v63, %v3141_v12  ;;  %v8885_v12 = vld [vmem:[#allocation7 + $0xec] ss:$16 sps:$4 sm:$0xff]  }
 0x2a1   :  { %v3185_v10 = vpop.f32.mrf.mxu0  ;;  %3977 = vmatprep.subr.bf16.mxu0 %v8885_v12  ;;  %v8940_v12 = vld [vmem:[#allocation9 + $0xc8] ss:$20 sps:$4 sm:$0xff]  }
 0x2a2   :  { %v3186_v19 = vadd.f32 %v3185_v10, %v3143_v13  ;;  %v8882_v10 = vld [vmem:[#allocation7 + $0xe4] ss:$16 sps:$4 sm:$0xff]  }
 0x2a3   :  { %v3187_v15 = vpop.f32.mrf.mxu0  ;;  %v8888_v13 = vld [vmem:[#allocation7 + $0xc4] ss:$16 sps:$4 sm:$0xff]   ;;  %3934 = vmatprep.subr.bf16.mxu1 %v8882_v10  ;;  %v8942_v10 = vld [vmem:[#allocation9 + $0xcc] ss:$20 sps:$4 sm:$0xff]  }
 0x2a4   :  { %v3188_v6 = vadd.f32 %v3187_v15, %v3145_v17  ;;  %v8886_v15 = vld [vmem:[#allocation7 + $0xc0] ss:$16 sps:$4 sm:$0xff]   ;;  %v8894_v17 = vld [vmem:[#allocation7 + $0xa4] ss:$16 sps:$4 sm:$0xff]  }
 0x2dc   :  { %v3224_v11 = vpop.f32.mrf.mxu1 }
 0x2dd   :  { %v3225_v0 = vadd.f32 %v3224_v11, %v3182_v20  ;;  %v3267_v31 = vpop.f32.mrf.mxu0  ;;  %v8883_v11 = vld [vmem:[#allocation7 + $0xe8] ss:$16 sps:$4 sm:$0xff]  }
 0x2de   :  { %v3226_v16 = vpop.f32.mrf.mxu1  ;;  %v3268_v43 = vadd.f32 %v3267_v31, %v2295_v38  ;;  %v8895_v20 = vld [vmem:[#allocation7 + $0xa8] ss:$16 sps:$4 sm:$0xff]   ;;  %v8921_v31 = vld [vmem:[#allocation7 + $0x2c] ss:$16 sps:$4 sm:$0xff]  }
 0x2df   :  { %v3227_v22 = vadd.f32 %v3226_v16, %v3184_v18  ;;  %v3362_v26 = vmax.f32 %v3225_v0, 0.0  ;;  %v3269_v32 = vpop.f32.mrf.mxu0  ;;  %v8889_v16 = vld [vmem:[#allocation7 + $0xc8] ss:$16 sps:$4 sm:$0xff]   ;;  %v8897_v18 = vld [vmem:[#allocation7 + $0xac] ss:$16 sps:$4 sm:$0xff]  }
 0x2e0   :  { %v3228_v21 = vpop.f32.mrf.mxu1  ;;  %v3270_v42 = vadd.f32 %v3269_v32, %v2299_v36  ;;  %v8906_v0 = vld [vmem:[#allocation7 + $0x64] ss:$16 sps:$4 sm:$0xff]   ;;  %v8916_v32 = vld [vmem:[#allocation7 + $0x20] ss:$16 sps:$4 sm:$0xff]  }
 0x2e1   :  { %v3229_v51 = vadd.f32 %v3228_v21, %v3186_v19  ;;  %v3363_v24 = vmax.f32 %v3227_v22, 0.0  ;;  %v3271_v33 = vpop.f32.mrf.mxu0  ;;  %v8892_v19 = vld [vmem:[#allocation7 + $0xa0] ss:$16 sps:$4 sm:$0xff]   ;;  %v8900_v21 = vld [vmem:[#allocation7 + $0x84] ss:$16 sps:$4 sm:$0xff]  }
 0x2e2   :  { %v3230_v3 = vpop.f32.mrf.mxu1  ;;  %v3272_v44 = vadd.f32 %v3271_v33, %v2295_v38  ;;  %v8898_v22 = vld [vmem:[#allocation7 + $0x80] ss:$16 sps:$4 sm:$0xff]   ;;  %v8919_v33 = vld [vmem:[#allocation7 + $0x28] ss:$16 sps:$4 sm:$0xff]  }
 0x2e3   :  { %v3231_v23 = vadd.f32 %v3230_v3, %v3188_v6  ;;  %v3366_v9 = vmax.f32 %v3229_v51, 0.0  ;;  %v3273_v34 = vpop.f32.mrf.mxu0  ;;  %v8903_v6 = vld [vmem:[#allocation7 + $0x8c] ss:$16 sps:$4 sm:$0xff]   ;;  %v8901_v51 = vld [vmem:[#allocation7 + $0x88] ss:$16 sps:$4 sm:$0xff]  }
 0x2e4   :  { %v3274_v47 = vadd.f32 %v3273_v34, %v2299_v36  ;;  %v8909_v3 = vld [vmem:[#allocation7 + $0x6c] ss:$16 sps:$4 sm:$0xff]   ;;  %v8924_v34 = vld [vmem:[#allocation7 + $0x4] ss:$16 sps:$4 sm:$0xff]   ;;  %v8922_v36 = vld [vmem:[#allocation7] ss:$16 sps:$4 sm:$0xff]  }
 0x2e5   :  { %v3367_v25 = vmax.f32 %v3231_v23, 0.0  ;;  %v3370_v30 = vpack.c.bf16 %v3366_v9, %v3362_v26  ;;  %v8904_v23 = vld [vmem:[#allocation7 + $0x60] ss:$16 sps:$4 sm:$0xff]   ;;  %v8907_v9 = vld [vmem:[#allocation7 + $0x68] ss:$16 sps:$4 sm:$0xff]  }
 0x2e6   :  { %v8910_v26 = vld [vmem:[#allocation7 + $0x40] ss:$16 sps:$4 sm:$0xff]   ;;  %v8925_v38 = vld [vmem:[#allocation7 + $0x8] ss:$16 sps:$4 sm:$0xff]  }
 0x2e7   :  { %v3371_v29 = vpack.c.bf16 %v3367_v25, %v3363_v24  ;;  %v8912_v24 = vld [vmem:[#allocation7 + $0x44] ss:$16 sps:$4 sm:$0xff]   ;;  %v8915_v25 = vld [vmem:[#allocation7 + $0x4c] ss:$16 sps:$4 sm:$0xff]  }
 0x2e9   :  { %3669 = vmatprep.mubr.bf16.mxu1 %v3371_v29  ;;  %v8913_v29 = vld [vmem:[#allocation7 + $0x48] ss:$16 sps:$4 sm:$0xff]  }
 0x2ea   :  { %3670 = vmatmul.mubr.bf16.vlgmr.msra.gmra.mxu1 %v3370_v30  ;;  %v8918_v30 = vld [vmem:[#allocation7 + $0x24] ss:$16 sps:$4 sm:$0xff]  }
 0x2eb   :  { %3966 = vmatprep.mubr.bf16.mxu1 %v9660_v40  ;;  %3935 = vmatpush1.bf16.msra.mxu1 %v8880_v8  ;;  %v8937_v8 = vld [vmem:[#allocation9 + $0x370] ss:$20 sps:$4 sm:$0xff]  }
 0x2ec   :  { %3936 = vmatprep.subr.bf16.mxu1 %v8888_v13  ;;  %v8943_v13 = vld [vmem:[#allocation9 + $0x348] ss:$20 sps:$4 sm:$0xff]  }
 0x2ef   :  { %3937 = vmatpush1.bf16.msra.mxu1 %v8886_v15  ;;  %v8951_v15 = vld [vmem:[#allocation9 + $0x324] ss:$20 sps:$4 sm:$0xff]  }
 0x2f0   :  { %3938 = vmatprep.subr.bf16.mxu1 %v8894_v17  ;;  %v8949_v17 = vld [vmem:[#allocation9 + $0x320] ss:$20 sps:$4 sm:$0xff]  }
 0x2f3   :  { %3939 = vmatpush1.bf16.msra.mxu1 %v8892_v19  ;;  %v8957_v19 = vld [vmem:[#allocation9 + $0x2fc] ss:$20 sps:$4 sm:$0xff]  }
 0x2f4   :  { %3940 = vmatprep.subr.bf16.mxu1 %v8900_v21  ;;  %v8955_v21 = vld [vmem:[#allocation9 + $0x2f8] ss:$20 sps:$4 sm:$0xff]  }
 0x2f7   :  { %3941 = vmatpush1.bf16.msra.mxu1 %v8898_v22  ;;  %v8963_v22 = vld [vmem:[#allocation9 + $0x2d4] ss:$20 sps:$4 sm:$0xff]  }
 0x2f8   :  { %3942 = vmatprep.subr.bf16.mxu1 %v8906_v0  ;;  %v8961_v0 = vld [vmem:[#allocation9 + $0x2d0] ss:$20 sps:$4 sm:$0xff]  }
 0x2fb   :  { %3943 = vmatpush1.bf16.msra.mxu1 %v8904_v23  ;;  %v8969_v23 = vld [vmem:[#allocation9 + $0x2ac] ss:$20 sps:$4 sm:$0xff]  }
 0x2fc   :  { %3944 = vmatprep.subr.bf16.mxu1 %v8912_v24  ;;  %v8967_v24 = vld [vmem:[#allocation9 + $0x2a8] ss:$20 sps:$4 sm:$0xff]  }
 0x2fd   :  { %v3353_v28 = vpop.f32.mrf.mxu0 }
 0x2ff   :  { %v3355_v39 = vpop.f32.mrf.mxu0  ;;  %3945 = vmatpush1.bf16.msra.mxu1 %v8910_v26  ;;  %v8975_v26 = vld [vmem:[#allocation9 + $0x284] ss:$20 sps:$4 sm:$0xff]  }
 0x300   :  { %3946 = vmatprep.subr.bf16.mxu1 %v8918_v30  ;;  %v8973_v30 = vld [vmem:[#allocation9 + $0x280] ss:$20 sps:$4 sm:$0xff]  }
 0x301   :  { %v3357_v37 = vpop.f32.mrf.mxu0 }
 0x303   :  { %v3359_v54 = vpop.f32.mrf.mxu0  ;;  %3947 = vmatpush1.bf16.msra.mxu1 %v8916_v32  ;;  %v8981_v32 = vld [vmem:[#allocation9 + $0x4dc] ss:$20 sps:$4 sm:$0xff]  }
 0x304   :  { %3948 = vmatprep.subr.bf16.mxu1 %v8924_v34  ;;  %v8979_v34 = vld [vmem:[#allocation9 + $0x4d8] ss:$20 sps:$4 sm:$0xff]  }
 0x307   :  { %3949 = vmatpush1.bf16.msra.mxu1 %v8922_v36  ;;  %v8987_v36 = vld [vmem:[#allocation9 + $0x4b4] ss:$20 sps:$4 sm:$0xff]  }
 0x31c   :  { %v3310_v41 = vpop.f32.mrf.mxu1 }
 0x31d   :  { %v3311_v46 = vadd.f32 %v3310_v41, %v3268_v43  ;;  %v8933_v41 = vld [vmem:[#allocation9 + $0x39c] ss:$20 sps:$4 sm:$0xff]  }
 0x31e   :  { %v3312_v35 = vpop.f32.mrf.mxu1 }
 0x31f   :  { %v3313_v45 = vadd.f32 %v3312_v35, %v3270_v42  ;;  %v3354_v56 = vadd.f32 %v3353_v28, %v3311_v46  ;;  %v8927_v28 = vld [vmem:[#allocation7 + $0xc] ss:$16 sps:$4 sm:$0xff]  }
 0x320   :  { %v3314_v27 = vpop.f32.mrf.mxu1 }
 0x321   :  { %v3315_v48 = vadd.f32 %v3314_v27, %v3272_v44  ;;  %v3356_v50 = vadd.f32 %v3355_v39, %v3313_v45  ;;  %v3364_v1 = vmax.f32 %v3354_v56, 0.0  ;;  %v8930_v39 = vld [vmem:[#allocation9 + $0x11c] ss:$20 sps:$4 sm:$0xff]  }
 0x322   :  { %v3316_v49 = vpop.f32.mrf.mxu1  ;;  %5075 = vmatprep.subr.bf16.mxu1 %v8930_v39  ;;  %v8985_v39 = vld [vmem:[#allocation9 + $0x4b0] ss:$20 sps:$4 sm:$0xff]  }
 0x323   :  { %v3358_v52 = vadd.f32 %v3357_v37, %v3315_v48  ;;  %v3317_v53 = vadd.f32 %v3316_v49, %v3274_v47  ;;  %v3365_v60 = vmax.f32 %v3356_v50, 0.0  ;;  %v7629_v47 = vld [vmem:[%s10006_s6] ss:$0 sm:$0xff] }
 0x325   :  { %v3360_v58 = vadd.f32 %v3359_v54, %v3317_v53  ;;  %v3368_v59 = vmax.f32 %v3358_v52, 0.0 }
 0x327   :  { %v3369_v63 = vmax.f32 %v3360_v58, 0.0  ;;  %v3372_v4 = vpack.c.bf16 %v3368_v59, %v3364_v1  ;;  %v8928_v59 = vld [vmem:[#allocation9 + $0x118] ss:$20 sps:$4 sm:$0xff]   ;;  %v8936_v1 = vld [vmem:[#allocation9 + $0xf4] ss:$20 sps:$4 sm:$0xff]  }
 0x329   :  { %v3373_v2 = vpack.c.bf16 %v3369_v63, %v3365_v60  ;;  %v8931_v60 = vld [vmem:[#allocation9 + $0x398] ss:$20 sps:$4 sm:$0xff]  }
 0x32b   :  { %3710 = vmatprep.mubr.bf16.mxu0 %v3373_v2  ;;  %v8939_v2 = vld [vmem:[#allocation9 + $0x374] ss:$20 sps:$4 sm:$0xff]  }
 0x32c   :  { %3711 = vmatmul.mubr.bf16.vlgmr.msra.gmra.mxu0 %v3372_v4  ;;  %v8934_v4 = vld [vmem:[#allocation9 + $0xf0] ss:$20 sps:$4 sm:$0xff]  }
 0x32d   :  { %4009 = vmatprep.mubr.bf16.mxu0 %v9660_v40  ;;  %3978 = vmatpush1.bf16.msra.mxu0 %v8883_v11  ;;  %v8945_v11 = vld [vmem:[#allocation9 + $0x34c] ss:$20 sps:$4 sm:$0xff]  }
 0x32e   :  { %3979 = vmatprep.subr.bf16.mxu0 %v8891_v14  ;;  %v8948_v14 = vld [vmem:[#allocation9 + $0xa4] ss:$20 sps:$4 sm:$0xff]  }
 0x331   :  { %3980 = vmatpush1.bf16.msra.mxu0 %v8889_v16  ;;  %v8946_v16 = vld [vmem:[#allocation9 + $0xa0] ss:$20 sps:$4 sm:$0xff]  }
 0x332   :  { %3981 = vmatprep.subr.bf16.mxu0 %v8897_v18  ;;  %v8954_v18 = vld [vmem:[#allocation9 + $0x7c] ss:$20 sps:$4 sm:$0xff]  }
 0x335   :  { %3982 = vmatpush1.bf16.msra.mxu0 %v8895_v20  ;;  %v8952_v20 = vld [vmem:[#allocation9 + $0x78] ss:$20 sps:$4 sm:$0xff]  }
 0x336   :  { %3983 = vmatprep.subr.bf16.mxu0 %v8903_v6  ;;  %v8960_v6 = vld [vmem:[#allocation9 + $0x54] ss:$20 sps:$4 sm:$0xff]  }
 0x339   :  { %3984 = vmatpush1.bf16.msra.mxu0 %v8901_v51  ;;  %v8958_v51 = vld [vmem:[#allocation9 + $0x50] ss:$20 sps:$4 sm:$0xff]  }
 0x33a   :  { %3985 = vmatprep.subr.bf16.mxu0 %v8909_v3  ;;  %v8966_v3 = vld [vmem:[#allocation9 + $0x2c] ss:$20 sps:$4 sm:$0xff]  }
 0x33d   :  { %3986 = vmatpush1.bf16.msra.mxu0 %v8907_v9  ;;  %v8964_v9 = vld [vmem:[#allocation9 + $0x28] ss:$20 sps:$4 sm:$0xff]  }
 0x33e   :  { %3987 = vmatprep.subr.bf16.mxu0 %v8915_v25  ;;  %v8972_v25 = vld [vmem:[#allocation9 + $0x4] ss:$20 sps:$4 sm:$0xff]  }
 0x341   :  { %3988 = vmatpush1.bf16.msra.mxu0 %v8913_v29  ;;  %v8970_v29 = vld [vmem:[#allocation9] ss:$20 sps:$4 sm:$0xff]  }
 0x342   :  { %3989 = vmatprep.subr.bf16.mxu0 %v8921_v31  ;;  %v8978_v31 = vld [vmem:[#allocation9 + $0x25c] ss:$20 sps:$4 sm:$0xff]  }
 0x345   :  { %3990 = vmatpush1.bf16.msra.mxu0 %v8919_v33  ;;  %v8976_v33 = vld [vmem:[#allocation9 + $0x258] ss:$20 sps:$4 sm:$0xff]  }
 0x346   :  { %3991 = vmatprep.subr.bf16.mxu0 %v8927_v28  ;;  %v8984_v28 = vld [vmem:[#allocation9 + $0x234] ss:$20 sps:$4 sm:$0xff]  }
 0x349   :  { %3992 = vmatpush1.bf16.msra.mxu0 %v8925_v38  ;;  %v8982_v38 = vld [vmem:[#allocation9 + $0x230] ss:$20 sps:$4 sm:$0xff]  }
 0x34a   :  { %5118 = vmatprep.subr.bf16.mxu0 %v8933_v41  ;;  %v8990_v41 = vld [vmem:[#allocation9 + $0x20c] ss:$20 sps:$4 sm:$0xff]  }
 0x3aa   :  { %v8176_v42 = vpop.f32.mrf.mxu1 }
 0x3ac   :  { %v8177_v43 = vpop.f32.mrf.mxu1 }
 0x3ad   :  { %v8178_v46 = vadd.f32 %v8177_v43, %v8176_v42  ;;  %v8993_v42 = vld [vmem:[#allocation9 + $0x48c] ss:$20 sps:$4 sm:$0xff]   ;;  %v8988_v43 = vld [vmem:[#allocation9 + $0x208] ss:$20 sps:$4 sm:$0xff]  }
 0x3ae   :  { %v8179_v35 = vpop.f32.mrf.mxu1 }
 0x3af   :  { %v3672_v52 = vadd.f32 %v8178_v46, %v7629_v47  ;;  %v8997_v46 = vld [vmem:[#allocation9 + $0x460] ss:$20 sps:$4 sm:$0xff]  }
 0x3b0   :  { %v8180_v44 = vpop.f32.mrf.mxu1 }
 0x3b1   :  { %v8181_v27 = vadd.f32 %v8180_v44, %v8179_v35  ;;  %v8991_v35 = vld [vmem:[#allocation9 + $0x488] ss:$20 sps:$4 sm:$0xff]   ;;  %v8996_v44 = vld [vmem:[#allocation9 + $0x1e4] ss:$20 sps:$4 sm:$0xff]  }
 0x3b3   :  { %v3675_v53 = vadd.f32 %v8181_v27, %v7629_v47  ;;  %v9002_v27 = vld [vmem:[#allocation9 + $0x1bc] ss:$20 sps:$4 sm:$0xff]  }
 0x3b4   :  { %v9005_v47 = vld [vmem:[#allocation9 + $0x43c] ss:$20 sps:$4 sm:$0xff]  }
 0x3ec   :  { %v8198_v45 = vpop.f32.mrf.mxu0 }
 0x3ee   :  { %v8199_v37 = vpop.f32.mrf.mxu0 }
 0x3ef   :  { %v8200_v49 = vadd.f32 %v8199_v37, %v8198_v45  ;;  %v8999_v45 = vld [vmem:[#allocation9 + $0x464] ss:$20 sps:$4 sm:$0xff]   ;;  %v8994_v37 = vld [vmem:[#allocation9 + $0x1e0] ss:$20 sps:$4 sm:$0xff]  }
 0x3f0   :  { %v8201_v48 = vpop.f32.mrf.mxu0 }
 0x3f1   :  { %v3713_v56 = vadd.f32 %v8200_v49, %v3672_v52  ;;  %v9003_v49 = vld [vmem:[#allocation9 + $0x438] ss:$20 sps:$4 sm:$0xff]   ;;  %v9011_v52 = vld [vmem:[#allocation9 + $0x414] ss:$20 sps:$4 sm:$0xff]  }
 0x3f2   :  { %v8202_v50 = vpop.f32.mrf.mxu0 }
 0x3f3   :  { %v8203_v54 = vadd.f32 %v8202_v50, %v8201_v48  ;;  %v9000_v48 = vld [vmem:[#allocation9 + $0x1b8] ss:$20 sps:$4 sm:$0xff]   ;;  %v9008_v50 = vld [vmem:[#allocation9 + $0x194] ss:$20 sps:$4 sm:$0xff]  }
 0x3f5   :  { %v3716_v58 = vadd.f32 %v8203_v54, %v3675_v53  ;;  %v9006_v53 = vld [vmem:[#allocation9 + $0x190] ss:$20 sps:$4 sm:$0xff]  }
 0x3f6   :  { %v9009_v54 = vld [vmem:[#allocation9 + $0x410] ss:$20 sps:$4 sm:$0xff]  }
 0x3f7   :  { %v3719_v63 = vpack.c.bf16 %v3716_v58, %v3713_v56  ;;  %v9014_v56 = vld [vmem:[#allocation9 + $0x16c] ss:$20 sps:$4 sm:$0xff]  }
 0x3f8   :  { %v9017_v58 = vld [vmem:[#allocation9 + $0x3ec] ss:$20 sps:$4 sm:$0xff]  }
 0x3f9   :  { %3967 = vmatmul.mubr.bf16.vlgmr.msra.gmra.mxu1 %v3719_v63  ;;  %4010 = vmatmul.mubr.bf16.vlgmr.msra.gmra.mxu0 %v3719_v63  ;;  %v9020_v63 = vld [vmem:[#allocation9 + $0x144] ss:$20 sps:$4 sm:$0xff]  }
 0x3fa   :  { %5076 = vmatpush1.bf16.msra.mxu1 %v8928_v59  ;;  %5119 = vmatpush1.bf16.msra.mxu0 %v8931_v60  ;;  %v9012_v59 = vld [vmem:[#allocation9 + $0x168] ss:$20 sps:$4 sm:$0xff]  }
 0x3fb   :  { %5077 = vmatprep.subr.bf16.mxu1 %v8936_v1  ;;  %5120 = vmatprep.subr.bf16.mxu0 %v8939_v2  ;;  %v9015_v60 = vld [vmem:[#allocation9 + $0x3e8] ss:$20 sps:$4 sm:$0xff]   ;;  %v9023_v1 = vld [vmem:[#allocation9 + $0x3c4] ss:$20 sps:$4 sm:$0xff]   ;;  %v9018_v2 = vld [vmem:[#allocation9 + $0x140] ss:$20 sps:$4 sm:$0xff]  }
 0x3fe   :  { %5078 = vmatpush1.bf16.msra.mxu1 %v8934_v4  ;;  %5121 = vmatpush1.bf16.msra.mxu0 %v8937_v8  ;;  %v9021_v4 = vld [vmem:[#allocation9 + $0x3c0] ss:$20 sps:$4 sm:$0xff]   ;;  %v9026_v8 = vld [vmem:[#allocation9 + $0x124] ss:$20 sps:$4 sm:$0xff]  }
 0x3ff   :  { %5079 = vmatprep.subr.bf16.mxu1 %v8942_v10  ;;  %5122 = vmatprep.subr.bf16.mxu0 %v8945_v11  ;;  %v9029_v10 = vld [vmem:[#allocation9 + $0x3a4] ss:$20 sps:$4 sm:$0xff]  }
 0x402   :  { %5080 = vmatpush1.bf16.msra.mxu1 %v8940_v12  ;;  %5123 = vmatpush1.bf16.msra.mxu0 %v8943_v13  ;;  %v3752_v13 = vld [vmem:[%s10008_s8] sm:$0xf] }
 0x403   :  { %5081 = vmatprep.subr.bf16.mxu1 %v8948_v14  ;;  %5124 = vmatprep.subr.bf16.mxu0 %v8951_v15 }
 0x406   :  { %5082 = vmatpush1.bf16.msra.mxu1 %v8946_v16  ;;  %5125 = vmatpush1.bf16.msra.mxu0 %v8949_v17  ;;  %v3761_v16 = vrot.slane %v3752_v13, %v9819_v5  ;;  %v3769_v17 = vrot.slane %v3752_v13, %v9836_v55 }
 0x407   :  { %5083 = vmatprep.subr.bf16.mxu1 %v8954_v18  ;;  %5126 = vmatprep.subr.bf16.mxu0 %v8957_v19  ;;  %v3757_v18 = vrot.slane %v3752_v13, %v9822_v7  ;;  %v3765_v19 = vrot.slane %v3752_v13, %v9839_v57  ;;  %v9080_v13 = vld [vmem:[#allocation9 + $0x23c] ss:$20 sps:$4 sm:$0xff]  }
 0x40a   :  { %5084 = vmatpush1.bf16.msra.mxu1 %v8952_v20  ;;  %5127 = vmatpush1.bf16.msra.mxu0 %v8955_v21 }
 0x40b   :  { %5085 = vmatprep.subr.bf16.mxu1 %v8960_v6  ;;  %5128 = vmatprep.subr.bf16.mxu0 %v8963_v22 }
 0x40e   :  { %5086 = vmatpush1.bf16.msra.mxu1 %v8958_v51  ;;  %5129 = vmatpush1.bf16.msra.mxu0 %v8961_v0 }
 0x40f   :  { %5087 = vmatprep.subr.bf16.mxu1 %v8966_v3  ;;  %5130 = vmatprep.subr.bf16.mxu0 %v8969_v23 }
 0x412   :  { %5088 = vmatpush1.bf16.msra.mxu1 %v8964_v9  ;;  %5131 = vmatpush1.bf16.msra.mxu0 %v8967_v24 }
 0x413   :  { %5089 = vmatprep.subr.bf16.mxu1 %v8972_v25  ;;  %5132 = vmatprep.subr.bf16.mxu0 %v8975_v26 }
 0x416   :  { %5090 = vmatpush1.bf16.msra.mxu1 %v8970_v29  ;;  %5133 = vmatpush1.bf16.msra.mxu0 %v8973_v30 }
 0x417   :  { %5091 = vmatprep.subr.bf16.mxu1 %v8978_v31  ;;  %5134 = vmatprep.subr.bf16.mxu0 %v8981_v32  ;;  %v9024_v31 = vld [vmem:[#allocation9 + $0x120] ss:$20 sps:$4 sm:$0xff]  }
 0x418   :  { %v9027_v32 = vld [vmem:[#allocation9 + $0x3a0] ss:$20 sps:$4 sm:$0xff]  }
 0x41a   :  { %5092 = vmatpush2.bf16.msra.mxu1 %v8976_v33  ;;  %5135 = vmatpush2.bf16.msra.mxu0 %v8979_v34 }
 0x41b   :  { %5093 = vmatprep.subr.bf16.mxu1 %v8984_v28  ;;  %5136 = vmatprep.subr.bf16.mxu0 %v8987_v36  ;;  %v9032_v28 = vld [vmem:[#allocation9 + $0xfc] ss:$20 sps:$4 sm:$0xff]  }
 0x41c   :  { %v9035_v36 = vld [vmem:[#allocation9 + $0x37c] ss:$20 sps:$4 sm:$0xff]  }
 0x41e   :  { %5094 = vmatpush2.bf16.msra.mxu1 %v8982_v38  ;;  %5137 = vmatpush2.bf16.msra.mxu0 %v8985_v39  ;;  %v9030_v38 = vld [vmem:[#allocation9 + $0xf8] ss:$20 sps:$4 sm:$0xff]  }
 0x41f   :  { %5095 = vmatprep.subr.bf16.mxu1 %v8990_v41  ;;  %5138 = vmatprep.subr.bf16.mxu0 %v8993_v42  ;;  %v9033_v39 = vld [vmem:[#allocation9 + $0x378] ss:$20 sps:$4 sm:$0xff]   ;;  %v9038_v41 = vld [vmem:[#allocation9 + $0xd4] ss:$20 sps:$4 sm:$0xff]  }
 0x420   :  { %v9041_v42 = vld [vmem:[#allocation9 + $0x354] ss:$20 sps:$4 sm:$0xff]  }
 0x422   :  { %5096 = vmatpush2.bf16.msra.mxu1 %v8988_v43  ;;  %5139 = vmatpush2.bf16.msra.mxu0 %v8991_v35  ;;  %v9036_v43 = vld [vmem:[#allocation9 + $0xd0] ss:$20 sps:$4 sm:$0xff]  }
 0x423   :  { %5097 = vmatprep.subr.bf16.mxu1 %v8996_v44  ;;  %5140 = vmatprep.subr.bf16.mxu0 %v8999_v45  ;;  %v9039_v35 = vld [vmem:[#allocation9 + $0x350] ss:$20 sps:$4 sm:$0xff]   ;;  %v9044_v44 = vld [vmem:[#allocation9 + $0xac] ss:$20 sps:$4 sm:$0xff]  }
 0x424   :  { %v9047_v45 = vld [vmem:[#allocation9 + $0x32c] ss:$20 sps:$4 sm:$0xff]  }
 0x426   :  { %5098 = vmatpush2.bf16.msra.mxu1 %v8994_v37  ;;  %5141 = vmatpush2.bf16.msra.mxu0 %v8997_v46  ;;  %v9042_v37 = vld [vmem:[#allocation9 + $0xa8] ss:$20 sps:$4 sm:$0xff]  }
 0x427   :  { %5099 = vmatprep.subr.bf16.mxu1 %v9002_v27  ;;  %5142 = vmatprep.subr.bf16.mxu0 %v9005_v47  ;;  %v9045_v46 = vld [vmem:[#allocation9 + $0x328] ss:$20 sps:$4 sm:$0xff]   ;;  %v9050_v27 = vld [vmem:[#allocation9 + $0x84] ss:$20 sps:$4 sm:$0xff]  }
 0x428   :  { %v9053_v47 = vld [vmem:[#allocation9 + $0x304] ss:$20 sps:$4 sm:$0xff]  }
 0x42a   :  { %5100 = vmatpush2.bf16.msra.mxu1 %v9000_v48  ;;  %5143 = vmatpush2.bf16.msra.mxu0 %v9003_v49  ;;  %v9048_v48 = vld [vmem:[#allocation9 + $0x80] ss:$20 sps:$4 sm:$0xff]  }
 0x42b   :  { %5101 = vmatprep.subr.bf16.mxu1 %v9008_v50  ;;  %5144 = vmatprep.subr.bf16.mxu0 %v9011_v52  ;;  %v9051_v49 = vld [vmem:[#allocation9 + $0x300] ss:$20 sps:$4 sm:$0xff]   ;;  %v9056_v50 = vld [vmem:[#allocation9 + $0x5c] ss:$20 sps:$4 sm:$0xff]  }
 0x42c   :  { %v9059_v52 = vld [vmem:[#allocation9 + $0x2dc] ss:$20 sps:$4 sm:$0xff]  }
 0x42e   :  { %5102 = vmatpush2.bf16.msra.mxu1 %v9006_v53  ;;  %5145 = vmatpush2.bf16.msra.mxu0 %v9009_v54  ;;  %v9054_v53 = vld [vmem:[#allocation9 + $0x58] ss:$20 sps:$4 sm:$0xff]  }
 0x42f   :  { %5103 = vmatprep.subr.bf16.mxu1 %v9014_v56  ;;  %5146 = vmatprep.subr.bf16.mxu0 %v9017_v58  ;;  %v9057_v54 = vld [vmem:[#allocation9 + $0x2d8] ss:$20 sps:$4 sm:$0xff]   ;;  %v9062_v56 = vld [vmem:[#allocation9 + $0x34] ss:$20 sps:$4 sm:$0xff]  }
 0x430   :  { %v9065_v58 = vld [vmem:[#allocation9 + $0x2b4] ss:$20 sps:$4 sm:$0xff]  }
 0x432   :  { %5104 = vmatpush2.bf16.msra.mxu1 %v9012_v59  ;;  %5147 = vmatpush2.bf16.msra.mxu0 %v9015_v60  ;;  %v9060_v59 = vld [vmem:[#allocation9 + $0x30] ss:$20 sps:$4 sm:$0xff]  }
 0x433   :  { %5105 = vmatprep.subr.bf16.mxu1 %v9020_v63  ;;  %5148 = vmatprep.subr.bf16.mxu0 %v9023_v1  ;;  %v9063_v60 = vld [vmem:[#allocation9 + $0x2b0] ss:$20 sps:$4 sm:$0xff]   ;;  %v9068_v63 = vld [vmem:[#allocation9 + $0xc] ss:$20 sps:$4 sm:$0xff]  }
 0x434   :  { %v9071_v1 = vld [vmem:[#allocation9 + $0x28c] ss:$20 sps:$4 sm:$0xff]  }
 0x436   :  { %5106 = vmatpush2.bf16.msra.mxu1 %v9018_v2  ;;  %5149 = vmatpush2.bf16.msra.mxu0 %v9021_v4  ;;  %v9066_v2 = vld [vmem:[#allocation9 + $0x8] ss:$20 sps:$4 sm:$0xff]  }
 0x437   :  { %5161 = vmatprep.subr.bf16.mxu1 %v9026_v8  ;;  %5204 = vmatprep.subr.bf16.mxu0 %v9029_v10  ;;  %v9069_v4 = vld [vmem:[#allocation9 + $0x288] ss:$20 sps:$4 sm:$0xff]   ;;  %v9074_v8 = vld [vmem:[#allocation9 + $0x264] ss:$20 sps:$4 sm:$0xff]  }
 0x438   :  { %v9077_v10 = vld [vmem:[#allocation9 + $0x4e4] ss:$20 sps:$4 sm:$0xff]  }
 0x4b9   :  { %v3968_v11 = vpop.f32.mrf.mxu1  ;;  %v4011_v12 = vpop.f32.mrf.mxu0 }
 0x4ba   :  { %v3969_v25 = vadd.f32 %v3968_v11, %v3757_v18  ;;  %v4012_v26 = vadd.f32 %v4011_v12, %v3765_v19  ;;  %v9072_v11 = vld [vmem:[#allocation9 + $0x260] ss:$20 sps:$4 sm:$0xff]  }
 0x4bb   :  { %v3970_v14 = vpop.f32.mrf.mxu1  ;;  %v4013_v15 = vpop.f32.mrf.mxu0  ;;  %v9075_v12 = vld [vmem:[#allocation9 + $0x4e0] ss:$20 sps:$4 sm:$0xff]  }
 0x4bc   :  { %v3971_v3 = vadd.f32 %v3970_v14, %v3761_v16  ;;  %v4014_v23 = vadd.f32 %v4013_v15, %v3769_v17  ;;  %v9083_v14 = vld [vmem:[#allocation9 + $0x4bc] ss:$20 sps:$4 sm:$0xff]   ;;  %v9078_v15 = vld [vmem:[#allocation9 + $0x238] ss:$20 sps:$4 sm:$0xff]  }
 0x4bd   :  { %v3972_v20 = vpop.f32.mrf.mxu1  ;;  %v4015_v21 = vpop.f32.mrf.mxu0 }
 0x4be   :  { %v3973_v6 = vadd.f32 %v3972_v20, %v3757_v18  ;;  %v4016_v22 = vadd.f32 %v4015_v21, %v3765_v19  ;;  %v9089_v18 = vld [vmem:[#allocation9 + $0x494] ss:$20 sps:$4 sm:$0xff]   ;;  %v9084_v19 = vld [vmem:[#allocation9 + $0x210] ss:$20 sps:$4 sm:$0xff]   ;;  %v9092_v21 = vld [vmem:[#allocation9 + $0x1ec] ss:$20 sps:$4 sm:$0xff]  }
 0x4bf   :  { %v3974_v51 = vpop.f32.mrf.mxu1  ;;  %v4017_v0 = vpop.f32.mrf.mxu0  ;;  %v9087_v20 = vld [vmem:[#allocation9 + $0x490] ss:$20 sps:$4 sm:$0xff]  }
 0x4c0   :  { %v3975_v9 = vadd.f32 %v3974_v51, %v3761_v16  ;;  %v4018_v24 = vadd.f32 %v4017_v0, %v3769_v17  ;;  %v9888_v33 = vpack.c.bf16 %v3973_v6, %v3969_v25  ;;  %v9890_v34 = vpack.c.bf16 %v4016_v22, %v4012_v26  ;;  %v9081_v16 = vld [vmem:[#allocation9 + $0x4b8] ss:$20 sps:$4 sm:$0xff]   ;;  %v9086_v17 = vld [vmem:[#allocation9 + $0x214] ss:$20 sps:$4 sm:$0xff]   ;;  %v9107_v25 = vld [vmem:[#allocation9 + $0x41c] ss:$20 sps:$4 sm:$0xff]  }
 0x4c1   :  { %v9095_v6 = vld [vmem:[#allocation9 + $0x46c] ss:$20 sps:$4 sm:$0xff]   ;;  %v9090_v22 = vld [vmem:[#allocation9 + $0x1e8] ss:$20 sps:$4 sm:$0xff]   ;;  %v9098_v0 = vld [vmem:[#allocation9 + $0x1c4] ss:$20 sps:$4 sm:$0xff]  }
 0x4c2   :  { %v9884_v29 = vpack.c.bf16 %v3975_v9, %v3971_v3  ;;  %v9886_v30 = vpack.c.bf16 %v4018_v24, %v4014_v23  ;;  %v9093_v51 = vld [vmem:[#allocation9 + $0x468] ss:$20 sps:$4 sm:$0xff]   ;;  %v9101_v3 = vld [vmem:[#allocation9 + $0x444] ss:$20 sps:$4 sm:$0xff]   ;;  %v9096_v23 = vld [vmem:[#allocation9 + $0x1c0] ss:$20 sps:$4 sm:$0xff]  }
 0x4c3   :  { %v9099_v9 = vld [vmem:[#allocation9 + $0x440] ss:$20 sps:$4 sm:$0xff]   ;;  %v9104_v24 = vld [vmem:[#allocation9 + $0x19c] ss:$20 sps:$4 sm:$0xff]   ;;  %v9102_v26 = vld [vmem:[#allocation9 + $0x198] ss:$20 sps:$4 sm:$0xff]  }
 0x4c4   :  { %5107 = vmatprep.mubr.bf16.mxu1 %v9884_v29  ;;  %5150 = vmatprep.mubr.bf16.mxu0 %v9886_v30 }
 0x4c5   :  { %5108 = vmatmul.mubr.bf16.vlgmr.msra.gmra.mxu1 %v9888_v33  ;;  %5151 = vmatmul.mubr.bf16.vlgmr.msra.gmra.mxu0 %v9890_v34 }
 0x4c6   :  { %5162 = vmatpush1.bf16.msra.mxu1 %v9024_v31  ;;  %5205 = vmatpush1.bf16.msra.mxu0 %v9027_v32  ;;  %v9105_v31 = vld [vmem:[#allocation9 + $0x418] ss:$20 sps:$4 sm:$0xff]   ;;  %v9110_v32 = vld [vmem:[#allocation9 + $0x174] ss:$20 sps:$4 sm:$0xff]  }
 0x4c7   :  { %5193 = vmatprep.mubr.bf16.mxu1 %v9884_v29  ;;  %5236 = vmatprep.mubr.bf16.mxu0 %v9886_v30 }
 0x4c8   :  { %5163 = vmatprep.subr.bf16.mxu1 %v9032_v28  ;;  %5206 = vmatprep.subr.bf16.mxu0 %v9035_v36  ;;  %v9113_v28 = vld [vmem:[#allocation9 + $0x3f4] ss:$20 sps:$4 sm:$0xff]   ;;  %v9108_v36 = vld [vmem:[#allocation9 + $0x170] ss:$20 sps:$4 sm:$0xff]  }
 0x4ca   :  { %5164 = vmatpush1.bf16.msra.mxu1 %v9030_v38  ;;  %5207 = vmatpush1.bf16.msra.mxu0 %v9033_v39  ;;  %v9111_v38 = vld [vmem:[#allocation9 + $0x3f0] ss:$20 sps:$4 sm:$0xff]   ;;  %v9116_v39 = vld [vmem:[#allocation9 + $0x14c] ss:$20 sps:$4 sm:$0xff]  }
 0x4cb   :  { %5165 = vmatprep.subr.bf16.mxu1 %v9038_v41  ;;  %5208 = vmatprep.subr.bf16.mxu0 %v9041_v42  ;;  %v9119_v41 = vld [vmem:[#allocation9 + $0x3cc] ss:$20 sps:$4 sm:$0xff]   ;;  %v9114_v42 = vld [vmem:[#allocation9 + $0x148] ss:$20 sps:$4 sm:$0xff]  }
 0x4ce   :  { %5166 = vmatpush1.bf16.msra.mxu1 %v9036_v43  ;;  %5209 = vmatpush1.bf16.msra.mxu0 %v9039_v35  ;;  %v9117_v43 = vld [vmem:[#allocation9 + $0x3c8] ss:$20 sps:$4 sm:$0xff]  }
 0x4cf   :  { %5167 = vmatprep.subr.bf16.mxu1 %v9044_v44  ;;  %5210 = vmatprep.subr.bf16.mxu0 %v9047_v45  ;;  %v9120_v35 = vld [vmem:[#allocation9 + $0x268] ss:$20 sps:$4 sm:$0xff]  }
 0x4d0   :  { %v9121_v44 = vld [vmem:[#allocation9 + $0x4e8] ss:$20 sps:$4 sm:$0xff]  }
 0x4d1   :  { %v9122_v45 = vld [vmem:[#allocation9 + $0x128] ss:$20 sps:$4 sm:$0xff]  }
 0x4d2   :  { %5168 = vmatpush1.bf16.msra.mxu1 %v9042_v37  ;;  %5211 = vmatpush1.bf16.msra.mxu0 %v9045_v46  ;;  %v9123_v37 = vld [vmem:[#allocation9 + $0x3a8] ss:$20 sps:$4 sm:$0xff]   ;;  %v9124_v46 = vld [vmem:[#allocation9 + $0x240] ss:$20 sps:$4 sm:$0xff]  }
 0x4d3   :  { %5169 = vmatprep.subr.bf16.mxu1 %v9050_v27  ;;  %5212 = vmatprep.subr.bf16.mxu0 %v9053_v47  ;;  %v9125_v27 = vld [vmem:[#allocation9 + $0x4c0] ss:$20 sps:$4 sm:$0xff]  }
 0x4d4   :  { %v9126_v47 = vld [vmem:[#allocation9 + $0x100] ss:$20 sps:$4 sm:$0xff]  }
 0x4d6   :  { %5170 = vmatpush1.bf16.msra.mxu1 %v9048_v48  ;;  %5213 = vmatpush1.bf16.msra.mxu0 %v9051_v49  ;;  %v9127_v48 = vld [vmem:[#allocation9 + $0x380] ss:$20 sps:$4 sm:$0xff]   ;;  %v9128_v49 = vld [vmem:[#allocation9 + $0x218] ss:$20 sps:$4 sm:$0xff]  }
 0x4d7   :  { %5171 = vmatprep.subr.bf16.mxu1 %v9056_v50  ;;  %5214 = vmatprep.subr.bf16.mxu0 %v9059_v52  ;;  %v9129_v50 = vld [vmem:[#allocation9 + $0x498] ss:$20 sps:$4 sm:$0xff]  }
 0x4d8   :  { %v9130_v52 = vld [vmem:[#allocation9 + $0xd8] ss:$20 sps:$4 sm:$0xff]  }
 0x4da   :  { %5172 = vmatpush1.bf16.msra.mxu1 %v9054_v53  ;;  %5215 = vmatpush1.bf16.msra.mxu0 %v9057_v54  ;;  %v9131_v53 = vld [vmem:[#allocation9 + $0x358] ss:$20 sps:$4 sm:$0xff]   ;;  %v9132_v54 = vld [vmem:[#allocation9 + $0x1f0] ss:$20 sps:$4 sm:$0xff]  }
 0x4db   :  { %5173 = vmatprep.subr.bf16.mxu1 %v9062_v56  ;;  %5216 = vmatprep.subr.bf16.mxu0 %v9065_v58  ;;  %v9133_v56 = vld [vmem:[#allocation9 + $0x470] ss:$20 sps:$4 sm:$0xff]  }
 0x4dc   :  { %v9134_v58 = vld [vmem:[#allocation9 + $0xb0] ss:$20 sps:$4 sm:$0xff]  }
 0x4de   :  { %5174 = vmatpush1.bf16.msra.mxu1 %v9060_v59  ;;  %5217 = vmatpush1.bf16.msra.mxu0 %v9063_v60  ;;  %v9136_v59 = vld [vmem:[#allocation9 + $0x1c8] ss:$20 sps:$4 sm:$0xff]  }
 0x4df   :  { %5175 = vmatprep.subr.bf16.mxu1 %v9068_v63  ;;  %5218 = vmatprep.subr.bf16.mxu0 %v9071_v1  ;;  %v9138_v60 = vld [vmem:[#allocation9 + $0x88] ss:$20 sps:$4 sm:$0xff]   ;;  %v9140_v1 = vld [vmem:[#allocation9 + $0x1a0] ss:$20 sps:$4 sm:$0xff]  }
 0x4e0   :  { %v9139_v63 = vld [vmem:[#allocation9 + $0x308] ss:$20 sps:$4 sm:$0xff]  }
 0x4e2   :  { %5176 = vmatpush1.bf16.msra.mxu1 %v9066_v2  ;;  %5219 = vmatpush1.bf16.msra.mxu0 %v9069_v4  ;;  %v9141_v2 = vld [vmem:[#allocation9 + $0x420] ss:$20 sps:$4 sm:$0xff]  }
 0x4e3   :  { %5177 = vmatprep.subr.bf16.mxu1 %v9074_v8  ;;  %5220 = vmatprep.subr.bf16.mxu0 %v9077_v10  ;;  %v9142_v4 = vld [vmem:[#allocation9 + $0x60] ss:$20 sps:$4 sm:$0xff]   ;;  %v9144_v10 = vld [vmem:[#allocation9 + $0x178] ss:$20 sps:$4 sm:$0xff]  }
 0x4e4   :  { %v9143_v8 = vld [vmem:[#allocation9 + $0x2e0] ss:$20 sps:$4 sm:$0xff]  }
 0x4e6   :  { %5178 = vmatpush2.bf16.msra.mxu1 %v9072_v11  ;;  %5221 = vmatpush2.bf16.msra.mxu0 %v9075_v12  ;;  %v9145_v11 = vld [vmem:[#allocation9 + $0x3f8] ss:$20 sps:$4 sm:$0xff]  }
 0x4e7   :  { %5179 = vmatprep.subr.bf16.mxu1 %v9080_v13  ;;  %5222 = vmatprep.subr.bf16.mxu0 %v9083_v14  ;;  %v9146_v12 = vld [vmem:[#allocation9 + $0x38] ss:$20 sps:$4 sm:$0xff]   ;;  %v9148_v14 = vld [vmem:[#allocation9 + $0x150] ss:$20 sps:$4 sm:$0xff]  }
 0x4e8   :  { %v9147_v13 = vld [vmem:[#allocation9 + $0x2b8] ss:$20 sps:$4 sm:$0xff]  }
 0x4ea   :  { %5180 = vmatpush2.bf16.msra.mxu1 %v9078_v15  ;;  %5223 = vmatpush2.bf16.msra.mxu0 %v9081_v16  ;;  %v9149_v15 = vld [vmem:[#allocation9 + $0x3d0] ss:$20 sps:$4 sm:$0xff]  }
 0x4eb   :  { %5181 = vmatprep.subr.bf16.mxu1 %v9086_v17  ;;  %5224 = vmatprep.subr.bf16.mxu0 %v9089_v18  ;;  %v9150_v16 = vld [vmem:[#allocation9 + $0x10] ss:$20 sps:$4 sm:$0xff]   ;;  %v9154_v18 = vld [vmem:[#allocation10 + $0x154] ss:$24 sps:$4 sm:$0xff]  }
 0x4ec   :  { %v9151_v17 = vld [vmem:[#allocation9 + $0x290] ss:$20 sps:$4 sm:$0xff]  }
 0x4ee   :  { %5182 = vmatpush2.bf16.msra.mxu1 %v9084_v19  ;;  %5225 = vmatpush2.bf16.msra.mxu0 %v9087_v20  ;;  %v9202_v19 = vld [vmem:[#allocation10 + $0x454] ss:$24 sps:$4 sm:$0xff]   ;;  %v9152_v20 = vld [vmem:[#allocation10 + $0x150] ss:$24 sps:$4 sm:$0xff]  }
 0x4ef   :  { %5183 = vmatprep.subr.bf16.mxu1 %v9092_v21  ;;  %5226 = vmatprep.subr.bf16.mxu0 %v9095_v6  ;;  %v9157_v21 = vld [vmem:[#allocation10 + $0x124] ss:$24 sps:$4 sm:$0xff]   ;;  %v9200_v6 = vld [vmem:[#allocation10 + $0x450] ss:$24 sps:$4 sm:$0xff]  }
 0x4f2   :  { %5184 = vmatpush2.bf16.msra.mxu1 %v9090_v22  ;;  %5227 = vmatpush2.bf16.msra.mxu0 %v9093_v51  ;;  %v9205_v22 = vld [vmem:[#allocation10 + $0x424] ss:$24 sps:$4 sm:$0xff]   ;;  %v9155_v51 = vld [vmem:[#allocation10 + $0x120] ss:$24 sps:$4 sm:$0xff]  }
 0x4f3   :  { %5185 = vmatprep.subr.bf16.mxu1 %v9098_v0  ;;  %5228 = vmatprep.subr.bf16.mxu0 %v9101_v3  ;;  %v9160_v0 = vld [vmem:[#allocation10 + $0xf4] ss:$24 sps:$4 sm:$0xff]   ;;  %v9203_v3 = vld [vmem:[#allocation10 + $0x420] ss:$24 sps:$4 sm:$0xff]  }
 0x4f6   :  { %5186 = vmatpush2.bf16.msra.mxu1 %v9096_v23  ;;  %5229 = vmatpush2.bf16.msra.mxu0 %v9099_v9  ;;  %v9208_v23 = vld [vmem:[#allocation10 + $0x3f4] ss:$24 sps:$4 sm:$0xff]   ;;  %v9158_v9 = vld [vmem:[#allocation10 + $0xf0] ss:$24 sps:$4 sm:$0xff]  }
 0x4f7   :  { %5187 = vmatprep.subr.bf16.mxu1 %v9104_v24  ;;  %5230 = vmatprep.subr.bf16.mxu0 %v9107_v25  ;;  %v9163_v24 = vld [vmem:[#allocation10 + $0xc4] ss:$24 sps:$4 sm:$0xff]   ;;  %v9206_v25 = vld [vmem:[#allocation10 + $0x3f0] ss:$24 sps:$4 sm:$0xff]  }
 0x4fa   :  { %5188 = vmatpush2.bf16.msra.mxu1 %v9102_v26  ;;  %5231 = vmatpush2.bf16.msra.mxu0 %v9105_v31  ;;  %v9211_v26 = vld [vmem:[#allocation10 + $0x3c4] ss:$24 sps:$4 sm:$0xff]   ;;  %v9209_v31 = vld [vmem:[#allocation10 + $0x3c0] ss:$24 sps:$4 sm:$0xff]  }
 0x4fb   :  { %5189 = vmatprep.subr.bf16.mxu1 %v9110_v32  ;;  %5232 = vmatprep.subr.bf16.mxu0 %v9113_v28  ;;  %v9214_v32 = vld [vmem:[#allocation10 + $0x394] ss:$24 sps:$4 sm:$0xff]   ;;  %v9164_v28 = vld [vmem:[#allocation10 + $0x90] ss:$24 sps:$4 sm:$0xff]  }
 0x4fe   :  { %5190 = vmatpush2.bf16.msra.mxu1 %v9108_v36  ;;  %5233 = vmatpush2.bf16.msra.mxu0 %v9111_v38  ;;  %v9169_v36 = vld [vmem:[#allocation10 + $0x64] ss:$24 sps:$4 sm:$0xff]   ;;  %v9212_v38 = vld [vmem:[#allocation10 + $0x390] ss:$24 sps:$4 sm:$0xff]  }
 0x4ff   :  { %5191 = vmatprep.subr.bf16.mxu1 %v9116_v39  ;;  %5234 = vmatprep.subr.bf16.mxu0 %v9119_v41  ;;  %v9217_v39 = vld [vmem:[#allocation10 + $0x364] ss:$24 sps:$4 sm:$0xff]   ;;  %v9167_v41 = vld [vmem:[#allocation10 + $0x60] ss:$24 sps:$4 sm:$0xff]  }
 0x502   :  { %5192 = vmatpush2.bf16.msra.mxu1 %v9114_v42  ;;  %5235 = vmatpush2.bf16.msra.mxu0 %v9117_v43  ;;  %v9172_v42 = vld [vmem:[#allocation10 + $0x34] ss:$24 sps:$4 sm:$0xff]   ;;  %v9215_v43 = vld [vmem:[#allocation10 + $0x360] ss:$24 sps:$4 sm:$0xff]  }
 0x503   :  { %8204 = vmatprep.subr.bf16.mxu1 %v9120_v35  ;;  %8226 = vmatprep.subr.bf16.mxu0 %v9121_v44  ;;  %v9220_v35 = vld [vmem:[#allocation10 + $0x334] ss:$24 sps:$4 sm:$0xff]   ;;  %v9170_v44 = vld [vmem:[#allocation10 + $0x30] ss:$24 sps:$4 sm:$0xff]  }
 0x505   :  { %5194 = vmatmul.mubr.bf16.vlgmr.msra.gmra.mxu1 %v9888_v33  ;;  %5237 = vmatmul.mubr.bf16.vlgmr.msra.gmra.mxu0 %v9890_v34 }
 0x506   :  { %8205 = vmatpush3.bf16.msra.mxu1 %v9122_v45  ;;  %5279 = vmatprep.mubr.bf16.mxu1 %v9884_v29  ;;  %v9135_v29 = vld [vmem:[#allocation9 + $0x330] ss:$20 sps:$4 sm:$0xff]  }
 0x507   :  { %8227 = vmatpush3.bf16.msra.mxu0 %v9123_v37  ;;  %5320 = vmatprep.mubr.bf16.mxu0 %v9886_v30  ;;  %v9137_v30 = vld [vmem:[#allocation9 + $0x448] ss:$20 sps:$4 sm:$0xff]  }
 0x508   :  { %8206 = vmatprep.subr.bf16.mxu1 %v9124_v46  ;;  %8228 = vmatprep.subr.bf16.mxu0 %v9125_v27  ;;  %v9175_v45 = vld [vmem:[#allocation10 + $0x4] ss:$24 sps:$4 sm:$0xff]   ;;  %v9218_v37 = vld [vmem:[#allocation10 + $0x330] ss:$24 sps:$4 sm:$0xff]   ;;  %v9173_v27 = vld [vmem:[#allocation10] ss:$24 sps:$4 sm:$0xff]  }
 0x509   :  { %v9223_v46 = vld [vmem:[#allocation10 + $0x304] ss:$24 sps:$4 sm:$0xff]  }
 0x50a   :  { %8207 = vmatpush3.bf16.msra.mxu1 %v9126_v47  ;;  %v9178_v47 = vld [vmem:[#allocation10 + $0x2d4] ss:$24 sps:$4 sm:$0xff]  }
 0x50b   :  { %8229 = vmatpush3.bf16.msra.mxu0 %v9127_v48  ;;  %8208 = vmatprep.subr.bf16.mxu1 %v9128_v49  ;;  %v9221_v48 = vld [vmem:[#allocation10 + $0x300] ss:$24 sps:$4 sm:$0xff]   ;;  %v9226_v49 = vld [vmem:[#allocation10 + $0x5d4] ss:$24 sps:$4 sm:$0xff]  }
 0x50c   :  { %8230 = vmatprep.subr.bf16.mxu0 %v9129_v50  ;;  %v9176_v50 = vld [vmem:[#allocation10 + $0x2d0] ss:$24 sps:$4 sm:$0xff]  }
 0x50e   :  { %8209 = vmatpush3.bf16.msra.mxu1 %v9130_v52  ;;  %v9181_v52 = vld [vmem:[#allocation10 + $0x2a4] ss:$24 sps:$4 sm:$0xff]  }
 0x50f   :  { %8231 = vmatpush3.bf16.msra.mxu0 %v9131_v53  ;;  %8210 = vmatprep.subr.bf16.mxu1 %v9132_v54  ;;  %v9224_v53 = vld [vmem:[#allocation10 + $0x5d0] ss:$24 sps:$4 sm:$0xff]   ;;  %v9229_v54 = vld [vmem:[#allocation10 + $0x5a4] ss:$24 sps:$4 sm:$0xff]  }
 0x510   :  { %8232 = vmatprep.subr.bf16.mxu0 %v9133_v56  ;;  %v9179_v56 = vld [vmem:[#allocation10 + $0x2a0] ss:$24 sps:$4 sm:$0xff]  }
 0x512   :  { %8211 = vmatpush3.bf16.msra.mxu1 %v9134_v58  ;;  %v9184_v58 = vld [vmem:[#allocation10 + $0x274] ss:$24 sps:$4 sm:$0xff]  }
 0x513   :  { %8233 = vmatpush3.bf16.msra.mxu0 %v9135_v29  ;;  %8212 = vmatprep.subr.bf16.mxu1 %v9136_v59  ;;  %v9227_v29 = vld [vmem:[#allocation10 + $0x5a0] ss:$24 sps:$4 sm:$0xff]   ;;  %v9232_v59 = vld [vmem:[#allocation10 + $0x574] ss:$24 sps:$4 sm:$0xff]  }
 0x514   :  { %8234 = vmatprep.subr.bf16.mxu0 %v9137_v30  ;;  %v9182_v30 = vld [vmem:[#allocation10 + $0x270] ss:$24 sps:$4 sm:$0xff]  }
 0x516   :  { %8213 = vmatpush3.bf16.msra.mxu1 %v9138_v60  ;;  %v9187_v60 = vld [vmem:[#allocation10 + $0x244] ss:$24 sps:$4 sm:$0xff]  }
 0x517   :  { %8235 = vmatpush3.bf16.msra.mxu0 %v9139_v63  ;;  %8214 = vmatprep.subr.bf16.mxu1 %v9140_v1  ;;  %v9230_v63 = vld [vmem:[#allocation10 + $0x570] ss:$24 sps:$4 sm:$0xff]   ;;  %v9235_v1 = vld [vmem:[#allocation10 + $0x544] ss:$24 sps:$4 sm:$0xff]  }
 0x518   :  { %8236 = vmatprep.subr.bf16.mxu0 %v9141_v2  ;;  %v9185_v2 = vld [vmem:[#allocation10 + $0x240] ss:$24 sps:$4 sm:$0xff]  }
 0x51a   :  { %8215 = vmatpush3.bf16.msra.mxu1 %v9142_v4  ;;  %v9190_v4 = vld [vmem:[#allocation10 + $0x214] ss:$24 sps:$4 sm:$0xff]  }
 0x51b   :  { %8237 = vmatpush3.bf16.msra.mxu0 %v9143_v8  ;;  %8216 = vmatprep.subr.bf16.mxu1 %v9144_v10  ;;  %v9233_v8 = vld [vmem:[#allocation10 + $0x540] ss:$24 sps:$4 sm:$0xff]   ;;  %v9238_v10 = vld [vmem:[#allocation10 + $0x514] ss:$24 sps:$4 sm:$0xff]  }
 0x51c   :  { %8238 = vmatprep.subr.bf16.mxu0 %v9145_v11  ;;  %v9188_v11 = vld [vmem:[#allocation10 + $0x210] ss:$24 sps:$4 sm:$0xff]  }
 0x51e   :  { %8217 = vmatpush3.bf16.msra.mxu1 %v9146_v12  ;;  %v9193_v12 = vld [vmem:[#allocation10 + $0x1e4] ss:$24 sps:$4 sm:$0xff]  }
 0x51f   :  { %8239 = vmatpush3.bf16.msra.mxu0 %v9147_v13  ;;  %8218 = vmatprep.subr.bf16.mxu1 %v9148_v14  ;;  %v9236_v13 = vld [vmem:[#allocation10 + $0x510] ss:$24 sps:$4 sm:$0xff]   ;;  %v9241_v14 = vld [vmem:[#allocation10 + $0x4e4] ss:$24 sps:$4 sm:$0xff]  }
 0x520   :  { %8240 = vmatprep.subr.bf16.mxu0 %v9149_v15  ;;  %v9191_v15 = vld [vmem:[#allocation10 + $0x1e0] ss:$24 sps:$4 sm:$0xff]  }
 0x522   :  { %8219 = vmatpush3.bf16.msra.mxu1 %v9150_v16  ;;  %v9196_v16 = vld [vmem:[#allocation10 + $0x1b4] ss:$24 sps:$4 sm:$0xff]  }
 0x523   :  { %8241 = vmatpush3.bf16.msra.mxu0 %v9151_v17  ;;  %6816 = vmatprep.subr.bf16.mxu1 %v9154_v18  ;;  %v9239_v17 = vld [vmem:[#allocation10 + $0x4e0] ss:$24 sps:$4 sm:$0xff]   ;;  %v9244_v18 = vld [vmem:[#allocation10 + $0x4b4] ss:$24 sps:$4 sm:$0xff]  }
 0x524   :  { %6859 = vmatprep.subr.bf16.mxu0 %v9202_v19  ;;  %v9194_v19 = vld [vmem:[#allocation10 + $0x1b0] ss:$24 sps:$4 sm:$0xff]  }
 0x525   :  { %5280 = vmatmul.mubr.bf16.vlgmr.msra.gmra.mxu1 %v9888_v33  ;;  %v9161_v33 = vld [vmem:[#allocation10 + $0xc0] ss:$24 sps:$4 sm:$0xff]  }
 0x526   :  { %5321 = vmatmul.mubr.bf16.vlgmr.msra.gmra.mxu0 %v9890_v34  ;;  %6817 = vmatpush1.bf16.msra.mxu1 %v9152_v20  ;;  %v9166_v34 = vld [vmem:[#allocation10 + $0x94] ss:$24 sps:$4 sm:$0xff]   ;;  %v9199_v20 = vld [vmem:[#allocation10 + $0x184] ss:$24 sps:$4 sm:$0xff]  }
 0x527   :  { %6818 = vmatprep.subr.bf16.mxu1 %v9157_v21  ;;  %6860 = vmatpush1.bf16.msra.mxu0 %v9200_v6  ;;  %v9242_v21 = vld [vmem:[#allocation10 + $0x4b0] ss:$24 sps:$4 sm:$0xff]   ;;  %v9247_v6 = vld [vmem:[#allocation10 + $0x484] ss:$24 sps:$4 sm:$0xff]  }
 0x528   :  { %6861 = vmatprep.subr.bf16.mxu0 %v9205_v22  ;;  %v9197_v22 = vld [vmem:[#allocation10 + $0x180] ss:$24 sps:$4 sm:$0xff]  }
 0x52a   :  { %6819 = vmatpush1.bf16.msra.mxu1 %v9155_v51  ;;  %v9245_v51 = vld [vmem:[#allocation10 + $0x480] ss:$24 sps:$4 sm:$0xff]  }
 0x52b   :  { %6820 = vmatprep.subr.bf16.mxu1 %v9160_v0  ;;  %6862 = vmatpush1.bf16.msra.mxu0 %v9203_v3  ;;  %v9253_v0 = vld [vmem:[#allocation10 + $0x754] ss:$24 sps:$4 sm:$0xff]  }
 0x52c   :  { %6863 = vmatprep.subr.bf16.mxu0 %v9208_v23  ;;  %v9250_v3 = vld [vmem:[#allocation10 + $0x15c] ss:$24 sps:$4 sm:$0xff]   ;;  %v9907_v23 = vld [vmem:[%s10010_s10] sm:$0x1f] }
 0x52e   :  { %6821 = vmatpush1.bf16.msra.mxu1 %v9158_v9  ;;  %v4225_v9 = vrot.slane %v9907_v23, %v9819_v5 }
 0x52f   :  { %6822 = vmatprep.subr.bf16.mxu1 %v9163_v24  ;;  %6864 = vmatpush1.bf16.msra.mxu0 %v9206_v25  ;;  %v4221_v24 = vrot.slane %v9907_v23, %v9822_v7 }
 0x530   :  { %6865 = vmatprep.subr.bf16.mxu0 %v9211_v26 }
 0x532   :  { %6823 = vmatpush1.bf16.msra.mxu1 %v9161_v33 }
 0x533   :  { %6824 = vmatprep.subr.bf16.mxu1 %v9166_v34  ;;  %6866 = vmatpush1.bf16.msra.mxu0 %v9209_v31 }
 0x534   :  { %6867 = vmatprep.subr.bf16.mxu0 %v9214_v32 }
 0x536   :  { %6825 = vmatpush1.bf16.msra.mxu1 %v9164_v28 }
 0x537   :  { %6826 = vmatprep.subr.bf16.mxu1 %v9169_v36  ;;  %6868 = vmatpush1.bf16.msra.mxu0 %v9212_v38 }
 0x538   :  { %6869 = vmatprep.subr.bf16.mxu0 %v9217_v39 }
 0x53a   :  { %6827 = vmatpush1.bf16.msra.mxu1 %v9167_v41 }
 0x53b   :  { %6828 = vmatprep.subr.bf16.mxu1 %v9172_v42  ;;  %6870 = vmatpush1.bf16.msra.mxu0 %v9215_v43 }
 0x53c   :  { %6871 = vmatprep.subr.bf16.mxu0 %v9220_v35 }
 0x53e   :  { %6829 = vmatpush1.bf16.msra.mxu1 %v9170_v44 }
 0x53f   :  { %6830 = vmatprep.subr.bf16.mxu1 %v9175_v45  ;;  %6872 = vmatpush1.bf16.msra.mxu0 %v9218_v37 }
 0x540   :  { %6873 = vmatprep.subr.bf16.mxu0 %v9223_v46 }
 0x542   :  { %6831 = vmatpush1.bf16.msra.mxu1 %v9173_v27 }
 0x543   :  { %6832 = vmatprep.subr.bf16.mxu1 %v9178_v47  ;;  %6874 = vmatpush1.bf16.msra.mxu0 %v9221_v48 }
 0x544   :  { %6875 = vmatprep.subr.bf16.mxu0 %v9226_v49  ;;  %v9251_v49 = vld [vmem:[#allocation10 + $0x750] ss:$24 sps:$4 sm:$0xff]  }
 0x546   :  { %6833 = vmatpush2.bf16.msra.mxu1 %v9176_v50 }
 0x547   :  { %6834 = vmatprep.subr.bf16.mxu1 %v9181_v52  ;;  %6876 = vmatpush2.bf16.msra.mxu0 %v9224_v53  ;;  %v9259_v52 = vld [vmem:[#allocation10 + $0x724] ss:$24 sps:$4 sm:$0xff]   ;;  %v9257_v53 = vld [vmem:[#allocation10 + $0x720] ss:$24 sps:$4 sm:$0xff]  }
 0x548   :  { %6877 = vmatprep.subr.bf16.mxu0 %v9229_v54  ;;  %v9265_v54 = vld [vmem:[#allocation10 + $0x6f4] ss:$24 sps:$4 sm:$0xff]  }
 0x54a   :  { %6835 = vmatpush2.bf16.msra.mxu1 %v9179_v56  ;;  %v9263_v56 = vld [vmem:[#allocation10 + $0x6f0] ss:$24 sps:$4 sm:$0xff]  }
 0x54b   :  { %6836 = vmatprep.subr.bf16.mxu1 %v9184_v58  ;;  %6878 = vmatpush2.bf16.msra.mxu0 %v9227_v29  ;;  %v9271_v58 = vld [vmem:[#allocation10 + $0x6c4] ss:$24 sps:$4 sm:$0xff]   ;;  %v9269_v29 = vld [vmem:[#allocation10 + $0x6c0] ss:$24 sps:$4 sm:$0xff]  }
 0x54c   :  { %6879 = vmatprep.subr.bf16.mxu0 %v9232_v59  ;;  %v9277_v59 = vld [vmem:[#allocation10 + $0x694] ss:$24 sps:$4 sm:$0xff]  }
 0x54e   :  { %6837 = vmatpush2.bf16.msra.mxu1 %v9182_v30  ;;  %v9275_v30 = vld [vmem:[#allocation10 + $0x690] ss:$24 sps:$4 sm:$0xff]  }
 0x54f   :  { %6838 = vmatprep.subr.bf16.mxu1 %v9187_v60  ;;  %6880 = vmatpush2.bf16.msra.mxu0 %v9230_v63  ;;  %v9283_v60 = vld [vmem:[#allocation10 + $0x664] ss:$24 sps:$4 sm:$0xff]   ;;  %v9281_v63 = vld [vmem:[#allocation10 + $0x660] ss:$24 sps:$4 sm:$0xff]  }
 0x550   :  { %6881 = vmatprep.subr.bf16.mxu0 %v9235_v1  ;;  %v9289_v1 = vld [vmem:[#allocation10 + $0x634] ss:$24 sps:$4 sm:$0xff]  }
 0x552   :  { %6839 = vmatpush2.bf16.msra.mxu1 %v9185_v2  ;;  %v9287_v2 = vld [vmem:[#allocation10 + $0x630] ss:$24 sps:$4 sm:$0xff]  }
 0x553   :  { %6840 = vmatprep.subr.bf16.mxu1 %v9190_v4  ;;  %6882 = vmatpush2.bf16.msra.mxu0 %v9233_v8  ;;  %v9295_v4 = vld [vmem:[#allocation10 + $0x604] ss:$24 sps:$4 sm:$0xff]   ;;  %v9293_v8 = vld [vmem:[#allocation10 + $0x600] ss:$24 sps:$4 sm:$0xff]  }
 0x554   :  { %6883 = vmatprep.subr.bf16.mxu0 %v9238_v10  ;;  %v9301_v10 = vld [vmem:[#allocation10 + $0x45c] ss:$24 sps:$4 sm:$0xff]  }
 0x556   :  { %6841 = vmatpush2.bf16.msra.mxu1 %v9188_v11  ;;  %v4233_v11 = vrot.slane %v9907_v23, %v9836_v55 }
 0x557   :  { %6842 = vmatprep.subr.bf16.mxu1 %v9193_v12  ;;  %6884 = vmatpush2.bf16.msra.mxu0 %v9236_v13  ;;  %v4229_v12 = vrot.slane %v9907_v23, %v9839_v57 }
 0x558   :  { %6885 = vmatprep.subr.bf16.mxu0 %v9241_v14 }
 0x55a   :  { %6843 = vmatpush2.bf16.msra.mxu1 %v9191_v15 }
 0x55b   :  { %6844 = vmatprep.subr.bf16.mxu1 %v9196_v16  ;;  %6886 = vmatpush2.bf16.msra.mxu0 %v9239_v17 }
 0x55c   :  { %6887 = vmatprep.subr.bf16.mxu0 %v9244_v18 }
 0x55e   :  { %6845 = vmatpush2.bf16.msra.mxu1 %v9194_v19 }
 0x55f   :  { %6846 = vmatprep.subr.bf16.mxu1 %v9199_v20  ;;  %6888 = vmatpush2.bf16.msra.mxu0 %v9242_v21 }
 0x560   :  { %6889 = vmatprep.subr.bf16.mxu0 %v9247_v6 }
 0x562   :  { %6847 = vmatpush2.bf16.msra.mxu1 %v9197_v22 }
 0x563   :  { %6890 = vmatpush2.bf16.msra.mxu0 %v9245_v51  ;;  %6902 = vmatprep.subr.bf16.mxu1 %v9253_v0 }
 0x564   :  { %6945 = vmatprep.subr.bf16.mxu0 %v9250_v3 }
 0x585   :  { %v5109_v25 = vpop.f32.mrf.mxu1  ;;  %v5152_v26 = vpop.f32.mrf.mxu0 }
 0x586   :  { %v5110_v32 = vadd.f32 %v5109_v25, %v4221_v24 }
 0x587   :  { %v5111_v33 = vpop.f32.mrf.mxu1  ;;  %v5154_v34 = vpop.f32.mrf.mxu0 }
 0x588   :  { %v5112_v31 = vadd.f32 %v5111_v33, %v4225_v9  ;;  %v5153_v35 = vadd.f32 %v5152_v26, %v5110_v32  ;;  %v9248_v32 = vld [vmem:[#allocation10 + $0x158] ss:$24 sps:$4 sm:$0xff]  }
 0x589   :  { %v5113_v28 = vpop.f32.mrf.mxu1  ;;  %v5156_v36 = vpop.f32.mrf.mxu0 }
 0x58a   :  { %v5114_v38 = vadd.f32 %v5113_v28, %v4221_v24  ;;  %v5155_v41 = vadd.f32 %v5154_v34, %v5112_v31  ;;  %v5329_v47 = vmax.f32 %v5153_v35, 0.0  ;;  %v9274_v35 = vld [vmem:[#allocation10 + $0x9c] ss:$24 sps:$4 sm:$0xff]  }
 0x58b   :  { %v5115_v39 = vpop.f32.mrf.mxu1  ;;  %v5158_v44 = vpop.f32.mrf.mxu0 }
 0x58c   :  { %v5157_v42 = vadd.f32 %v5156_v36, %v5114_v38  ;;  %v5116_v43 = vadd.f32 %v5115_v39, %v4225_v9  ;;  %v5330_v46 = vmax.f32 %v5155_v41, 0.0  ;;  %v9256_v36 = vld [vmem:[#allocation10 + $0x12c] ss:$24 sps:$4 sm:$0xff]   ;;  %v9254_v38 = vld [vmem:[#allocation10 + $0x128] ss:$24 sps:$4 sm:$0xff]  }
 0x58d   :  { %v9262_v39 = vld [vmem:[#allocation10 + $0xfc] ss:$24 sps:$4 sm:$0xff]   ;;  %v9260_v41 = vld [vmem:[#allocation10 + $0xf8] ss:$24 sps:$4 sm:$0xff]  }
 0x58e   :  { %v5159_v45 = vadd.f32 %v5158_v44, %v5116_v43  ;;  %v5334_v37 = vmax.f32 %v5157_v42, 0.0  ;;  %v9268_v42 = vld [vmem:[#allocation10 + $0xcc] ss:$24 sps:$4 sm:$0xff]   ;;  %v9266_v43 = vld [vmem:[#allocation10 + $0xc8] ss:$24 sps:$4 sm:$0xff]  }
 0x58f   :  { %v9272_v44 = vld [vmem:[#allocation10 + $0x98] ss:$24 sps:$4 sm:$0xff]  }
 0x590   :  { %v5335_v27 = vmax.f32 %v5159_v45, 0.0  ;;  %v9915_v50 = vpack.c.bf16 %v5334_v37, %v5329_v47  ;;  %v9280_v45 = vld [vmem:[#allocation10 + $0x6c] ss:$24 sps:$4 sm:$0xff]   ;;  %v9278_v47 = vld [vmem:[#allocation10 + $0x68] ss:$24 sps:$4 sm:$0xff]  }
 0x592   :  { %v9913_v48 = vpack.c.bf16 %v5335_v27, %v5330_v46  ;;  %v4237_v27 = vrot.slane %v9907_v23, %v9853_v61 }
 0x594   :  { %6848 = vmatprep.mubr.bf16.mxu1 %v9913_v48 }
 0x595   :  { %6849 = vmatmul.mubr.bf16.vlgmr.msra.gmra.mxu1 %v9915_v50 }
 0x596   :  { %6903 = vmatpush1.bf16.msra.mxu1 %v9251_v49  ;;  %6934 = vmatprep.mubr.bf16.mxu1 %v9660_v40 }
 0x597   :  { %6904 = vmatprep.subr.bf16.mxu1 %v9259_v52  ;;  %v9286_v52 = vld [vmem:[#allocation10 + $0x3c] ss:$24 sps:$4 sm:$0xff]  }
 0x59a   :  { %6905 = vmatpush1.bf16.msra.mxu1 %v9257_v53 }
 0x59b   :  { %6906 = vmatprep.subr.bf16.mxu1 %v9265_v54 }
 0x59e   :  { %6907 = vmatpush1.bf16.msra.mxu1 %v9263_v56 }
 0x59f   :  { %6908 = vmatprep.subr.bf16.mxu1 %v9271_v58 }
 0x5a2   :  { %6909 = vmatpush1.bf16.msra.mxu1 %v9269_v29 }
 0x5a3   :  { %6910 = vmatprep.subr.bf16.mxu1 %v9277_v59  ;;  %v9284_v59 = vld [vmem:[#allocation10 + $0x38] ss:$24 sps:$4 sm:$0xff]  }
 0x5a6   :  { %6911 = vmatpush1.bf16.msra.mxu1 %v9275_v30 }
 0x5a7   :  { %6912 = vmatprep.subr.bf16.mxu1 %v9283_v60  ;;  %v9292_v60 = vld [vmem:[#allocation10 + $0xc] ss:$24 sps:$4 sm:$0xff]  }
 0x5aa   :  { %6913 = vmatpush1.bf16.msra.mxu1 %v9281_v63 }
 0x5ab   :  { %6914 = vmatprep.subr.bf16.mxu1 %v9289_v1 }
 0x5ae   :  { %6915 = vmatpush1.bf16.msra.mxu1 %v9287_v2 }
 0x5af   :  { %6916 = vmatprep.subr.bf16.mxu1 %v9295_v4 }
 0x5b2   :  { %6917 = vmatpush1.bf16.msra.mxu1 %v9293_v8 }
 0x5b3   :  { %6988 = vmatprep.subr.bf16.mxu1 %v9301_v10  ;;  %v9290_v10 = vld [vmem:[#allocation10 + $0x8] ss:$24 sps:$4 sm:$0xff]  }
 0x5c5   :  { %v5195_v13 = vpop.f32.mrf.mxu1  ;;  %v5238_v14 = vpop.f32.mrf.mxu0 }
 0x5c6   :  { %v5196_v18 = vadd.f32 %v5195_v13, %v4229_v12 }
 0x5c7   :  { %v5197_v15 = vpop.f32.mrf.mxu1  ;;  %v5240_v16 = vpop.f32.mrf.mxu0 }
 0x5c8   :  { %v5198_v17 = vadd.f32 %v5197_v15, %v4233_v11  ;;  %v5239_v3 = vadd.f32 %v5238_v14, %v5196_v18  ;;  %v9296_v15 = vld [vmem:[#allocation10 + $0x2d8] ss:$24 sps:$4 sm:$0xff]   ;;  %v9304_v18 = vld [vmem:[#allocation10 + $0x2ac] ss:$24 sps:$4 sm:$0xff]  }
 0x5c9   :  { %v5199_v19 = vpop.f32.mrf.mxu1  ;;  %v5242_v20 = vpop.f32.mrf.mxu0 }
 0x5ca   :  { %v5200_v21 = vadd.f32 %v5199_v19, %v4229_v12  ;;  %v5241_v22 = vadd.f32 %v5240_v16, %v5198_v17  ;;  %v5331_v34 = vmax.f32 %v5239_v3, 0.0  ;;  %v9299_v16 = vld [vmem:[#allocation10 + $0x458] ss:$24 sps:$4 sm:$0xff]   ;;  %v9307_v19 = vld [vmem:[#allocation10 + $0x42c] ss:$24 sps:$4 sm:$0xff]  }
 0x5cb   :  { %v5201_v6 = vpop.f32.mrf.mxu1  ;;  %v5244_v9 = vpop.f32.mrf.mxu0  ;;  %v9316_v3 = vld [vmem:[#allocation10 + $0x24c] ss:$24 sps:$4 sm:$0xff]  }
 0x5cc   :  { %v5243_v51 = vadd.f32 %v5242_v20, %v5200_v21  ;;  %v5202_v0 = vadd.f32 %v5201_v6, %v4233_v11  ;;  %v5332_v26 = vmax.f32 %v5241_v22, 0.0  ;;  %v9298_v11 = vld [vmem:[#allocation10 + $0x2dc] ss:$24 sps:$4 sm:$0xff]   ;;  %v9302_v20 = vld [vmem:[#allocation10 + $0x2a8] ss:$24 sps:$4 sm:$0xff]  }
 0x5cd   :  { %v9305_v21 = vld [vmem:[#allocation10 + $0x428] ss:$24 sps:$4 sm:$0xff]   ;;  %v9310_v6 = vld [vmem:[#allocation10 + $0x27c] ss:$24 sps:$4 sm:$0xff]  }
 0x5ce   :  { %v5245_v24 = vadd.f32 %v5244_v9, %v5202_v0  ;;  %v5336_v25 = vmax.f32 %v5243_v51, 0.0  ;;  %v9313_v22 = vld [vmem:[#allocation10 + $0x3fc] ss:$24 sps:$4 sm:$0xff]   ;;  %v9308_v51 = vld [vmem:[#allocation10 + $0x278] ss:$24 sps:$4 sm:$0xff]  }
 0x5cf   :  { %v9311_v0 = vld [vmem:[#allocation10 + $0x3f8] ss:$24 sps:$4 sm:$0xff]   ;;  %v9319_v9 = vld [vmem:[#allocation10 + $0x3cc] ss:$24 sps:$4 sm:$0xff]  }
 0x5d0   :  { %v5337_v33 = vmax.f32 %v5245_v24, 0.0  ;;  %v9926_v28 = vpack.c.bf16 %v5336_v25, %v5331_v34  ;;  %v9314_v24 = vld [vmem:[#allocation10 + $0x248] ss:$24 sps:$4 sm:$0xff]   ;;  %v9320_v34 = vld [vmem:[#allocation10 + $0x218] ss:$24 sps:$4 sm:$0xff]  }
 0x5d1   :  { %v9317_v25 = vld [vmem:[#allocation10 + $0x3c8] ss:$24 sps:$4 sm:$0xff]  }
 0x5d2   :  { %v9924_v31 = vpack.c.bf16 %v5337_v33, %v5332_v26  ;;  %v9322_v26 = vld [vmem:[#allocation10 + $0x21c] ss:$24 sps:$4 sm:$0xff]  }
 0x5d3   :  { %v9325_v33 = vld [vmem:[#allocation10 + $0x39c] ss:$24 sps:$4 sm:$0xff]  }
 0x5d4   :  { %6891 = vmatprep.mubr.bf16.mxu0 %v9924_v31 }
 0x5d5   :  { %6892 = vmatmul.mubr.bf16.vlgmr.msra.gmra.mxu0 %v9926_v28 }
 0x5d6   :  { %6946 = vmatpush1.bf16.msra.mxu0 %v9248_v32  ;;  %6977 = vmatprep.mubr.bf16.mxu0 %v9913_v48  ;;  %v9323_v32 = vld [vmem:[#allocation10 + $0x398] ss:$24 sps:$4 sm:$0xff]  }
 0x5d7   :  { %6947 = vmatprep.subr.bf16.mxu0 %v9256_v36  ;;  %v9328_v36 = vld [vmem:[#allocation10 + $0x1ec] ss:$24 sps:$4 sm:$0xff]  }
 0x5da   :  { %6948 = vmatpush1.bf16.msra.mxu0 %v9254_v38  ;;  %v9331_v38 = vld [vmem:[#allocation10 + $0x36c] ss:$24 sps:$4 sm:$0xff]  }
 0x5db   :  { %6949 = vmatprep.subr.bf16.mxu0 %v9262_v39  ;;  %v9326_v39 = vld [vmem:[#allocation10 + $0x1e8] ss:$24 sps:$4 sm:$0xff]  }
 0x5de   :  { %6950 = vmatpush1.bf16.msra.mxu0 %v9260_v41  ;;  %v9329_v41 = vld [vmem:[#allocation10 + $0x368] ss:$24 sps:$4 sm:$0xff]  }
 0x5df   :  { %6951 = vmatprep.subr.bf16.mxu0 %v9268_v42  ;;  %v9334_v42 = vld [vmem:[#allocation10 + $0x1bc] ss:$24 sps:$4 sm:$0xff]  }
 0x5e2   :  { %6952 = vmatpush1.bf16.msra.mxu0 %v9266_v43  ;;  %v9337_v43 = vld [vmem:[#allocation10 + $0x33c] ss:$24 sps:$4 sm:$0xff]  }
 0x5e3   :  { %6953 = vmatprep.subr.bf16.mxu0 %v9274_v35  ;;  %v9332_v35 = vld [vmem:[#allocation10 + $0x1b8] ss:$24 sps:$4 sm:$0xff]  }
 0x5e5   :  { %v8220_v37 = vpop.f32.mrf.mxu1 }
 0x5e6   :  { %v8242_v46 = vpop.f32.mrf.mxu0  ;;  %6954 = vmatpush1.bf16.msra.mxu0 %v9272_v44  ;;  %v9335_v44 = vld [vmem:[#allocation10 + $0x338] ss:$24 sps:$4 sm:$0xff]  }
 0x5e7   :  { %v8221_v49 = vpop.f32.mrf.mxu1  ;;  %6955 = vmatprep.subr.bf16.mxu0 %v9280_v45  ;;  %v9340_v45 = vld [vmem:[#allocation10 + $0x18c] ss:$24 sps:$4 sm:$0xff]  }
 0x5e8   :  { %v8222_v53 = vadd.f32 %v8221_v49, %v8220_v37  ;;  %v8243_v54 = vpop.f32.mrf.mxu0  ;;  %v9343_v37 = vld [vmem:[#allocation10 + $0x30c] ss:$24 sps:$4 sm:$0xff]   ;;  %v9349_v49 = vld [vmem:[#allocation10 + $0x5dc] ss:$24 sps:$4 sm:$0xff]  }
 0x5e9   :  { %v8223_v56 = vpop.f32.mrf.mxu1  ;;  %v8244_v63 = vadd.f32 %v8243_v54, %v8242_v46  ;;  %v9338_v46 = vld [vmem:[#allocation10 + $0x188] ss:$24 sps:$4 sm:$0xff]   ;;  %v9352_v54 = vld [vmem:[#allocation10 + $0x72c] ss:$24 sps:$4 sm:$0xff]  }
 0x5ea   :  { %v5282_v58 = vadd.f32 %v8222_v53, %v4237_v27  ;;  %v8245_v29 = vpop.f32.mrf.mxu0  ;;  %6956 = vmatpush1.bf16.msra.mxu0 %v9278_v47  ;;  %v9346_v47 = vld [vmem:[#allocation10 + $0x75c] ss:$24 sps:$4 sm:$0xff]   ;;  %v9347_v53 = vld [vmem:[#allocation10 + $0x5d8] ss:$24 sps:$4 sm:$0xff]  }
 0x5eb   :  { %v8224_v30 = vpop.f32.mrf.mxu1  ;;  %6957 = vmatprep.subr.bf16.mxu0 %v9286_v52  ;;  %v9344_v52 = vld [vmem:[#allocation10 + $0x758] ss:$24 sps:$4 sm:$0xff]  }
 0x5ec   :  { %v8225_v1 = vadd.f32 %v8224_v30, %v8223_v56  ;;  %v8246_v2 = vpop.f32.mrf.mxu0  ;;  %v5323_v4 = vadd.f32 %v8244_v63, %v5282_v58  ;;  %v9355_v56 = vld [vmem:[#allocation10 + $0x5ac] ss:$24 sps:$4 sm:$0xff]   ;;  %v9350_v58 = vld [vmem:[#allocation10 + $0x728] ss:$24 sps:$4 sm:$0xff]   ;;  %v9361_v30 = vld [vmem:[#allocation10 + $0x57c] ss:$24 sps:$4 sm:$0xff]  }
 0x5ed   :  { %v8247_v23 = vadd.f32 %v8246_v2, %v8245_v29  ;;  %v9353_v29 = vld [vmem:[#allocation10 + $0x5a8] ss:$24 sps:$4 sm:$0xff]   ;;  %v9359_v63 = vld [vmem:[#allocation10 + $0x578] ss:$24 sps:$4 sm:$0xff]   ;;  %v9367_v2 = vld [vmem:[#allocation10 + $0x54c] ss:$24 sps:$4 sm:$0xff]  }
 0x5ee   :  { %v5285_v8 = vadd.f32 %v8225_v1, %v4237_v27  ;;  %6958 = vmatpush1.bf16.msra.mxu0 %v9284_v59  ;;  %v5333_v13 = vmax.f32 %v5323_v4, 0.0  ;;  %v9341_v27 = vld [vmem:[#allocation10 + $0x308] ss:$24 sps:$4 sm:$0xff]   ;;  %v9358_v59 = vld [vmem:[#allocation10 + $0x6fc] ss:$24 sps:$4 sm:$0xff]  }
 0x5ef   :  { %6959 = vmatprep.subr.bf16.mxu0 %v9292_v60  ;;  %v9356_v60 = vld [vmem:[#allocation10 + $0x6f8] ss:$24 sps:$4 sm:$0xff]   ;;  %v9364_v1 = vld [vmem:[#allocation10 + $0x6cc] ss:$24 sps:$4 sm:$0xff]   ;;  %v9362_v4 = vld [vmem:[#allocation10 + $0x6c8] ss:$24 sps:$4 sm:$0xff]  }
 0x5f0   :  { %v5326_v12 = vadd.f32 %v8247_v23, %v5285_v8  ;;  %v9365_v8 = vld [vmem:[#allocation10 + $0x548] ss:$24 sps:$4 sm:$0xff]   ;;  %v9370_v23 = vld [vmem:[#allocation10 + $0x69c] ss:$24 sps:$4 sm:$0xff]  }
 0x5f2   :  { %v5338_v14 = vmax.f32 %v5326_v12, 0.0  ;;  %6960 = vmatpush1.bf16.msra.mxu0 %v9290_v10  ;;  %v9373_v10 = vld [vmem:[#allocation10 + $0x51c] ss:$24 sps:$4 sm:$0xff]   ;;  %v9371_v12 = vld [vmem:[#allocation10 + $0x518] ss:$24 sps:$4 sm:$0xff]  }
 0x5f3   :  { %6961 = vmatprep.subr.bf16.mxu0 %v9298_v11  ;;  %v9368_v11 = vld [vmem:[#allocation10 + $0x698] ss:$24 sps:$4 sm:$0xff]  }
 0x5f4   :  { %v9933_v17 = vpack.c.bf16 %v5338_v14, %v5333_v13  ;;  %v9376_v13 = vld [vmem:[#allocation10 + $0x66c] ss:$24 sps:$4 sm:$0xff]  }
 0x5f5   :  { %v9379_v14 = vld [vmem:[#allocation10 + $0x4ec] ss:$24 sps:$4 sm:$0xff]  }
 0x5f6   :  { %6962 = vmatpush2.bf16.msra.mxu0 %v9296_v15  ;;  %6935 = vmatmul.mubr.bf16.vlgmr.msra.gmra.mxu1 %v9933_v17  ;;  %v9374_v15 = vld [vmem:[#allocation10 + $0x668] ss:$24 sps:$4 sm:$0xff]  }
 0x5f7   :  { %6989 = vmatpush1.bf16.msra.mxu1 %v9299_v16  ;;  %7020 = vmatprep.mubr.bf16.mxu1 %v9924_v31  ;;  %v9377_v16 = vld [vmem:[#allocation10 + $0x4e8] ss:$24 sps:$4 sm:$0xff]  }
 0x5f8   :  { %6963 = vmatprep.subr.bf16.mxu0 %v9304_v18  ;;  %6990 = vmatprep.subr.bf16.mxu1 %v9307_v19  ;;  %v9382_v18 = vld [vmem:[#allocation10 + $0x63c] ss:$24 sps:$4 sm:$0xff]  }
 0x5f9   :  { %v9385_v19 = vld [vmem:[#allocation10 + $0x4bc] ss:$24 sps:$4 sm:$0xff]  }
 0x5fa   :  { %6964 = vmatpush2.bf16.msra.mxu0 %v9302_v20  ;;  %v9380_v20 = vld [vmem:[#allocation10 + $0x638] ss:$24 sps:$4 sm:$0xff]  }
 0x5fb   :  { %6991 = vmatpush1.bf16.msra.mxu1 %v9305_v21  ;;  %6965 = vmatprep.subr.bf16.mxu0 %v9310_v6  ;;  %v9383_v21 = vld [vmem:[#allocation10 + $0x4b8] ss:$24 sps:$4 sm:$0xff]   ;;  %v9388_v6 = vld [vmem:[#allocation10 + $0x60c] ss:$24 sps:$4 sm:$0xff]  }
 0x5fc   :  { %6992 = vmatprep.subr.bf16.mxu1 %v9313_v22  ;;  %v9391_v22 = vld [vmem:[#allocation10 + $0x48c] ss:$24 sps:$4 sm:$0xff]  }
 0x5fe   :  { %6966 = vmatpush2.bf16.msra.mxu0 %v9308_v51  ;;  %v9386_v51 = vld [vmem:[#allocation10 + $0x608] ss:$24 sps:$4 sm:$0xff]  }
 0x5ff   :  { %6993 = vmatpush1.bf16.msra.mxu1 %v9311_v0  ;;  %6967 = vmatprep.subr.bf16.mxu0 %v9316_v3  ;;  %v9389_v0 = vld [vmem:[#allocation10 + $0x488] ss:$24 sps:$4 sm:$0xff]   ;;  %v9394_v3 = vld [vmem:[#allocation10 + $0x464] ss:$24 sps:$4 sm:$0xff]  }
 0x600   :  { %6994 = vmatprep.subr.bf16.mxu1 %v9319_v9  ;;  %v9397_v9 = vld [vmem:[#allocation10 + $0x164] ss:$24 sps:$4 sm:$0xff]  }
 0x602   :  { %6968 = vmatpush2.bf16.msra.mxu0 %v9314_v24  ;;  %v9392_v24 = vld [vmem:[#allocation10 + $0x460] ss:$24 sps:$4 sm:$0xff]  }
 0x603   :  { %6995 = vmatpush1.bf16.msra.mxu1 %v9317_v25  ;;  %6969 = vmatprep.subr.bf16.mxu0 %v9322_v26  ;;  %v9395_v25 = vld [vmem:[#allocation10 + $0x160] ss:$24 sps:$4 sm:$0xff]   ;;  %v9400_v26 = vld [vmem:[#allocation10 + $0x434] ss:$24 sps:$4 sm:$0xff]  }
 0x604   :  { %6996 = vmatprep.subr.bf16.mxu1 %v9325_v33  ;;  %v9403_v33 = vld [vmem:[#allocation10 + $0x134] ss:$24 sps:$4 sm:$0xff]  }
 0x606   :  { %6970 = vmatpush2.bf16.msra.mxu0 %v9320_v34  ;;  %v9398_v34 = vld [vmem:[#allocation10 + $0x430] ss:$24 sps:$4 sm:$0xff]  }
 0x607   :  { %6997 = vmatpush1.bf16.msra.mxu1 %v9323_v32  ;;  %6971 = vmatprep.subr.bf16.mxu0 %v9328_v36  ;;  %v9401_v32 = vld [vmem:[#allocation10 + $0x130] ss:$24 sps:$4 sm:$0xff]   ;;  %v9406_v36 = vld [vmem:[#allocation10 + $0x404] ss:$24 sps:$4 sm:$0xff]  }
 0x608   :  { %6998 = vmatprep.subr.bf16.mxu1 %v9331_v38  ;;  %v9409_v38 = vld [vmem:[#allocation10 + $0x104] ss:$24 sps:$4 sm:$0xff]  }
 0x60a   :  { %6972 = vmatpush2.bf16.msra.mxu0 %v9326_v39  ;;  %v9404_v39 = vld [vmem:[#allocation10 + $0x400] ss:$24 sps:$4 sm:$0xff]  }
 0x60b   :  { %6999 = vmatpush1.bf16.msra.mxu1 %v9329_v41  ;;  %6973 = vmatprep.subr.bf16.mxu0 %v9334_v42  ;;  %v9407_v41 = vld [vmem:[#allocation10 + $0x100] ss:$24 sps:$4 sm:$0xff]   ;;  %v9412_v42 = vld [vmem:[#allocation10 + $0x3d4] ss:$24 sps:$4 sm:$0xff]  }
 0x60c   :  { %7000 = vmatprep.subr.bf16.mxu1 %v9337_v43  ;;  %v9415_v43 = vld [vmem:[#allocation10 + $0xd4] ss:$24 sps:$4 sm:$0xff]  }
 0x60e   :  { %6974 = vmatpush2.bf16.msra.mxu0 %v9332_v35  ;;  %v9410_v35 = vld [vmem:[#allocation10 + $0x3d0] ss:$24 sps:$4 sm:$0xff]  }
 0x60f   :  { %7001 = vmatpush1.bf16.msra.mxu1 %v9335_v44  ;;  %6975 = vmatprep.subr.bf16.mxu0 %v9340_v45  ;;  %v9418_v44 = vld [vmem:[#allocation10 + $0x3a4] ss:$24 sps:$4 sm:$0xff]  }
 0x610   :  { %7002 = vmatprep.subr.bf16.mxu1 %v9343_v37  ;;  %v9421_v45 = vld [vmem:[#allocation10 + $0xa4] ss:$24 sps:$4 sm:$0xff]   ;;  %v9419_v37 = vld [vmem:[#allocation10 + $0xa0] ss:$24 sps:$4 sm:$0xff]  }
 0x612   :  { %6976 = vmatpush2.bf16.msra.mxu0 %v9338_v46  ;;  %v9424_v46 = vld [vmem:[#allocation10 + $0x374] ss:$24 sps:$4 sm:$0xff]  }
 0x613   :  { %7003 = vmatpush1.bf16.msra.mxu1 %v9341_v27  ;;  %7031 = vmatprep.subr.bf16.mxu0 %v9346_v47  ;;  %v9427_v27 = vld [vmem:[#allocation10 + $0x74] ss:$24 sps:$4 sm:$0xff]   ;;  %v9422_v47 = vld [vmem:[#allocation10 + $0x370] ss:$24 sps:$4 sm:$0xff]  }
 0x614   :  { %7004 = vmatprep.subr.bf16.mxu1 %v9349_v49  ;;  %v9425_v49 = vld [vmem:[#allocation10 + $0x70] ss:$24 sps:$4 sm:$0xff]  }
 0x615   :  { %6978 = vmatmul.mubr.bf16.vlgmr.msra.gmra.mxu0 %v9915_v50 }
 0x616   :  { %7032 = vmatpush1.bf16.msra.mxu0 %v9344_v52  ;;  %7063 = vmatprep.mubr.bf16.mxu0 %v9660_v40  ;;  %v9430_v52 = vld [vmem:[#allocation10 + $0x344] ss:$24 sps:$4 sm:$0xff]  }
 0x617   :  { %7005 = vmatpush2.bf16.msra.mxu1 %v9347_v53  ;;  %7033 = vmatprep.subr.bf16.mxu0 %v9352_v54  ;;  %v9433_v53 = vld [vmem:[#allocation10 + $0x44] ss:$24 sps:$4 sm:$0xff]   ;;  %v9428_v54 = vld [vmem:[#allocation10 + $0x340] ss:$24 sps:$4 sm:$0xff]  }
 0x618   :  { %7006 = vmatprep.subr.bf16.mxu1 %v9355_v56  ;;  %v9431_v56 = vld [vmem:[#allocation10 + $0x40] ss:$24 sps:$4 sm:$0xff]  }
 0x61a   :  { %7034 = vmatpush1.bf16.msra.mxu0 %v9350_v58  ;;  %v9436_v58 = vld [vmem:[#allocation10 + $0x314] ss:$24 sps:$4 sm:$0xff]  }
 0x61b   :  { %7007 = vmatpush2.bf16.msra.mxu1 %v9353_v29  ;;  %7035 = vmatprep.subr.bf16.mxu0 %v9358_v59  ;;  %v9439_v29 = vld [vmem:[#allocation10 + $0x14] ss:$24 sps:$4 sm:$0xff]   ;;  %v9434_v59 = vld [vmem:[#allocation10 + $0x310] ss:$24 sps:$4 sm:$0xff]  }
 0x61c   :  { %7008 = vmatprep.subr.bf16.mxu1 %v9361_v30  ;;  %v9437_v30 = vld [vmem:[#allocation10 + $0x10] ss:$24 sps:$4 sm:$0xff]  }
 0x61e   :  { %7036 = vmatpush1.bf16.msra.mxu0 %v9356_v60  ;;  %v9442_v60 = vld [vmem:[#allocation10 + $0x5e4] ss:$24 sps:$4 sm:$0xff]  }
 0x61f   :  { %7009 = vmatpush2.bf16.msra.mxu1 %v9359_v63  ;;  %7037 = vmatprep.subr.bf16.mxu0 %v9364_v1  ;;  %v9445_v63 = vld [vmem:[#allocation10 + $0x2e4] ss:$24 sps:$4 sm:$0xff]   ;;  %v9440_v1 = vld [vmem:[#allocation10 + $0x5e0] ss:$24 sps:$4 sm:$0xff]  }
 0x620   :  { %7010 = vmatprep.subr.bf16.mxu1 %v9367_v2  ;;  %v9443_v2 = vld [vmem:[#allocation10 + $0x2e0] ss:$24 sps:$4 sm:$0xff]  }
 0x622   :  { %7038 = vmatpush1.bf16.msra.mxu0 %v9362_v4  ;;  %v9448_v4 = vld [vmem:[#allocation10 + $0x5b4] ss:$24 sps:$4 sm:$0xff]  }
 0x623   :  { %7011 = vmatpush2.bf16.msra.mxu1 %v9365_v8  ;;  %7039 = vmatprep.subr.bf16.mxu0 %v9370_v23  ;;  %v9451_v8 = vld [vmem:[#allocation10 + $0x2b4] ss:$24 sps:$4 sm:$0xff]   ;;  %v9446_v23 = vld [vmem:[#allocation10 + $0x5b0] ss:$24 sps:$4 sm:$0xff]  }
 0x624   :  { %7012 = vmatprep.subr.bf16.mxu1 %v9373_v10  ;;  %v9449_v10 = vld [vmem:[#allocation10 + $0x2b0] ss:$24 sps:$4 sm:$0xff]  }
 0x626   :  { %7040 = vmatpush1.bf16.msra.mxu0 %v9368_v11  ;;  %v9454_v11 = vld [vmem:[#allocation10 + $0x584] ss:$24 sps:$4 sm:$0xff]  }
 0x627   :  { %7013 = vmatpush2.bf16.msra.mxu1 %v9371_v12  ;;  %7041 = vmatprep.subr.bf16.mxu0 %v9376_v13  ;;  %v9457_v12 = vld [vmem:[#allocation10 + $0x284] ss:$24 sps:$4 sm:$0xff]   ;;  %v9452_v13 = vld [vmem:[#allocation10 + $0x580] ss:$24 sps:$4 sm:$0xff]  }
 0x628   :  { %7014 = vmatprep.subr.bf16.mxu1 %v9379_v14  ;;  %v9455_v14 = vld [vmem:[#allocation10 + $0x280] ss:$24 sps:$4 sm:$0xff]  }
 0x62a   :  { %7042 = vmatpush1.bf16.msra.mxu0 %v9374_v15  ;;  %v9460_v15 = vld [vmem:[#allocation10 + $0x554] ss:$24 sps:$4 sm:$0xff]  }
 0x62b   :  { %7015 = vmatpush2.bf16.msra.mxu1 %v9377_v16  ;;  %7043 = vmatprep.subr.bf16.mxu0 %v9382_v18  ;;  %v9463_v16 = vld [vmem:[#allocation10 + $0x254] ss:$24 sps:$4 sm:$0xff]   ;;  %v9458_v18 = vld [vmem:[#allocation10 + $0x550] ss:$24 sps:$4 sm:$0xff]  }
 0x62c   :  { %7016 = vmatprep.subr.bf16.mxu1 %v9385_v19  ;;  %v9461_v19 = vld [vmem:[#allocation10 + $0x250] ss:$24 sps:$4 sm:$0xff]  }
 0x62e   :  { %7044 = vmatpush1.bf16.msra.mxu0 %v9380_v20  ;;  %v9466_v20 = vld [vmem:[#allocation10 + $0x524] ss:$24 sps:$4 sm:$0xff]  }
 0x62f   :  { %7017 = vmatpush2.bf16.msra.mxu1 %v9383_v21  ;;  %7045 = vmatprep.subr.bf16.mxu0 %v9388_v6  ;;  %v9469_v21 = vld [vmem:[#allocation10 + $0x224] ss:$24 sps:$4 sm:$0xff]   ;;  %v9464_v6 = vld [vmem:[#allocation10 + $0x520] ss:$24 sps:$4 sm:$0xff]  }
 0x630   :  { %7018 = vmatprep.subr.bf16.mxu1 %v9391_v22  ;;  %v9467_v22 = vld [vmem:[#allocation10 + $0x220] ss:$24 sps:$4 sm:$0xff]  }
 0x632   :  { %7046 = vmatpush1.bf16.msra.mxu0 %v9386_v51  ;;  %v9472_v51 = vld [vmem:[#allocation10 + $0x4f4] ss:$24 sps:$4 sm:$0xff]  }
 0x633   :  { %7019 = vmatpush2.bf16.msra.mxu1 %v9389_v0  ;;  %7117 = vmatprep.subr.bf16.mxu0 %v9394_v3  ;;  %v9475_v0 = vld [vmem:[#allocation10 + $0x1f4] ss:$24 sps:$4 sm:$0xff]   ;;  %v9470_v3 = vld [vmem:[#allocation10 + $0x4f0] ss:$24 sps:$4 sm:$0xff]  }
 0x634   :  { %7074 = vmatprep.subr.bf16.mxu1 %v9397_v9  ;;  %v9473_v9 = vld [vmem:[#allocation10 + $0x1f0] ss:$24 sps:$4 sm:$0xff]  }
 0x635   :  { %7064 = vmatmul.mubr.bf16.vlgmr.msra.gmra.mxu0 %v9933_v17 }
 0x636   :  { %7021 = vmatmul.mubr.bf16.vlgmr.msra.gmra.mxu1 %v9926_v28  ;;  %7118 = vmatpush1.bf16.msra.mxu0 %v9392_v24  ;;  %v9478_v24 = vld [vmem:[#allocation10 + $0x4c4] ss:$24 sps:$4 sm:$0xff]  }
 0x637   :  { %7149 = vmatprep.mubr.bf16.mxu0 %v9924_v31  ;;  %7075 = vmatpush1.bf16.msra.mxu1 %v9395_v25  ;;  %v9413_v31 = vld [vmem:[#allocation10 + $0xd0] ss:$24 sps:$4 sm:$0xff]   ;;  %v9481_v25 = vld [vmem:[#allocation10 + $0x1c4] ss:$24 sps:$4 sm:$0xff]  }
 0x638   :  { %7106 = vmatprep.mubr.bf16.mxu1 %v9913_v48  ;;  %7119 = vmatprep.subr.bf16.mxu0 %v9400_v26  ;;  %v9416_v48 = vld [vmem:[#allocation10 + $0x3a0] ss:$24 sps:$4 sm:$0xff]  }
 0x639   :  { %7076 = vmatprep.subr.bf16.mxu1 %v9403_v33  ;;  %v9476_v26 = vld [vmem:[#allocation10 + $0x4c0] ss:$24 sps:$4 sm:$0xff]  }
 0x63a   :  { %7120 = vmatpush1.bf16.msra.mxu0 %v9398_v34  ;;  %v9479_v33 = vld [vmem:[#allocation10 + $0x1c0] ss:$24 sps:$4 sm:$0xff]   ;;  %v9484_v34 = vld [vmem:[#allocation10 + $0x494] ss:$24 sps:$4 sm:$0xff]  }
 0x63b   :  { %7077 = vmatpush1.bf16.msra.mxu1 %v9401_v32  ;;  %7121 = vmatprep.subr.bf16.mxu0 %v9406_v36  ;;  %v9487_v32 = vld [vmem:[#allocation10 + $0x194] ss:$24 sps:$4 sm:$0xff]   ;;  %v9482_v36 = vld [vmem:[#allocation10 + $0x490] ss:$24 sps:$4 sm:$0xff]  }
 0x63c   :  { %7078 = vmatprep.subr.bf16.mxu1 %v9409_v38  ;;  %v9485_v38 = vld [vmem:[#allocation10 + $0x190] ss:$24 sps:$4 sm:$0xff]  }
 0x63e   :  { %7122 = vmatpush1.bf16.msra.mxu0 %v9404_v39  ;;  %v9490_v39 = vld [vmem:[#allocation10 + $0x764] ss:$24 sps:$4 sm:$0xff]  }
 0x63f   :  { %7079 = vmatpush1.bf16.msra.mxu1 %v9407_v41  ;;  %7123 = vmatprep.subr.bf16.mxu0 %v9412_v42  ;;  %v9488_v41 = vld [vmem:[#allocation10 + $0x760] ss:$24 sps:$4 sm:$0xff]   ;;  %v9493_v42 = vld [vmem:[#allocation10 + $0x734] ss:$24 sps:$4 sm:$0xff]  }
 0x640   :  { %7080 = vmatprep.subr.bf16.mxu1 %v9415_v43  ;;  %v9491_v43 = vld [vmem:[#allocation10 + $0x730] ss:$24 sps:$4 sm:$0xff]  }
 0x642   :  { %7124 = vmatpush1.bf16.msra.mxu0 %v9410_v35  ;;  %v9496_v35 = vld [vmem:[#allocation10 + $0x704] ss:$24 sps:$4 sm:$0xff]  }
 0x643   :  { %7081 = vmatpush1.bf16.msra.mxu1 %v9413_v31  ;;  %7125 = vmatprep.subr.bf16.mxu0 %v9418_v44  ;;  %v9494_v31 = vld [vmem:[#allocation10 + $0x700] ss:$24 sps:$4 sm:$0xff]   ;;  %v9499_v44 = vld [vmem:[#allocation10 + $0x6d4] ss:$24 sps:$4 sm:$0xff]  }
 0x644   :  { %7082 = vmatprep.subr.bf16.mxu1 %v9421_v45  ;;  %v9497_v45 = vld [vmem:[#allocation10 + $0x6d0] ss:$24 sps:$4 sm:$0xff]  }
 0x646   :  { %7126 = vmatpush1.bf16.msra.mxu0 %v9416_v48  ;;  %v9502_v48 = vld [vmem:[#allocation10 + $0x6a4] ss:$24 sps:$4 sm:$0xff]  }
 0x647   :  { %7083 = vmatpush1.bf16.msra.mxu1 %v9419_v37  ;;  %7127 = vmatprep.subr.bf16.mxu0 %v9424_v46  ;;  %v9500_v37 = vld [vmem:[#allocation10 + $0x6a0] ss:$24 sps:$4 sm:$0xff]   ;;  %v9508_v46 = vld [vmem:[#allocation10 + $0x644] ss:$24 sps:$4 sm:$0xff]  }
 0x648   :  { %7084 = vmatprep.subr.bf16.mxu1 %v9427_v27  ;;  %v9511_v27 = vld [vmem:[#allocation10 + $0x614] ss:$24 sps:$4 sm:$0xff]  }
 0x64a   :  { %7128 = vmatpush1.bf16.msra.mxu0 %v9422_v47  ;;  %v9509_v47 = vld [vmem:[#allocation10 + $0x610] ss:$24 sps:$4 sm:$0xff]  }
 0x64b   :  { %7085 = vmatpush1.bf16.msra.mxu1 %v9425_v49  ;;  %7129 = vmatprep.subr.bf16.mxu0 %v9430_v52  ;;  %v9950_v52 = vld [vmem:[%s10012_s12] sm:$0x3f] }
 0x64c   :  { %7086 = vmatprep.subr.bf16.mxu1 %v9433_v53 }
 0x64e   :  { %7130 = vmatpush1.bf16.msra.mxu0 %v9428_v54 }
 0x64f   :  { %7087 = vmatpush1.bf16.msra.mxu1 %v9431_v56  ;;  %7131 = vmatprep.subr.bf16.mxu0 %v9436_v58  ;;  %v5589_v56 = vrot.slane %v9950_v52, %v9822_v7 }
 0x650   :  { %7088 = vmatprep.subr.bf16.mxu1 %v9439_v29 }
 0x652   :  { %7132 = vmatpush1.bf16.msra.mxu0 %v9434_v59  ;;  %v5593_v59 = vrot.slane %v9950_v52, %v9819_v5 }
 0x653   :  { %7089 = vmatpush1.bf16.msra.mxu1 %v9437_v30  ;;  %7133 = vmatprep.subr.bf16.mxu0 %v9442_v60 }
 0x654   :  { %7090 = vmatprep.subr.bf16.mxu1 %v9445_v63 }
 0x655   :  { %v6850_v49 = vpop.f32.mrf.mxu1 }
 0x656   :  { %7134 = vmatpush2.bf16.msra.mxu0 %v9440_v1  ;;  %v6851_v30 = vadd.f32 %v6850_v49, %v5589_v56 }
 0x657   :  { %7091 = vmatpush2.bf16.msra.mxu1 %v9443_v2  ;;  %7135 = vmatprep.subr.bf16.mxu0 %v9448_v4  ;;  %v6852_v53 = vpop.f32.mrf.mxu1 }
 0x658   :  { %7092 = vmatprep.subr.bf16.mxu1 %v9451_v8 }
 0x659   :  { %v6854_v58 = vpop.f32.mrf.mxu1 }
 0x65a   :  { %7136 = vmatpush2.bf16.msra.mxu0 %v9446_v23  ;;  %v6855_v4 = vadd.f32 %v6854_v58, %v5589_v56 }
 0x65b   :  { %7093 = vmatpush2.bf16.msra.mxu1 %v9449_v10  ;;  %7137 = vmatprep.subr.bf16.mxu0 %v9454_v11  ;;  %v6856_v60 = vpop.f32.mrf.mxu1 }
 0x65c   :  { %7094 = vmatprep.subr.bf16.mxu1 %v9457_v12  ;;  %v6857_v12 = vadd.f32 %v6856_v60, %v5593_v59 }
 0x65e   :  { %7138 = vmatpush2.bf16.msra.mxu0 %v9452_v13 }
 0x65f   :  { %7095 = vmatpush2.bf16.msra.mxu1 %v9455_v14  ;;  %7139 = vmatprep.subr.bf16.mxu0 %v9460_v15 }
 0x660   :  { %7096 = vmatprep.subr.bf16.mxu1 %v9463_v16 }
 0x662   :  { %7140 = vmatpush2.bf16.msra.mxu0 %v9458_v18 }
 0x663   :  { %7097 = vmatpush2.bf16.msra.mxu1 %v9461_v19  ;;  %7141 = vmatprep.subr.bf16.mxu0 %v9466_v20 }
 0x664   :  { %7098 = vmatprep.subr.bf16.mxu1 %v9469_v21 }
 0x666   :  { %7142 = vmatpush2.bf16.msra.mxu0 %v9464_v6  ;;  %v5597_v6 = vrot.slane %v9950_v52, %v9839_v57 }
 0x667   :  { %7099 = vmatpush2.bf16.msra.mxu1 %v9467_v22  ;;  %7143 = vmatprep.subr.bf16.mxu0 %v9472_v51  ;;  %v5601_v22 = vrot.slane %v9950_v52, %v9836_v55 }
 0x668   :  { %7100 = vmatprep.subr.bf16.mxu1 %v9475_v0 }
 0x66a   :  { %7144 = vmatpush2.bf16.msra.mxu0 %v9470_v3 }
 0x66b   :  { %7101 = vmatpush2.bf16.msra.mxu1 %v9473_v9  ;;  %7145 = vmatprep.subr.bf16.mxu0 %v9478_v24 }
 0x66c   :  { %7102 = vmatprep.subr.bf16.mxu1 %v9481_v25 }
 0x66e   :  { %7146 = vmatpush2.bf16.msra.mxu0 %v9476_v26 }
 0x66f   :  { %7103 = vmatpush2.bf16.msra.mxu1 %v9479_v33  ;;  %7147 = vmatprep.subr.bf16.mxu0 %v9484_v34 }
 0x670   :  { %7104 = vmatprep.subr.bf16.mxu1 %v9487_v32 }
 0x672   :  { %7148 = vmatpush2.bf16.msra.mxu0 %v9482_v36 }
 0x673   :  { %7105 = vmatpush2.bf16.msra.mxu1 %v9485_v38 }
 0x674   :  { %7160 = vmatprep.subr.bf16.mxu1 %v9490_v39 }
 0x675   :  { %7150 = vmatmul.mubr.bf16.vlgmr.msra.gmra.mxu0 %v9926_v28  ;;  %v9505_v28 = vld [vmem:[#allocation10 + $0x674] ss:$24 sps:$4 sm:$0xff]  }
 0x676   :  { %7107 = vmatmul.mubr.bf16.vlgmr.msra.gmra.mxu1 %v9915_v50  ;;  %v9503_v50 = vld [vmem:[#allocation10 + $0x670] ss:$24 sps:$4 sm:$0xff]  }
 0x677   :  { %7161 = vmatpush1.bf16.msra.mxu1 %v9488_v41  ;;  %7192 = vmatprep.mubr.bf16.mxu1 %v9660_v40  ;;  %v9506_v40 = vld [vmem:[#allocation10 + $0x640] ss:$24 sps:$4 sm:$0xff]  }
 0x678   :  { %7162 = vmatprep.subr.bf16.mxu1 %v9493_v42 }
 0x67b   :  { %7163 = vmatpush1.bf16.msra.mxu1 %v9491_v43 }
 0x67c   :  { %7164 = vmatprep.subr.bf16.mxu1 %v9496_v35 }
 0x67f   :  { %7165 = vmatpush1.bf16.msra.mxu1 %v9494_v31 }
 0x680   :  { %7166 = vmatprep.subr.bf16.mxu1 %v9499_v44 }
 0x683   :  { %7167 = vmatpush1.bf16.msra.mxu1 %v9497_v45 }
 0x684   :  { %7168 = vmatprep.subr.bf16.mxu1 %v9502_v48  ;;  %v5608_v48 = vsub.s32 5, %v9811_v62 }
 0x687   :  { %7169 = vmatpush1.bf16.msra.mxu1 %v9500_v37 }
 0x688   :  { %7170 = vmatprep.subr.bf16.mxu1 %v9505_v28  ;;  %v5605_v28 = vrot.slane %v9950_v52, %v9853_v61 }
 0x68b   :  { %7171 = vmatpush1.bf16.msra.mxu1 %v9503_v50 }
 0x68c   :  { %7172 = vmatprep.subr.bf16.mxu1 %v9508_v46  ;;  %v5609_v46 = vrot.slane %v9950_v52, %v5608_v48 }
 0x68f   :  { %7173 = vmatpush1.bf16.msra.mxu1 %v9506_v40 }
 0x690   :  { %7174 = vmatprep.subr.bf16.mxu1 %v9511_v27 }
 0x693   :  { %7175 = vmatpush1.bf16.msra.mxu1 %v9509_v47 }
 0x695   :  { %v6893_v54 = vpop.f32.mrf.mxu0 }
 0x696   :  { %7193 = vmatmul.mubr.bf16.vlgmr.msra.gmra.mxu1 %v9933_v17  ;;  %v6853_v17 = vadd.f32 %v6852_v53, %v5593_v59  ;;  %v6894_v1 = vadd.f32 %v6893_v54, %v6851_v30 }
 0x697   :  { %v6895_v29 = vpop.f32.mrf.mxu0 }
 0x698   :  { %v6896_v8 = vadd.f32 %v6895_v29, %v6853_v17 }
 0x699   :  { %v6897_v63 = vpop.f32.mrf.mxu0 }
 0x69a   :  { %v6898_v13 = vadd.f32 %v6897_v63, %v6855_v4 }
 0x69b   :  { %v6899_v10 = vpop.f32.mrf.mxu0 }
 0x69c   :  { %v6900_v5 = vadd.f32 %v6899_v10, %v6857_v12 }
 0x6b6   :  { %v6936_v2 = vpop.f32.mrf.mxu1 }
 0x6b7   :  { %v6937_v23 = vadd.f32 %v6936_v2, %v6894_v1 }
 0x6b8   :  { %v6938_v11 = vpop.f32.mrf.mxu1 }
 0x6b9   :  { %7203 = vst [vmem:[%s10013_s13] sm:$0xff] %v6937_v23  ;;  %v6939_v7 = vadd.f32 %v6938_v11, %v6896_v8 }
 0x6ba   :  { %v6940_v14 = vpop.f32.mrf.mxu1 }
 0x6bb   :  { %7204 = vst [vmem:[%s10013_s13 + $0x8] sm:$0xff] %v6939_v7  ;;  %v6941_v15 = vadd.f32 %v6940_v14, %v6898_v13 }
 0x6bc   :  { %v6942_v16 = vpop.f32.mrf.mxu1 }
 0x6bd   :  { %7209 = vst [vmem:[%s10013_s13 + $0x30] sm:$0xff] %v6941_v15  ;;  %v6943_v18 = vadd.f32 %v6942_v16, %v6900_v5 }
 0x6bf   :  { %7210 = vst [vmem:[%s10013_s13 + $0x38] sm:$0xff] %v6943_v18 }
 0x6d5   :  { %v6979_v19 = vpop.f32.mrf.mxu0 }
 0x6d6   :  { %v6980_v0 = vadd.f32 %v6979_v19, %v5597_v6 }
 0x6d7   :  { %v6981_v20 = vpop.f32.mrf.mxu0 }
 0x6d8   :  { %v6982_v24 = vadd.f32 %v6981_v20, %v5601_v22 }
 0x6d9   :  { %v6983_v21 = vpop.f32.mrf.mxu0 }
 0x6da   :  { %v6984_v34 = vadd.f32 %v6983_v21, %v5597_v6 }
 0x6db   :  { %v6985_v51 = vpop.f32.mrf.mxu0 }
 0x6dc   :  { %v6986_v41 = vadd.f32 %v6985_v51, %v5601_v22 }
 0x6f5   :  { %v7065_v3 = vpop.f32.mrf.mxu0 }
 0x6f6   :  { %v7022_v9 = vpop.f32.mrf.mxu1 }
 0x6f7   :  { %v7023_v25 = vadd.f32 %v7022_v9, %v6980_v0  ;;  %v7067_v26 = vpop.f32.mrf.mxu0 }
 0x6f8   :  { %v7024_v33 = vpop.f32.mrf.mxu1 }
 0x6f9   :  { %v7066_v32 = vadd.f32 %v7065_v3, %v7023_v25  ;;  %v7025_v36 = vadd.f32 %v7024_v33, %v6982_v24  ;;  %v7069_v38 = vpop.f32.mrf.mxu0 }
 0x6fa   :  { %v7026_v39 = vpop.f32.mrf.mxu1 }
 0x6fb   :  { %7205 = vst [vmem:[%s10013_s13 + $0x10] sm:$0xff] %v7066_v32  ;;  %v7068_v57 = vadd.f32 %v7067_v26, %v7025_v36  ;;  %v7027_v55 = vadd.f32 %v7026_v39, %v6984_v34  ;;  %v7071_v31 = vpop.f32.mrf.mxu0 }
 0x6fc   :  { %v7028_v42 = vpop.f32.mrf.mxu1 }
 0x6fd   :  { %7206 = vst [vmem:[%s10013_s13 + $0x18] sm:$0xff] %v7068_v57  ;;  %v7070_v43 = vadd.f32 %v7069_v38, %v7027_v55  ;;  %v7029_v35 = vadd.f32 %v7028_v42, %v6986_v41 }
 0x6ff   :  { %7211 = vst [vmem:[%s10013_s13 + $0x40] sm:$0xff] %v7070_v43  ;;  %v7072_v44 = vadd.f32 %v7071_v31, %v7029_v35 }
 0x701   :  { %7212 = vst [vmem:[%s10013_s13 + $0x48] sm:$0xff] %v7072_v44 }
 0x735   :  { %v7151_v50 = vpop.f32.mrf.mxu0 }
 0x736   :  { %v7108_v45 = vpop.f32.mrf.mxu1 }
 0x737   :  { %v7109_v27 = vadd.f32 %v7108_v45, %v5605_v28  ;;  %v7153_v47 = vpop.f32.mrf.mxu0 }
 0x738   :  { %v7110_v37 = vpop.f32.mrf.mxu1 }
 0x739   :  { %v7111_v49 = vadd.f32 %v7110_v37, %v5609_v46  ;;  %v7152_v56 = vadd.f32 %v7151_v50, %v7109_v27  ;;  %v7155_v58 = vpop.f32.mrf.mxu0 }
 0x73a   :  { %v7112_v40 = vpop.f32.mrf.mxu1 }
 0x73b   :  { %v7113_v54 = vadd.f32 %v7112_v40, %v5605_v28  ;;  %v7154_v60 = vadd.f32 %v7153_v47, %v7111_v49  ;;  %v7157_v52 = vpop.f32.mrf.mxu0 }
 0x73c   :  { %v7114_v53 = vpop.f32.mrf.mxu1 }
 0x73d   :  { %v7115_v59 = vadd.f32 %v7114_v53, %v5609_v46  ;;  %v7156_v63 = vadd.f32 %v7155_v58, %v7113_v54 }
 0x73f   :  { %v7158_v2 = vadd.f32 %v7157_v52, %v7115_v59 }
 0x756   :  { %v7194_v29 = vpop.f32.mrf.mxu1 }
 0x757   :  { %v7195_v30 = vadd.f32 %v7194_v29, %v7152_v56 }
 0x758   :  { %v7196_v62 = vpop.f32.mrf.mxu1 }
 0x759   :  { %7207 = vst [vmem:[%s10013_s13 + $0x20] sm:$0xff] %v7195_v30  ;;  %v7197_v61 = vadd.f32 %v7196_v62, %v7154_v60 }
 0x75a   :  { %v7198_v17 = vpop.f32.mrf.mxu1 }
 0x75b   :  { %7208 = vst [vmem:[%s10013_s13 + $0x28] sm:$0xff] %v7197_v61  ;;  %v7199_v1 = vadd.f32 %v7198_v17, %v7156_v63 }
 0x75c   :  { %v7200_v4 = vpop.f32.mrf.mxu1 }
 0x75d   :  { %7213 = vst [vmem:[%s10013_s13 + $0x50] sm:$0xff] %v7199_v1  ;;  %v7201_v8 = vadd.f32 %v7200_v4, %v7158_v2 }
 0x75f   :  { %7214 = vst [vmem:[%s10013_s13 + $0x58] sm:$0xff] %v7201_v8 }
 0x760   :  { %7219 = vsyncpa [#allocation3], 1 }
 0x761   :  { %7220 = vsyncpa [#allocation5], 1 }
 0x762   :  { %7221 = vsyncpa [#allocation8], 1 }
 0x763   :  { %7222 = vsyncpa [#allocation11], 1 }

</bundles_post_ra>
